<compile_context>
chip_gen: v7x
topology: tpu7x:2x2x1
jax: 0.10.0
libtpu: 0.0.40
codegen_flags: <defaults>
</compile_context>

<pallas_src>
import functools

import numpy as np
import jax
import jax.numpy as jnp
from jax import lax
from jax.experimental import pallas as pl
from jax.experimental.pallas import tpu as pltpu


NUM_CLASSES = 5
MAX_EVENTS_PER_ENTRY = 8   # upper bound on distinct batch ids per list entry


# -----------------------------------------------------------------------------
# helpers
# -----------------------------------------------------------------------------
def _round_up(x, m):
    return ((x + m - 1) // m) * m


def _choose_tm(n_rows):
    # Big tiles amortize the ~0.35 us per-grid-step overhead; keep >= 2 grid
    # blocks along M when possible so both v7x TensorCores get work.
    tm = 512
    while tm > 128 and _round_up(n_rows, tm) // tm < 2:
        tm //= 2
    return tm


# -----------------------------------------------------------------------------
# Pallas kernel: fused per-point CE + accuracy + per-event segment reduction
# -----------------------------------------------------------------------------
def _seg_loss_kernel(logits_ref, labels_ref, weights_ref, bids_ref, o_ref,
                     *, num_classes, n_events):
    x = logits_ref[...].astype(jnp.float32)          # (tm, C)
    tm = x.shape[0]
    lbl = labels_ref[...]                            # (tm, 1) int32
    w = weights_ref[...]                             # (tm, 1) f32
    bid = bids_ref[...]                              # (1, tm) int32 (event ids)

    # --- per-point cross-entropy:  CE = logsumexp(x) - x[label] -------------
    cls = lax.broadcasted_iota(jnp.int32, (tm, num_classes), 1)
    m = jnp.max(x, axis=-1, keepdims=True)                                # (tm,1)
    lse = m + jnp.log(jnp.sum(jnp.exp(x - m), axis=-1, keepdims=True))    # (tm,1)
    picked = jnp.sum(jnp.where(cls == lbl, x, 0.0), axis=-1, keepdims=True)
    loss = lse - picked                                                   # (tm,1)

    # --- per-point accuracy flag (first-max argmax, matches torch) ----------
    cls_f = cls.astype(jnp.float32)
    pred = jnp.min(jnp.where(x >= m, cls_f, float(num_classes)),
                   axis=-1, keepdims=True)                                # (tm,1)
    correct = (pred == lbl.astype(jnp.float32)).astype(jnp.float32)       # (tm,1)

    wloss = loss * w                                                      # (tm,1)

    # --- pack per-point stats into a lane-dense (tm, 128) slab --------------
    # col 0: weight*loss, col 1: correct, col 2: point count, cols 3..127: 0
    col = lax.broadcasted_iota(jnp.int32, (tm, 128), 1)
    stats = (jnp.where(col == 0, wloss, 0.0)
             + jnp.where(col == 1, correct, 0.0)
             + jnp.where(col == 2, 1.0, 0.0))

    # --- per-event segment sum via one MXU matmul ----------------------------
    # one-hot(event) is built already transposed so this is a plain NN dot.
    # Padded points carry event id -1 -> all-zero one-hot column -> excluded.
    ev = lax.broadcasted_iota(jnp.int32, (n_events, tm), 0)
    onehot_t = (ev == bid).astype(jnp.float32)                            # (E, tm)
    o_ref[...] = jnp.dot(onehot_t, stats, preferred_element_type=jnp.float32)


def _segmented_ce_stats(logits, bids, labels, weights, n_events):
    """Per-event [sum(weight*CE), sum(correct), point_count] via one pallas_call."""
    n, c = logits.shape
    tm = _choose_tm(n)
    n_pad = _round_up(n, tm)
    e_pad = _round_up(max(n_events, 8), 8)
    pad = n_pad - n

    logits_p = jnp.pad(logits.astype(jnp.float32), ((0, pad), (0, 0)))
    labels_p = jnp.pad(labels.astype(jnp.int32).reshape(n, 1), ((0, pad), (0, 0)))
    weights_p = jnp.pad(weights.astype(jnp.float32).reshape(n, 1), ((0, pad), (0, 0)))
    bids_p = jnp.pad(bids.astype(jnp.int32).reshape(1, n), ((0, 0), (0, pad)),
                     constant_values=-1)

    nt = n_pad // tm
    kernel = functools.partial(_seg_loss_kernel, num_classes=c, n_events=e_pad)
    partials = pl.pallas_call(
        kernel,
        out_shape=jax.ShapeDtypeStruct((nt * e_pad, 128), jnp.float32),
        grid=(nt,),
        in_specs=[
            pl.BlockSpec((tm, c), lambda i: (i, 0)),   # logits row tile
            pl.BlockSpec((tm, 1), lambda i: (i, 0)),   # class labels
            pl.BlockSpec((tm, 1), lambda i: (i, 0)),   # per-point weights
            pl.BlockSpec((1, tm), lambda i: (0, i)),   # event ids (lane-oriented)
        ],
        out_specs=pl.BlockSpec((e_pad, 128), lambda i: (i, 0)),   # per-tile partial stats
        compiler_params=pltpu.CompilerParams(dimension_semantics=("parallel",)),
    )(logits_p, labels_p, weights_p, bids_p)

    stats = partials.reshape(nt, e_pad, 128).sum(axis=0)   # tiny cross-tile reduce
    return stats[:, 0], stats[:, 1], stats[:, 2]


# -----------------------------------------------------------------------------
# SegmentationLoss.forward equivalent
# -----------------------------------------------------------------------------
def segmentation_loss(outputs, label, weight=None,
                      max_events_per_entry=MAX_EVENTS_PER_ENTRY):
    segmentation = outputs['segmentation']
    assert len(segmentation) == len(label)

    logits_l, bids_l, labels_l, weights_l = [], [], [], []
    for i, (seg, lab) in enumerate(zip(segmentation, label)):
        b = lab[:, -2].astype(jnp.int32)
        y = lab[:, -1].astype(jnp.int32)
        if weight is None:
            w = jnp.ones((seg.shape[0],), jnp.float32)
        else:
            w = jnp.reshape(weight[i], (-1,)).astype(jnp.float32)
        logits_l.append(seg)
        bids_l.append(b + i * max_events_per_entry)   # globally unique event ids
        labels_l.append(y)
        weights_l.append(w)

    logits = jnp.concatenate(logits_l, axis=0)
    bids = jnp.concatenate(bids_l, axis=0)
    labels = jnp.concatenate(labels_l, axis=0)
    weights = jnp.concatenate(weights_l, axis=0)
    n_events = len(segmentation) * max_events_per_entry

    wloss_sum, correct_sum, count = _segmented_ce_stats(
        logits, bids, labels, weights, n_events)

    present = count > 0.5                          # events actually present (== .unique())
    safe = jnp.where(present, count, 1.0)
    ev_loss = jnp.where(present, wloss_sum / safe, 0.0)   # mean(loss * weight) per event
    ev_acc = jnp.where(present, correct_sum / safe, 0.0)  # accuracy per event
    n_present = jnp.sum(present.astype(jnp.float32))

    return {
        'loss': jnp.sum(ev_loss) / n_present,
        'accuracy': jnp.sum(ev_acc) / n_present,
    }


# -----------------------------------------------------------------------------
# numpy reference mirroring the PyTorch module (for correctness check)
# -----------------------------------------------------------------------------
def _reference_loss(outputs, label, weight):
    segmentation = outputs['segmentation']
    total_loss, total_acc, count = 0.0, 0.0, 0
    for i in range(len(segmentation)):
        seg = np.asarray(segmentation[i], dtype=np.float64)
        lab = np.asarray(label[i])
        bids = lab[:, -2].astype(np.int64)
        ys = lab[:, -1].astype(np.int64)
        w = None if weight is None else np.asarray(weight[i], dtype=np.float64).reshape(-1)
        for b in np.unique(bids):
            m = bids == b
            x, y = seg[m], ys[m]
            mx = x.max(axis=-1, keepdims=True)
            lse = mx[:, 0] + np.log(np.exp(x - mx).sum(axis=-1))
            loss = lse - x[np.arange(x.shape[0]), y]
            if w is not None:
                total_loss += float(np.mean(loss * w[m]))
            else:
                total_loss += float(np.mean(loss))
            total_acc += float((x.argmax(axis=-1) == y).mean())
            count += 1
    return {'loss': total_loss / count, 'accuracy': total_acc / count}


# -----------------------------------------------------------------------------
if __name__ == "__main__":
    key = jax.random.PRNGKey(0)
    keys = iter(jax.random.split(key, 32))

    num_entries = 2        # len(segmentation) == number of "GPUs"
    batch_size = 4         # events (distinct batch ids) per entry
    dim = 3
    n_points = [600, 452]  # points per entry (non-multiples of the tile -> padding path)

    segmentation, labels_list, weight_list = [], [], []
    for n in n_points:
        seg = jax.random.normal(next(keys), (n, NUM_CLASSES), dtype=jnp.float32)
        coords = jax.random.uniform(next(keys), (n, dim), dtype=jnp.float32) * 100.0
        bid = jax.random.randint(next(keys), (n, 1), 0, batch_size).astype(jnp.float32)
        cls = jax.random.randint(next(keys), (n, 1), 0, NUM_CLASSES).astype(jnp.float32)
        lab = jnp.concatenate([coords, bid, cls], axis=1)        # (n, dim + 2)
        w = jax.random.uniform(next(keys), (n, 1), dtype=jnp.float32) + 0.5
        segmentation.append(seg)
        labels_list.append(lab)
        weight_list.append(w)

    outputs = {'segmentation': segmentation}

    # unweighted (default) and weighted paths
    res = segmentation_loss(outputs, labels_list)
    res_w = segmentation_loss(outputs, labels_list, weight=weight_list)
    jax.block_until_ready(res['loss'])
    jax.block_until_ready(res_w['loss'])

    ref = _reference_loss(outputs, labels_list, None)
    ref_w = _reference_loss(outputs, labels_list, weight_list)
    np.testing.assert_allclose(float(res['loss']), ref['loss'], rtol=1e-4, atol=1e-5)
    np.testing.assert_allclose(float(res['accuracy']), ref['accuracy'], rtol=1e-4, atol=1e-5)
    np.testing.assert_allclose(float(res_w['loss']), ref_w['loss'], rtol=1e-4, atol=1e-5)
    np.testing.assert_allclose(float(res_w['accuracy']), ref_w['accuracy'], rtol=1e-4, atol=1e-5)

    print("KERNEL_OK")
</pallas_src>

<mosaic_0001>
module attributes {stable_mosaic.version = 11 : i64} {
  func.func @_seg_loss_kernel(%arg0: i32, %arg1: memref<512x5xf32, #tpu.memory_space<vmem>>, %arg2: memref<512x1xi32, #tpu.memory_space<vmem>>, %arg3: memref<512x1xf32, #tpu.memory_space<vmem>>, %arg4: memref<1x512xi32, #tpu.memory_space<vmem>>, %arg5: memref<16x128xf32, #tpu.memory_space<vmem>>) attributes {dimension_semantics = [#tpu.dimension_semantics<parallel>], iteration_bounds = array<i64: 3>, scalar_prefetch = 0 : i64, scratch_operands = 0 : i64, tpu.core_type = #tpu.core_type<tc>, window_params = [{transform_indices = @transform_0, window_bounds = array<i64: 512, 5>}, {transform_indices = @transform_1, window_bounds = array<i64: 512, 1>}, {transform_indices = @transform_2, window_bounds = array<i64: 512, 1>}, {transform_indices = @transform_3, window_bounds = array<i64: 1, 512>}, {transform_indices = @transform_4, window_bounds = array<i64: 16, 128>}]} {
    %c0 = arith.constant 0 : index
    %c0_0 = arith.constant 0 : index
    %0 = vector.load %arg1[%c0, %c0_0] : memref<512x5xf32, #tpu.memory_space<vmem>>, vector<512x5xf32>
    %c0_1 = arith.constant 0 : index
    %c0_2 = arith.constant 0 : index
    %1 = vector.load %arg2[%c0_1, %c0_2] : memref<512x1xi32, #tpu.memory_space<vmem>>, vector<512x1xi32>
    %c0_3 = arith.constant 0 : index
    %c0_4 = arith.constant 0 : index
    %2 = vector.load %arg3[%c0_3, %c0_4] : memref<512x1xf32, #tpu.memory_space<vmem>>, vector<512x1xf32>
    %c0_5 = arith.constant 0 : index
    %c0_6 = arith.constant 0 : index
    %3 = vector.load %arg4[%c0_5, %c0_6] : memref<1x512xi32, #tpu.memory_space<vmem>>, vector<1x512xi32>
    %4 = tpu.iota {dimensions = array<i32: 1>} : vector<512x5xi32>
    %cst = arith.constant dense<0xFF800000> : vector<512xf32>
    %5 = vector.multi_reduction <maximumf>, %0, %cst [1] : vector<512x5xf32> to vector<512xf32>
    %6 = vector.shape_cast %5 : vector<512xf32> to vector<512x1xf32>
    %7 = vector.broadcast %6 : vector<512x1xf32> to vector<512x5xf32>
    %8 = arith.subf %0, %7 : vector<512x5xf32>
    %9 = math.exp %8 : vector<512x5xf32>
    %cst_7 = arith.constant dense<0.000000e+00> : vector<512xf32>
    %10 = vector.multi_reduction <add>, %9, %cst_7 [1] : vector<512x5xf32> to vector<512xf32>
    %11 = vector.shape_cast %10 : vector<512xf32> to vector<512x1xf32>
    %12 = math.log %11 : vector<512x1xf32>
    %13 = arith.addf %6, %12 : vector<512x1xf32>
    %14 = vector.broadcast %1 : vector<512x1xi32> to vector<512x5xi32>
    %15 = arith.cmpi eq, %4, %14 : vector<512x5xi32>
    %cst_8 = arith.constant 0.000000e+00 : f32
    %16 = vector.broadcast %cst_8 : f32 to vector<512x5xf32>
    %17 = arith.select %15, %0, %16 : vector<512x5xi1>, vector<512x5xf32>
    %cst_9 = arith.constant dense<0.000000e+00> : vector<512xf32>
    %18 = vector.multi_reduction <add>, %17, %cst_9 [1] : vector<512x5xf32> to vector<512xf32>
    %19 = vector.shape_cast %18 : vector<512xf32> to vector<512x1xf32>
    %20 = arith.subf %13, %19 : vector<512x1xf32>
    %21 = arith.sitofp %4 : vector<512x5xi32> to vector<512x5xf32>
    %22 = vector.broadcast %6 : vector<512x1xf32> to vector<512x5xf32>
    %23 = arith.cmpf oge, %0, %22 : vector<512x5xf32>
    %cst_10 = arith.constant 5.000000e+00 : f32
    %24 = vector.broadcast %cst_10 : f32 to vector<512x5xf32>
    %25 = arith.select %23, %21, %24 : vector<512x5xi1>, vector<512x5xf32>
    %cst_11 = arith.constant dense<0x7F800000> : vector<512xf32>
    %26 = vector.multi_reduction <minimumf>, %25, %cst_11 [1] : vector<512x5xf32> to vector<512xf32>
    %27 = vector.shape_cast %26 : vector<512xf32> to vector<512x1xf32>
    %28 = arith.sitofp %1 : vector<512x1xi32> to vector<512x1xf32>
    %29 = arith.cmpf oeq, %27, %28 : vector<512x1xf32>
    %30 = arith.extui %29 : vector<512x1xi1> to vector<512x1xi32>
    %31 = arith.sitofp %30 : vector<512x1xi32> to vector<512x1xf32>
    %32 = arith.mulf %20, %2 : vector<512x1xf32>
    %33 = tpu.iota {dimensions = array<i32: 1>} : vector<512x128xi32>
    %c0_i32 = arith.constant 0 : i32
    %34 = vector.broadcast %c0_i32 : i32 to vector<512x128xi32>
    %35 = arith.cmpi eq, %33, %34 : vector<512x128xi32>
    %cst_12 = arith.constant 0.000000e+00 : f32
    %36 = vector.shape_cast %32 : vector<512x1xf32> to vector<512x1xf32>
    %37 = vector.broadcast %36 : vector<512x1xf32> to vector<512x128xf32>
    %38 = vector.broadcast %cst_12 : f32 to vector<512x128xf32>
    %39 = arith.select %35, %37, %38 : vector<512x128xi1>, vector<512x128xf32>
    %c1_i32 = arith.constant 1 : i32
    %40 = vector.broadcast %c1_i32 : i32 to vector<512x128xi32>
    %41 = arith.cmpi eq, %33, %40 : vector<512x128xi32>
    %cst_13 = arith.constant 0.000000e+00 : f32
    %42 = vector.shape_cast %31 : vector<512x1xf32> to vector<512x1xf32>
    %43 = vector.broadcast %42 : vector<512x1xf32> to vector<512x128xf32>
    %44 = vector.broadcast %cst_13 : f32 to vector<512x128xf32>
    %45 = arith.select %41, %43, %44 : vector<512x128xi1>, vector<512x128xf32>
    %46 = arith.addf %39, %45 : vector<512x128xf32>
    %c2_i32 = arith.constant 2 : i32
    %47 = vector.broadcast %c2_i32 : i32 to vector<512x128xi32>
    %48 = arith.cmpi eq, %33, %47 : vector<512x128xi32>
    %cst_14 = arith.constant 1.000000e+00 : f32
    %cst_15 = arith.constant 0.000000e+00 : f32
    %49 = vector.broadcast %cst_14 : f32 to vector<512x128xf32>
    %50 = vector.broadcast %cst_15 : f32 to vector<512x128xf32>
    %51 = arith.select %48, %49, %50 : vector<512x128xi1>, vector<512x128xf32>
    %52 = arith.addf %46, %51 : vector<512x128xf32>
    %53 = tpu.iota {dimensions = array<i32: 0>} : vector<16x512xi32>
    %54 = vector.broadcast %3 : vector<1x512xi32> to vector<16x512xi32>
    %55 = arith.cmpi eq, %53, %54 : vector<16x512xi32>
    %56 = arith.extui %55 : vector<16x512xi1> to vector<16x512xi32>
    %57 = arith.sitofp %56 : vector<16x512xi32> to vector<16x512xf32>
    %cst_16 = arith.constant dense<0.000000e+00> : vector<16x128xf32>
    %58 = tpu.matmul %57, %52, %cst_16 {dimension_numbers = #tpu.dot_dimension_numbers<[1], [0], [0], [1], [0, 0, 1, 1], [], []>} : vector<16x512xf32>, vector<512x128xf32>, vector<16x128xf32> -> vector<16x128xf32>
    %c0_17 = arith.constant 0 : index
    %c0_18 = arith.constant 0 : index
    %59 = vector.load %arg5[%c0_17, %c0_18] : memref<16x128xf32, #tpu.memory_space<vmem>>, vector<16x128xf32>
    tpu.vector_store %arg5[%c0_17, %c0_18], %58 {strides = array<i32>} : memref<16x128xf32, #tpu.memory_space<vmem>>, vector<16x128xf32>,
    return
  }
  func.func @transform_0(%arg0: i32) -> (i32, i32) {
    %c0_i32 = arith.constant 0 : i32
    %c0_i32_0 = arith.constant 0 : i32
    return %arg0, %c0_i32 : i32, i32
  }
  func.func @transform_1(%arg0: i32) -> (i32, i32) {
    %c0_i32 = arith.constant 0 : i32
    %c0_i32_0 = arith.constant 0 : i32
    return %arg0, %c0_i32 : i32, i32
  }
  func.func @transform_2(%arg0: i32) -> (i32, i32) {
    %c0_i32 = arith.constant 0 : i32
    %c0_i32_0 = arith.constant 0 : i32
    return %arg0, %c0_i32 : i32, i32
  }
  func.func @transform_3(%arg0: i32) -> (i32, i32) {
    %c0_i32 = arith.constant 0 : i32
    %c0_i32_0 = arith.constant 0 : i32
    return %c0_i32, %arg0 : i32, i32
  }
  func.func @transform_4(%arg0: i32) -> (i32, i32) {
    %c0_i32 = arith.constant 0 : i32
    %c0_i32_0 = arith.constant 0 : i32
    return %arg0, %c0_i32 : i32, i32
  }
}

</mosaic_0001>

<bundles_post_ra>
// kernel: tpu_custom_call.1
= control target key start
LH: loop header
LB: loop body
LE: loop exit
PB: predicated region body
PF: predicated region fallthrough
CT: control target
= control target key end

     0   :  { %9 = vsyncpa [#allocation3], 0  ;;  %s7597_s0 = inlined_call_operand.vmem [shape: f32[1536,5], index: 0, kind: input, shape index: {}]   ;;  %s7598_s1 = inlined_call_operand.vmem [shape: s32[1536,1], index: 1, kind: input, shape index: {}]   ;;  %s7599_s2 = inlined_call_operand.vmem [shape: f32[1536,1], index: 2, kind: input, shape index: {}]   ;;  %s7600_s3 = inlined_call_operand.vmem [shape: s32[1,1536], index: 3, kind: input, shape index: {}]   ;;  %s7601_s4 = inlined_call_operand.hbm [shape: f32[48,128], index: 4, kind: output, shape index: {}]  }
   0x1   :  { %11 = vsyncpa [#allocation3 + $0x1], 0  ;;  %s4570_s15 = smov 0   ;;  %s4572_s16 = smov 0  }
   0x2   :  { %s4574_s17 = smov 0   ;;  %s4576_s18 = smov 0  }
   0x3 LB: > { %s4591_s19 = sadd.s32 4294967295, %s4537_s18   ;;  %s3647_s20 = sadd.s32 4294967294, %s4537_s18   ;;  %s4537_s18 = sphi %s4576_s18, %s8233_s18   ;;  %s4533_s17 = sphi %s4574_s17, %s8232_s17   ;;  %s4529_s16 = sphi %s4572_s16, %s8231_s16   ;;  %s4525_s15 = sphi %s4570_s15, %s8230_s15  }
   0x4   : > { %s4595_s21 = sadd.s32 1, %s4537_s18   ;;  %s128_s22 = sadd.s32 1, %s4533_s17 }
   0x5   : > { %s125_s23 = ssub.s32 %s4537_s18, %s4595_s21  ;;  %p138_p0 = scmp.ne.s32.totalorder %s4533_s17, %s4529_s16 }
   0x6   : > { %p126_p1 = scmp.eq.s32.totalorder %s125_s23, 0  ;;  %p139_p2 = scmp.eq.s32.totalorder %s4591_s19, 2 }
   0x7   : > { %p144_p3 = scmp.ne.s32.totalorder %s4529_s16, %s4525_s15  ;;  %p145_p4 = scmp.eq.s32.totalorder %s3647_s20, 2 }
   0x8   : > { %s4606_s24 = scalar_select %p126_p1, %s4533_s17, %s128_s22  }
   0x9   : > { %p4608_p5 = por %p139_p2, %p138_p0  ;;  %p4612_p6 = por %p145_p4, %p144_p3 }
   0xa   : > { %p3650_p7 = scmp.ge.s32.totalorder %s4537_s18, 1  ;;  %p198_p8 = scmp.lt.s32.totalorder %s4537_s18, 4 }
   0xc   : > { %p199_p9 = pnand %p3650_p7, %p198_p8 }
   0xe   : > { %202 = sbr.rel (%p199_p9) target bundleno = 1338 (0x53a), region = 36 }
  0x15   : > { %s3652_s27 = sshll.u32 %s4591_s19, 6  ;;  %vm457_vm0 = vcmask 39936   ;;  %s3658_s12 = sshll.u32 %s4591_s19, 2 }
  0x16   : > { %p239_p10 = scmp.lt.s32.totalorder %s3652_s27, 191  ;;  %p257_p11 = scmp.lt.s32.totalorder %s3658_s12, 11 }
  0x17   : > { %s235_s22 = sand.u32 1, %s4529_s16   ;;  %s3744_s29 = sshll.u32 %s4591_s19, 8 }
  0x18   : > { %s8235_s27 = smov (!%p239_p10, %s3652_s27), 191  ;;  %s8237_s12 = smov (!%p257_p11, %s3658_s12), 11 }
  0x19   : > { %s4619_s28 = sshll.u32 %s8235_s27, 3  ;;  %s259_s20 = scalar_lea.vmem %s7600_s3, %s8237_s12 }
  0x1a   : > { %s4625_s5 = scalar_lea.vmem %s7597_s0, %s4619_s28  ;;  %s5271_s8 = scalar_lea.vmem %s7598_s1, %s4619_s28 }
  0x1b   : > { %v4628_v0 = vld [vmem:[%s4625_s5] sm:$0xff]  ;;  %v4631_v1 = vld [vmem:[%s4625_s5 + $0x10] sm:$0xff]  ;;  %v4634_v2 = vld [vmem:[%s4625_s5 + $0x8] sm:$0xff]  ;;  %s6306_s11 = scalar_lea.vmem %s7599_s2, %s4619_s28  ;;  %s3651_s23 = sshll.u32 %s235_s22, 4 }
  0x1c   : > { %v458_v3 = vsel %vm457_vm0, %v4628_v0, -inf  ;;  %v464_v4 = vsel %vm457_vm0, %v4631_v1, -inf  ;;  %v4641_v5 = vld [vmem:[%s4625_s5 + $0x18] sm:$0xff]  ;;  %v461_v6 = vsel %vm457_vm0, %v4634_v2, -inf  ;;  %v4648_v8 = vld [vmem:[%s4625_s5 + $0x20] sm:$0xff]  ;;  %v4651_v9 = vld [vmem:[%s4625_s5 + $0x28] sm:$0xff]  ;;  %s7554_s6 = scalar_lea.hbm %s7601_s4, %s3744_s29 }
  0x1d   : > { %459 = vmax.xlane.f32.xlu0 %v458_v3  ;;  %465 = vmax.xlane.f32.xlu1 %v464_v4  ;;  %v467_v7 = vsel %vm457_vm0, %v4641_v5, -inf  ;;  %v470_v10 = vsel %vm457_vm0, %v4648_v8, -inf  ;;  %v473_v11 = vsel %vm457_vm0, %v4651_v9, -inf  ;;  %v4658_v12 = vld [vmem:[%s4625_s5 + $0x30] sm:$0xff]  ;;  %v4661_v13 = vld [vmem:[%s4625_s5 + $0x38] sm:$0xff]  ;;  %v4668_v16 = vld [vmem:[%s4625_s5 + $0x40] sm:$0xff] }
  0x1e   : > { %v476_v14 = vsel %vm457_vm0, %v4658_v12, -inf  ;;  %v479_v15 = vsel %vm457_vm0, %v4661_v13, -inf  ;;  %v4671_v17 = vld [vmem:[%s4625_s5 + $0x48] sm:$0xff]  ;;  %v482_v18 = vsel %vm457_vm0, %v4668_v16, -inf  ;;  %v4678_v20 = vld [vmem:[%s4625_s5 + $0x50] sm:$0xff]  ;;  %v4681_v21 = vld [vmem:[%s4625_s5 + $0x58] sm:$0xff] }
  0x1f   : > { %v485_v19 = vsel %vm457_vm0, %v4671_v17, -inf  ;;  %v488_v22 = vsel %vm457_vm0, %v4678_v20, -inf  ;;  %v491_v23 = vsel %vm457_vm0, %v4681_v21, -inf  ;;  %v4688_v24 = vld [vmem:[%s4625_s5 + $0x60] sm:$0xff]  ;;  %v4691_v25 = vld [vmem:[%s4625_s5 + $0x68] sm:$0xff]  ;;  %v4698_v28 = vld [vmem:[%s4625_s5 + $0x70] sm:$0xff] }
  0x20   : > { %v494_v26 = vsel %vm457_vm0, %v4688_v24, -inf  ;;  %v497_v27 = vsel %vm457_vm0, %v4691_v25, -inf  ;;  %v4701_v29 = vld [vmem:[%s4625_s5 + $0x78] sm:$0xff]  ;;  %v500_v30 = vsel %vm457_vm0, %v4698_v28, -inf  ;;  %v4708_v32 = vld [vmem:[%s4625_s5 + $0x80] sm:$0xff]  ;;  %v4711_v33 = vld [vmem:[%s4625_s5 + $0x88] sm:$0xff] }
  0x21   : > { %462 = vmax.xlane.f32.xlu0 %v461_v6  ;;  %468 = vmax.xlane.f32.xlu1 %v467_v7  ;;  %v503_v31 = vsel %vm457_vm0, %v4701_v29, -inf  ;;  %v506_v34 = vsel %vm457_vm0, %v4708_v32, -inf  ;;  %v509_v35 = vsel %vm457_vm0, %v4711_v33, -inf  ;;  %v4718_v36 = vld [vmem:[%s4625_s5 + $0x90] sm:$0xff]  ;;  %v4721_v37 = vld [vmem:[%s4625_s5 + $0x98] sm:$0xff]  ;;  %v4728_v40 = vld [vmem:[%s4625_s5 + $0xa0] sm:$0xff] }
  0x22   : > { %v512_v38 = vsel %vm457_vm0, %v4718_v36, -inf  ;;  %v515_v39 = vsel %vm457_vm0, %v4721_v37, -inf  ;;  %v4731_v41 = vld [vmem:[%s4625_s5 + $0xa8] sm:$0xff]  ;;  %v518_v42 = vsel %vm457_vm0, %v4728_v40, -inf  ;;  %v4738_v44 = vld [vmem:[%s4625_s5 + $0xb0] sm:$0xff]  ;;  %v4741_v45 = vld [vmem:[%s4625_s5 + $0xb8] sm:$0xff] }
  0x23   : > { %v521_v43 = vsel %vm457_vm0, %v4731_v41, -inf  ;;  %v524_v46 = vsel %vm457_vm0, %v4738_v44, -inf  ;;  %v527_v47 = vsel %vm457_vm0, %v4741_v45, -inf  ;;  %v4748_v48 = vld [vmem:[%s4625_s5 + $0xc0] sm:$0xff]  ;;  %v4751_v49 = vld [vmem:[%s4625_s5 + $0xc8] sm:$0xff]  ;;  %v4758_v52 = vld [vmem:[%s4625_s5 + $0xd0] sm:$0xff] }
  0x24   : > { %v530_v50 = vsel %vm457_vm0, %v4748_v48, -inf  ;;  %v533_v51 = vsel %vm457_vm0, %v4751_v49, -inf  ;;  %v4761_v53 = vld [vmem:[%s4625_s5 + $0xd8] sm:$0xff]  ;;  %v536_v54 = vsel %vm457_vm0, %v4758_v52, -inf  ;;  %v4768_v56 = vld [vmem:[%s4625_s5 + $0xe0] sm:$0xff]  ;;  %v4771_v57 = vld [vmem:[%s4625_s5 + $0xe8] sm:$0xff] }
  0x25   : > { %471 = vmax.xlane.f32.xlu0 %v470_v10  ;;  %474 = vmax.xlane.f32.xlu1 %v473_v11  ;;  %v539_v55 = vsel %vm457_vm0, %v4761_v53, -inf  ;;  %v542_v58 = vsel %vm457_vm0, %v4768_v56, -inf  ;;  %v545_v59 = vsel %vm457_vm0, %v4771_v57, -inf  ;;  %v4778_v60 = vld [vmem:[%s4625_s5 + $0xf0] sm:$0xff]  ;;  %v4781_v61 = vld [vmem:[%s4625_s5 + $0xf8] sm:$0xff]  ;;  %v4788_v3 = vld [vmem:[%s4625_s5 + $0x100] sm:$0xff] }
  0x26   : > { %v548_v62 = vsel %vm457_vm0, %v4778_v60, -inf  ;;  %v551_v63 = vsel %vm457_vm0, %v4781_v61, -inf  ;;  %v4791_v4 = vld [vmem:[%s4625_s5 + $0x108] sm:$0xff]  ;;  %v554_v6 = vsel %vm457_vm0, %v4788_v3, -inf  ;;  %v4798_v10 = vld [vmem:[%s4625_s5 + $0x110] sm:$0xff]  ;;  %v4801_v11 = vld [vmem:[%s4625_s5 + $0x118] sm:$0xff] }
  0x27   : > { %v557_v7 = vsel %vm457_vm0, %v4791_v4, -inf  ;;  %s237_s27 = scalar_lea.vmem [#allocation2], %s3651_s23  ;;  %s7556_s7 = scalar_lea.sflag [#allocation3], %s235_s22 }
  0x28   : > { %s3552_s28 = sshll.u32 %s237_s27, 4  ;;  %s4542_s19 = smov [#allocation2]   ;;  %s7549_s28 = int_to_ptr.vmem [resolvable:$true] %s3552_s28 }
  0x29   : > { %477 = vmax.xlane.f32.xlu0 %v476_v14  ;;  %480 = vmax.xlane.f32.xlu1 %v479_v15  ;;  %v560_v14 = vsel %vm457_vm0, %v4798_v10, -inf  ;;  %v563_v15 = vsel %vm457_vm0, %v4801_v11, -inf  ;;  %s4479_s9 = sshll.u32 %s4542_s19, 4  ;;  %s4480_s9 = int_to_ptr.vmem [resolvable:$false] %s4479_s9 }
  0x2a   : > { %s4481_s10 = scalar_lea.vmem %s4480_s9, 512  ;;  %p4482_p1 = scmp.lt.s32.totalorder %s7549_s28, %s4480_s9 }
  0x2d   : > { %483 = vmax.xlane.f32.xlu0 %v482_v18  ;;  %486 = vmax.xlane.f32.xlu1 %v485_v19  ;;  %v4808_v18 = vld [vmem:[%s4625_s5 + $0x120] sm:$0xff]  ;;  %v4811_v19 = vld [vmem:[%s4625_s5 + $0x128] sm:$0xff] }
  0x31   : > { %489 = vmax.xlane.f32.xlu0 %v488_v22  ;;  %492 = vmax.xlane.f32.xlu1 %v491_v23  ;;  %v566_v22 = vsel %vm457_vm0, %v4808_v18, -inf  ;;  %v569_v23 = vsel %vm457_vm0, %v4811_v19, -inf }
  0x35   : > { %495 = vmax.xlane.f32.xlu0 %v494_v26  ;;  %498 = vmax.xlane.f32.xlu1 %v497_v27  ;;  %v4818_v26 = vld [vmem:[%s4625_s5 + $0x130] sm:$0xff]  ;;  %v4821_v27 = vld [vmem:[%s4625_s5 + $0x138] sm:$0xff] }
  0x39   : > { %501 = vmax.xlane.f32.xlu0 %v500_v30  ;;  %504 = vmax.xlane.f32.xlu1 %v503_v31  ;;  %v572_v30 = vsel %vm457_vm0, %v4818_v26, -inf  ;;  %v575_v31 = vsel %vm457_vm0, %v4821_v27, -inf }
  0x3d   : > { %507 = vmax.xlane.f32.xlu0 %v506_v34  ;;  %510 = vmax.xlane.f32.xlu1 %v509_v35  ;;  %v4828_v34 = vld [vmem:[%s4625_s5 + $0x140] sm:$0xff]  ;;  %v4831_v35 = vld [vmem:[%s4625_s5 + $0x148] sm:$0xff] }
  0x41   : > { %513 = vmax.xlane.f32.xlu0 %v512_v38  ;;  %516 = vmax.xlane.f32.xlu1 %v515_v39  ;;  %v578_v38 = vsel %vm457_vm0, %v4828_v34, -inf  ;;  %v581_v39 = vsel %vm457_vm0, %v4831_v35, -inf }
  0x45   : > { %519 = vmax.xlane.f32.xlu0 %v518_v42  ;;  %522 = vmax.xlane.f32.xlu1 %v521_v43  ;;  %v4838_v42 = vld [vmem:[%s4625_s5 + $0x150] sm:$0xff]  ;;  %v4841_v43 = vld [vmem:[%s4625_s5 + $0x158] sm:$0xff] }
  0x49   : > { %525 = vmax.xlane.f32.xlu0 %v524_v46  ;;  %528 = vmax.xlane.f32.xlu1 %v527_v47  ;;  %v584_v46 = vsel %vm457_vm0, %v4838_v42, -inf  ;;  %v587_v47 = vsel %vm457_vm0, %v4841_v43, -inf }
  0x4d   : > { %531 = vmax.xlane.f32.xlu0 %v530_v50  ;;  %534 = vmax.xlane.f32.xlu1 %v533_v51  ;;  %v4848_v50 = vld [vmem:[%s4625_s5 + $0x160] sm:$0xff]  ;;  %v4851_v51 = vld [vmem:[%s4625_s5 + $0x168] sm:$0xff] }
  0x51   : > { %537 = vmax.xlane.f32.xlu0 %v536_v54  ;;  %540 = vmax.xlane.f32.xlu1 %v539_v55  ;;  %v590_v54 = vsel %vm457_vm0, %v4848_v50, -inf  ;;  %v593_v55 = vsel %vm457_vm0, %v4851_v51, -inf }
  0x55   : > { %543 = vmax.xlane.f32.xlu0 %v542_v58  ;;  %546 = vmax.xlane.f32.xlu1 %v545_v59  ;;  %v4858_v58 = vld [vmem:[%s4625_s5 + $0x170] sm:$0xff]  ;;  %v4861_v59 = vld [vmem:[%s4625_s5 + $0x178] sm:$0xff] }
  0x59   : > { %549 = vmax.xlane.f32.xlu0 %v548_v62  ;;  %552 = vmax.xlane.f32.xlu1 %v551_v63  ;;  %v596_v62 = vsel %vm457_vm0, %v4858_v58, -inf  ;;  %v599_v63 = vsel %vm457_vm0, %v4861_v59, -inf }
  0x5d   : > { %555 = vmax.xlane.f32.xlu0 %v554_v6  ;;  %558 = vmax.xlane.f32.xlu1 %v557_v7  ;;  %v4868_v6 = vld [vmem:[%s4625_s5 + $0x180] sm:$0xff]  ;;  %v4871_v7 = vld [vmem:[%s4625_s5 + $0x188] sm:$0xff] }
  0x61   : > { %561 = vmax.xlane.f32.xlu0 %v560_v14  ;;  %564 = vmax.xlane.f32.xlu1 %v563_v15  ;;  %v602_v14 = vsel %vm457_vm0, %v4868_v6, -inf  ;;  %v605_v15 = vsel %vm457_vm0, %v4871_v7, -inf }
  0x65   : > { %567 = vmax.xlane.f32.xlu0 %v566_v22  ;;  %570 = vmax.xlane.f32.xlu1 %v569_v23  ;;  %v4878_v22 = vld [vmem:[%s4625_s5 + $0x190] sm:$0xff]  ;;  %v4881_v23 = vld [vmem:[%s4625_s5 + $0x198] sm:$0xff] }
  0x69   : > { %573 = vmax.xlane.f32.xlu0 %v572_v30  ;;  %576 = vmax.xlane.f32.xlu1 %v575_v31  ;;  %v608_v30 = vsel %vm457_vm0, %v4878_v22, -inf  ;;  %v611_v31 = vsel %vm457_vm0, %v4881_v23, -inf }
  0x6d   : > { %579 = vmax.xlane.f32.xlu0 %v578_v38  ;;  %582 = vmax.xlane.f32.xlu1 %v581_v39  ;;  %v4888_v38 = vld [vmem:[%s4625_s5 + $0x1a0] sm:$0xff]  ;;  %v4891_v39 = vld [vmem:[%s4625_s5 + $0x1a8] sm:$0xff] }
  0x6e   : > { %7752 = vst [vmem:[#allocation5_spill] sm:$0xff] %v4888_v38  ;;  %7753 = vst [vmem:[#allocation6_spill] sm:$0xff] %v4891_v39 }
  0x71   : > { %585 = vmax.xlane.f32.xlu0 %v584_v46  ;;  %588 = vmax.xlane.f32.xlu1 %v587_v47  ;;  %v614_v46 = vsel %vm457_vm0, %v4888_v38, -inf  ;;  %v617_v47 = vsel %vm457_vm0, %v4891_v39, -inf }
  0x75   : > { %591 = vmax.xlane.f32.xlu0 %v590_v54  ;;  %594 = vmax.xlane.f32.xlu1 %v593_v55  ;;  %v4898_v54 = vld [vmem:[%s4625_s5 + $0x1b0] sm:$0xff]  ;;  %v4901_v55 = vld [vmem:[%s4625_s5 + $0x1b8] sm:$0xff] }
  0x76   : > { %7754 = vst [vmem:[#allocation7_spill] sm:$0xff] %v4898_v54  ;;  %7755 = vst [vmem:[#allocation8_spill] sm:$0xff] %v4901_v55 }
  0x79   : > { %597 = vmax.xlane.f32.xlu0 %v596_v62  ;;  %600 = vmax.xlane.f32.xlu1 %v599_v63  ;;  %v620_v62 = vsel %vm457_vm0, %v4898_v54, -inf  ;;  %v623_v63 = vsel %vm457_vm0, %v4901_v55, -inf  ;;  %v4931_v54 = vld [vmem:[%s4625_s5 + $0x1e8] sm:$0xff] }
  0x7a   : > { %7761 = vst [vmem:[#allocation14_spill] sm:$0xff] %v4931_v54 }
  0x7d   : > { %603 = vmax.xlane.f32.xlu0 %v602_v14  ;;  %606 = vmax.xlane.f32.xlu1 %v605_v15  ;;  %v4908_v14 = vld [vmem:[%s4625_s5 + $0x1c0] sm:$0xff]  ;;  %v4911_v15 = vld [vmem:[%s4625_s5 + $0x1c8] sm:$0xff] }
  0x7e   : > { %7756 = vst [vmem:[#allocation9_spill] sm:$0xff] %v4908_v14  ;;  %7757 = vst [vmem:[#allocation10_spill] sm:$0xff] %v4911_v15 }
  0x81   : > { %609 = vmax.xlane.f32.xlu0 %v608_v30  ;;  %612 = vmax.xlane.f32.xlu1 %v611_v31  ;;  %v626_v30 = vsel %vm457_vm0, %v4908_v14, -inf  ;;  %v629_v31 = vsel %vm457_vm0, %v4911_v15, -inf  ;;  %v641_v14 = vsel %vm457_vm0, %v4931_v54, -inf }
  0x85   : > { %615 = vmax.xlane.f32.xlu0 %v614_v46  ;;  %618 = vmax.xlane.f32.xlu1 %v617_v47  ;;  %v4918_v46 = vld [vmem:[%s4625_s5 + $0x1d0] sm:$0xff]  ;;  %v4921_v47 = vld [vmem:[%s4625_s5 + $0x1d8] sm:$0xff] }
  0x86   : > { %7758 = vst [vmem:[#allocation11_spill] sm:$0xff] %v4918_v46  ;;  %7759 = vst [vmem:[#allocation12_spill] sm:$0xff] %v4921_v47  ;;  %v632_v55 = vsel %vm457_vm0, %v4918_v46, -inf }
  0x89   : > { %621 = vmax.xlane.f32.xlu0 %v620_v62  ;;  %624 = vmax.xlane.f32.xlu1 %v623_v63  ;;  %v635_v62 = vsel %vm457_vm0, %v4921_v47, -inf  ;;  %v4928_v63 = vld [vmem:[%s4625_s5 + $0x1e0] sm:$0xff] }
  0x8a   : > { %7760 = vst [vmem:[#allocation13_spill] sm:$0xff] %v4928_v63  ;;  %v638_v15 = vsel %vm457_vm0, %v4928_v63, -inf }
  0x8d   : > { %627 = vmax.xlane.f32.xlu0 %v626_v30  ;;  %630 = vmax.xlane.f32.xlu1 %v629_v31  ;;  %v4938_v30 = vld [vmem:[%s4625_s5 + $0x1f0] sm:$0xff]  ;;  %v4941_v31 = vld [vmem:[%s4625_s5 + $0x1f8] sm:$0xff] }
  0x8e   : > { %7762 = vst [vmem:[#allocation15_spill] sm:$0xff] %v4938_v30  ;;  %7763 = vst [vmem:[#allocation16_spill] sm:$0xff] %v4941_v31  ;;  %v644_v47 = vsel %vm457_vm0, %v4938_v30, -inf  ;;  %v647_v46 = vsel %vm457_vm0, %v4941_v31, -inf }
  0x91   : > { %633 = vmax.xlane.f32.xlu0 %v632_v55  ;;  %636 = vmax.xlane.f32.xlu1 %v635_v62 }
  0x95   : > { %639 = vmax.xlane.f32.xlu0 %v638_v15  ;;  %642 = vmax.xlane.f32.xlu1 %v641_v14 }
  0x99   : > { %645 = vmax.xlane.f32.xlu0 %v644_v47  ;;  %648 = vmax.xlane.f32.xlu1 %v647_v46 }
  0xaa   : > { %v4947_v55 = vpop.xlane.xlu0 %459  ;;  %v4949_v62 = vpop.xlane.xlu1 %465 }
  0xab   : > { %7764 = vst [vmem:[#allocation17_spill] sm:$0xff] %v4947_v55  ;;  %v650_v54 = vsub.f32 %v4628_v0, %v4947_v55  ;;  %v652_v63 = vsub.f32 %v4631_v1, %v4949_v62 }
  0xad   : > { %v714_v15 = vmul.f32 1.442695, %v650_v54  ;;  %v718_v14 = vmul.f32 1.442695, %v652_v63 }
  0xae   : > { %v4955_v39 = vpop.xlane.xlu0 %462  ;;  %v4957_v30 = vpop.xlane.xlu1 %468 }
  0xaf   : > { %7765 = vst [vmem:[#allocation18_spill] sm:$0xff] %v4957_v30  ;;  %4091 = vpow2.f32 %v714_v15  ;;  %v651_v46 = vsub.f32 %v4634_v2, %v4955_v39  ;;  %v653_v47 = vsub.f32 %v4641_v5, %v4957_v30 }
  0xb0   : > { %4093 = vpow2.f32 %v718_v14 }
  0xb1   : > { %v716_v31 = vmul.f32 1.442695, %v651_v46  ;;  %v720_v38 = vmul.f32 1.442695, %v653_v47 }
  0xb2   : > { %v4963_v0 = vpop.xlane.xlu0 %471  ;;  %v4965_v55 = vpop.xlane.xlu1 %474 }
  0xb3   : > { %7766 = vst [vmem:[#allocation19_spill] sm:$0xff] %v4965_v55  ;;  %4095 = vpow2.f32 %v716_v31  ;;  %v654_v1 = vsub.f32 %v4648_v8, %v4963_v0  ;;  %v655_v54 = vsub.f32 %v4651_v9, %v4965_v55 }
  0xb4   : > { %4097 = vpow2.f32 %v720_v38 }
  0xb5   : > { %v722_v63 = vmul.f32 1.442695, %v654_v1  ;;  %v724_v2 = vmul.f32 1.442695, %v655_v54 }
  0xb6   : > { %v4971_v15 = vpop.xlane.xlu0 %477  ;;  %v4973_v5 = vpop.xlane.xlu1 %480 }
  0xb7   : > { %7767 = vst [vmem:[#allocation20_spill] sm:$0xff] %v4973_v5  ;;  %4099 = vpow2.f32 %v722_v63  ;;  %v656_v14 = vsub.f32 %v4658_v12, %v4971_v15  ;;  %v657_v31 = vsub.f32 %v4661_v13, %v4973_v5 }
  0xb8   : > { %4101 = vpow2.f32 %v724_v2 }
  0xb9   : > { %v4092_v46 = vpop.eup %4091  ;;  %v726_v8 = vmul.f32 1.442695, %v656_v14  ;;  %v728_v47 = vmul.f32 1.442695, %v657_v31 }
  0xba   : > { %v4094_v30 = vpop.eup %4093  ;;  %v4979_v9 = vpop.xlane.xlu0 %483  ;;  %v842_v38 = vsel %vm457_vm0, %v4092_v46, 0.0 }
  0xbb   : > { %v4982_v1 = vpop.xlane.xlu1 %486  ;;  %4103 = vpow2.f32 %v726_v8  ;;  %v658_v54 = vsub.f32 %v4668_v16, %v4979_v9  ;;  %843 = vadd.xlane.f32.xlu0 %v842_v38  ;;  %v848_v13 = vsel %vm457_vm0, %v4094_v30, 0.0 }
  0xbc   : > { %v659_v12 = vsub.f32 %v4671_v17, %v4982_v1  ;;  %4105 = vpow2.f32 %v728_v47 }
  0xbd   : > { %v4096_v63 = vpop.eup %4095  ;;  %v730_v2 = vmul.f32 1.442695, %v658_v54 }
  0xbe   : > { %v732_v14 = vmul.f32 1.442695, %v659_v12  ;;  %v4098_v31 = vpop.eup %4097  ;;  %v4989_v5 = vpop.xlane.xlu0 %489  ;;  %v845_v46 = vsel %vm457_vm0, %v4096_v63, 0.0 }
  0xbf   : > { %v4992_v55 = vpop.xlane.xlu1 %492  ;;  %4107 = vpow2.f32 %v730_v2  ;;  %v660_v16 = vsub.f32 %v4678_v20, %v4989_v5  ;;  %849 = vadd.xlane.f32.xlu0 %v848_v13  ;;  %846 = vadd.xlane.f32.xlu1 %v845_v46  ;;  %v851_v30 = vsel %vm457_vm0, %v4098_v31, 0.0 }
  0xc0   : > { %v661_v17 = vsub.f32 %v4681_v21, %v4992_v55  ;;  %4109 = vpow2.f32 %v732_v14 }
  0xc1   : > { %v4100_v8 = vpop.eup %4099  ;;  %v734_v47 = vmul.f32 1.442695, %v660_v16 }
  0xc2   : > { %v736_v38 = vmul.f32 1.442695, %v661_v17  ;;  %v4102_v54 = vpop.eup %4101  ;;  %v4999_v12 = vpop.xlane.xlu0 %495  ;;  %v854_v63 = vsel %vm457_vm0, %v4100_v8, 0.0 }
  0xc3   : > { %v5002_v2 = vpop.xlane.xlu1 %498  ;;  %4111 = vpow2.f32 %v734_v47  ;;  %v662_v20 = vsub.f32 %v4688_v24, %v4999_v12  ;;  %852 = vadd.xlane.f32.xlu1 %v851_v30  ;;  %855 = vadd.xlane.f32.xlu0 %v854_v63  ;;  %v857_v13 = vsel %vm457_vm0, %v4102_v54, 0.0 }
  0xc4   : > { %v663_v21 = vsub.f32 %v4691_v25, %v5002_v2  ;;  %4113 = vpow2.f32 %v736_v38 }
  0xc5   : > { %v4104_v14 = vpop.eup %4103  ;;  %v738_v31 = vmul.f32 1.442695, %v662_v20 }
  0xc6   : > { %v740_v46 = vmul.f32 1.442695, %v663_v21  ;;  %v4106_v16 = vpop.eup %4105  ;;  %v5009_v17 = vpop.xlane.xlu0 %501  ;;  %v860_v8 = vsel %vm457_vm0, %v4104_v14, 0.0 }
  0xc7   : > { %7768 = vst [vmem:[#allocation21_spill] sm:$0xff] %v5009_v17  ;;  %v5012_v47 = vpop.xlane.xlu1 %504  ;;  %4115 = vpow2.f32 %v738_v31  ;;  %v664_v24 = vsub.f32 %v4698_v28, %v5009_v17  ;;  %858 = vadd.xlane.f32.xlu1 %v857_v13  ;;  %861 = vadd.xlane.f32.xlu0 %v860_v8  ;;  %v863_v30 = vsel %vm457_vm0, %v4106_v16, 0.0 }
  0xc8   : > { %v665_v25 = vsub.f32 %v4701_v29, %v5012_v47  ;;  %4117 = vpow2.f32 %v740_v46  ;;  %v4539_v46 = vmov 0  }
  0xc9   : > { %v4108_v38 = vpop.eup %4107  ;;  %v742_v54 = vmul.f32 1.442695, %v664_v24  ;;  %3930 = vset.pattern.permute.xlu1 %v4539_v46  ;;  %3929 = vset.pattern.permute.xlu0 %v4539_v46 }
  0xca   : > { %v744_v63 = vmul.f32 1.442695, %v665_v25  ;;  %v4110_v20 = vpop.eup %4109  ;;  %v5019_v21 = vpop.xlane.xlu0 %507  ;;  %v866_v14 = vsel %vm457_vm0, %v4108_v38, 0.0 }
  0xcb   : > { %7769 = vst [vmem:[#allocation22_spill] sm:$0xff] %v5019_v21  ;;  %v5022_v31 = vpop.xlane.xlu1 %510  ;;  %4119 = vpow2.f32 %v742_v54  ;;  %v666_v28 = vsub.f32 %v4708_v32, %v5019_v21  ;;  %864 = vadd.xlane.f32.xlu1 %v863_v30  ;;  %867 = vadd.xlane.f32.xlu0 %v866_v14  ;;  %v869_v13 = vsel %vm457_vm0, %v4110_v20, 0.0 }
  0xcc   : > { %v667_v29 = vsub.f32 %v4711_v33, %v5022_v31  ;;  %4121 = vpow2.f32 %v744_v63 }
  0xcd   : > { %v4112_v16 = vpop.eup %4111  ;;  %v746_v8 = vmul.f32 1.442695, %v666_v28 }
  0xce   : > { %v748_v24 = vmul.f32 1.442695, %v667_v29  ;;  %v4114_v25 = vpop.eup %4113  ;;  %v5029_v38 = vpop.xlane.xlu0 %513  ;;  %v872_v54 = vsel %vm457_vm0, %v4112_v16, 0.0 }
  0xcf   : > { %7770 = vst [vmem:[#allocation23_spill] sm:$0xff] %v5029_v38  ;;  %v5032_v32 = vpop.xlane.xlu1 %516  ;;  %4123 = vpow2.f32 %v746_v8  ;;  %v668_v33 = vsub.f32 %v4718_v36, %v5029_v38  ;;  %870 = vadd.xlane.f32.xlu1 %v869_v13  ;;  %873 = vadd.xlane.f32.xlu0 %v872_v54  ;;  %v875_v63 = vsel %vm457_vm0, %v4114_v25, 0.0 }
  0xd0   : > { %7771 = vst [vmem:[#allocation24_spill] sm:$0xff] %v5032_v32  ;;  %v669_v30 = vsub.f32 %v4721_v37, %v5032_v32  ;;  %4125 = vpow2.f32 %v748_v24  ;;  %v5668_v32 = vld [vmem:[%s4625_s5 + $0x98] sm:$0xff] }
  0xd1   : > { %v4116_v20 = vpop.eup %4115  ;;  %v750_v14 = vmul.f32 1.442695, %v668_v33  ;;  %7894 = vst [vmem:[#allocation123_spill] sm:$0xff] %v5668_v32 }
  0xd2   : > { %v752_v28 = vmul.f32 1.442695, %v669_v30  ;;  %v4118_v29 = vpop.eup %4117  ;;  %v5039_v46 = vpop.xlane.xlu0 %519  ;;  %v878_v16 = vsel %vm457_vm0, %v4116_v20, 0.0 }
  0xd3   : > { %7772 = vst [vmem:[#allocation25_spill] sm:$0xff] %v5039_v46  ;;  %v5042_v8 = vpop.xlane.xlu1 %522  ;;  %4127 = vpow2.f32 %v750_v14  ;;  %v670_v36 = vsub.f32 %v4728_v40, %v5039_v46  ;;  %876 = vadd.xlane.f32.xlu1 %v875_v63  ;;  %879 = vadd.xlane.f32.xlu0 %v878_v16  ;;  %v881_v13 = vsel %vm457_vm0, %v4118_v29, 0.0 }
  0xd4   : > { %7773 = vst [vmem:[#allocation26_spill] sm:$0xff] %v5042_v8  ;;  %v671_v37 = vsub.f32 %v4731_v41, %v5042_v8  ;;  %4129 = vpow2.f32 %v752_v28  ;;  %v5653_v8 = vld [vmem:[%s4625_s5 + $0x88] sm:$0xff] }
  0xd5   : > { %v4120_v24 = vpop.eup %4119  ;;  %v754_v25 = vmul.f32 1.442695, %v670_v36  ;;  %7893 = vst [vmem:[#allocation122_spill] sm:$0xff] %v5653_v8 }
  0xd6   : > { %v756_v54 = vmul.f32 1.442695, %v671_v37  ;;  %v4122_v33 = vpop.eup %4121  ;;  %v5049_v30 = vpop.xlane.xlu0 %525  ;;  %v884_v20 = vsel %vm457_vm0, %v4120_v24, 0.0 }
  0xd7   : > { %7774 = vst [vmem:[#allocation27_spill] sm:$0xff] %v5049_v30  ;;  %v5052_v14 = vpop.xlane.xlu1 %528  ;;  %4131 = vpow2.f32 %v754_v25  ;;  %v672_v40 = vsub.f32 %v4738_v44, %v5049_v30  ;;  %882 = vadd.xlane.f32.xlu1 %v881_v13  ;;  %885 = vadd.xlane.f32.xlu0 %v884_v20  ;;  %v887_v63 = vsel %vm457_vm0, %v4122_v33, 0.0 }
  0xd8   : > { %7775 = vst [vmem:[#allocation28_spill] sm:$0xff] %v5052_v14  ;;  %v673_v41 = vsub.f32 %v4741_v45, %v5052_v14  ;;  %4133 = vpow2.f32 %v756_v54 }
  0xd9   : > { %v4124_v28 = vpop.eup %4123  ;;  %v758_v29 = vmul.f32 1.442695, %v672_v40 }
  0xda   : > { %v760_v16 = vmul.f32 1.442695, %v673_v41  ;;  %v4126_v36 = vpop.eup %4125  ;;  %v5059_v37 = vpop.xlane.xlu0 %531  ;;  %v890_v24 = vsel %vm457_vm0, %v4124_v28, 0.0 }
  0xdb   : > { %7776 = vst [vmem:[#allocation29_spill] sm:$0xff] %v5059_v37  ;;  %v5062_v25 = vpop.xlane.xlu1 %534  ;;  %4135 = vpow2.f32 %v758_v29  ;;  %v674_v44 = vsub.f32 %v4748_v48, %v5059_v37  ;;  %888 = vadd.xlane.f32.xlu1 %v887_v63  ;;  %891 = vadd.xlane.f32.xlu0 %v890_v24  ;;  %v893_v13 = vsel %vm457_vm0, %v4126_v36, 0.0 }
  0xdc   : > { %7777 = vst [vmem:[#allocation30_spill] sm:$0xff] %v5062_v25  ;;  %v675_v45 = vsub.f32 %v4751_v49, %v5062_v25  ;;  %4137 = vpow2.f32 %v760_v16 }
  0xdd   : > { %v4128_v54 = vpop.eup %4127  ;;  %v762_v33 = vmul.f32 1.442695, %v674_v44 }
  0xde   : > { %v764_v20 = vmul.f32 1.442695, %v675_v45  ;;  %v4130_v40 = vpop.eup %4129  ;;  %v5069_v41 = vpop.xlane.xlu0 %537  ;;  %v896_v28 = vsel %vm457_vm0, %v4128_v54, 0.0 }
  0xdf   : > { %7778 = vst [vmem:[#allocation31_spill] sm:$0xff] %v5069_v41  ;;  %v5072_v29 = vpop.xlane.xlu1 %540  ;;  %4139 = vpow2.f32 %v762_v33  ;;  %v676_v48 = vsub.f32 %v4758_v52, %v5069_v41  ;;  %894 = vadd.xlane.f32.xlu1 %v893_v13  ;;  %897 = vadd.xlane.f32.xlu0 %v896_v28  ;;  %v899_v63 = vsel %vm457_vm0, %v4130_v40, 0.0 }
  0xe0   : > { %7779 = vst [vmem:[#allocation32_spill] sm:$0xff] %v5072_v29  ;;  %v677_v49 = vsub.f32 %v4761_v53, %v5072_v29  ;;  %4141 = vpow2.f32 %v764_v20 }
  0xe1   : > { %v4132_v16 = vpop.eup %4131  ;;  %v766_v36 = vmul.f32 1.442695, %v676_v48 }
  0xe2   : > { %v768_v24 = vmul.f32 1.442695, %v677_v49  ;;  %v4134_v44 = vpop.eup %4133  ;;  %v5079_v45 = vpop.xlane.xlu0 %543  ;;  %v902_v54 = vsel %vm457_vm0, %v4132_v16, 0.0 }
  0xe3   : > { %7780 = vst [vmem:[#allocation33_spill] sm:$0xff] %v5079_v45  ;;  %v5082_v33 = vpop.xlane.xlu1 %546  ;;  %4143 = vpow2.f32 %v766_v36  ;;  %v678_v52 = vsub.f32 %v4768_v56, %v5079_v45  ;;  %900 = vadd.xlane.f32.xlu1 %v899_v63  ;;  %903 = vadd.xlane.f32.xlu0 %v902_v54  ;;  %v905_v13 = vsel %vm457_vm0, %v4134_v44, 0.0 }
  0xe4   : > { %7781 = vst [vmem:[#allocation34_spill] sm:$0xff] %v5082_v33  ;;  %v679_v53 = vsub.f32 %v4771_v57, %v5082_v33  ;;  %4145 = vpow2.f32 %v768_v24  ;;  %v5582_v33 = vld [vmem:[%s4625_s5 + $0x38] sm:$0xff] }
  0xe5   : > { %v4136_v20 = vpop.eup %4135  ;;  %v770_v40 = vmul.f32 1.442695, %v678_v52 }
  0xe6   : > { %v772_v28 = vmul.f32 1.442695, %v679_v53  ;;  %v4138_v48 = vpop.eup %4137  ;;  %v5089_v49 = vpop.xlane.xlu0 %549  ;;  %v908_v16 = vsel %vm457_vm0, %v4136_v20, 0.0 }
  0xe7   : > { %7782 = vst [vmem:[#allocation35_spill] sm:$0xff] %v5089_v49  ;;  %v5092_v36 = vpop.xlane.xlu1 %552  ;;  %4147 = vpow2.f32 %v770_v40  ;;  %v680_v56 = vsub.f32 %v4778_v60, %v5089_v49  ;;  %906 = vadd.xlane.f32.xlu1 %v905_v13  ;;  %909 = vadd.xlane.f32.xlu0 %v908_v16  ;;  %v911_v63 = vsel %vm457_vm0, %v4138_v48, 0.0 }
  0xe8   : > { %7783 = vst [vmem:[#allocation36_spill] sm:$0xff] %v5092_v36  ;;  %v681_v57 = vsub.f32 %v4781_v61, %v5092_v36  ;;  %4149 = vpow2.f32 %v772_v28  ;;  %v5567_v36 = vld [vmem:[%s4625_s5 + $0x28] sm:$0xff] }
  0xe9   : > { %v4140_v24 = vpop.eup %4139  ;;  %v774_v44 = vmul.f32 1.442695, %v680_v56 }
  0xea   : > { %v776_v54 = vmul.f32 1.442695, %v681_v57  ;;  %v4142_v52 = vpop.eup %4141  ;;  %v5099_v53 = vpop.xlane.xlu0 %555  ;;  %v914_v20 = vsel %vm457_vm0, %v4140_v24, 0.0 }
  0xeb   : > { %7784 = vst [vmem:[#allocation37_spill] sm:$0xff] %v5099_v53  ;;  %v5102_v40 = vpop.xlane.xlu1 %558  ;;  %4151 = vpow2.f32 %v774_v44  ;;  %v682_v60 = vsub.f32 %v4788_v3, %v5099_v53  ;;  %912 = vadd.xlane.f32.xlu1 %v911_v63  ;;  %915 = vadd.xlane.f32.xlu0 %v914_v20  ;;  %v917_v13 = vsel %vm457_vm0, %v4142_v52, 0.0 }
  0xec   : > { %7785 = vst [vmem:[#allocation38_spill] sm:$0xff] %v5102_v40  ;;  %v683_v61 = vsub.f32 %v4791_v4, %v5102_v40  ;;  %4153 = vpow2.f32 %v776_v54  ;;  %v5552_v40 = vld [vmem:[%s4625_s5 + $0x18] sm:$0xff] }
  0xed   : > { %v4144_v28 = vpop.eup %4143  ;;  %v778_v48 = vmul.f32 1.442695, %v682_v60 }
  0xee   : > { %v780_v16 = vmul.f32 1.442695, %v683_v61  ;;  %v4146_v56 = vpop.eup %4145  ;;  %v5109_v57 = vpop.xlane.xlu0 %561  ;;  %v920_v24 = vsel %vm457_vm0, %v4144_v28, 0.0 }
  0xef   : > { %7786 = vst [vmem:[#allocation39_spill] sm:$0xff] %v5109_v57  ;;  %v5112_v44 = vpop.xlane.xlu1 %564  ;;  %4155 = vpow2.f32 %v778_v48  ;;  %v684_v3 = vsub.f32 %v4798_v10, %v5109_v57  ;;  %918 = vadd.xlane.f32.xlu1 %v917_v13  ;;  %921 = vadd.xlane.f32.xlu0 %v920_v24  ;;  %v923_v63 = vsel %vm457_vm0, %v4146_v56, 0.0 }
  0xf0   : > { %7787 = vst [vmem:[#allocation40_spill] sm:$0xff] %v5112_v44  ;;  %v685_v4 = vsub.f32 %v4801_v11, %v5112_v44  ;;  %4157 = vpow2.f32 %v780_v16 }
  0xf1   : > { %v4148_v54 = vpop.eup %4147  ;;  %v782_v52 = vmul.f32 1.442695, %v684_v3 }
  0xf2   : > { %v784_v20 = vmul.f32 1.442695, %v685_v4  ;;  %v4150_v60 = vpop.eup %4149  ;;  %v5119_v61 = vpop.xlane.xlu0 %567  ;;  %v926_v28 = vsel %vm457_vm0, %v4148_v54, 0.0 }
  0xf3   : > { %7788 = vst [vmem:[#allocation41_spill] sm:$0xff] %v5119_v61  ;;  %v5122_v48 = vpop.xlane.xlu1 %570  ;;  %4159 = vpow2.f32 %v782_v52  ;;  %v686_v10 = vsub.f32 %v4808_v18, %v5119_v61  ;;  %924 = vadd.xlane.f32.xlu1 %v923_v63  ;;  %927 = vadd.xlane.f32.xlu0 %v926_v28  ;;  %v929_v13 = vsel %vm457_vm0, %v4150_v60, 0.0  ;;  %v5625_v61 = vld [vmem:[%s4625_s5 + $0x68] sm:$0xff] }
  0xf4   : > { %7789 = vst [vmem:[#allocation42_spill] sm:$0xff] %v5122_v48  ;;  %v687_v11 = vsub.f32 %v4811_v19, %v5122_v48  ;;  %4161 = vpow2.f32 %v784_v20 }
  0xf5   : > { %v4152_v16 = vpop.eup %4151  ;;  %v786_v56 = vmul.f32 1.442695, %v686_v10 }
  0xf6   : > { %v788_v24 = vmul.f32 1.442695, %v687_v11  ;;  %v4154_v3 = vpop.eup %4153  ;;  %v5129_v4 = vpop.xlane.xlu0 %573  ;;  %v932_v54 = vsel %vm457_vm0, %v4152_v16, 0.0 }
  0xf7   : > { %7790 = vst [vmem:[#allocation43_spill] sm:$0xff] %v5129_v4  ;;  %v5132_v52 = vpop.xlane.xlu1 %576  ;;  %4163 = vpow2.f32 %v786_v56  ;;  %v688_v18 = vsub.f32 %v4818_v26, %v5129_v4  ;;  %930 = vadd.xlane.f32.xlu1 %v929_v13  ;;  %933 = vadd.xlane.f32.xlu0 %v932_v54  ;;  %v935_v63 = vsel %vm457_vm0, %v4154_v3, 0.0  ;;  %v5610_v4 = vld [vmem:[%s4625_s5 + $0x58] sm:$0xff] }
  0xf8   : > { %7791 = vst [vmem:[#allocation44_spill] sm:$0xff] %v5132_v52  ;;  %v689_v19 = vsub.f32 %v4821_v27, %v5132_v52  ;;  %4165 = vpow2.f32 %v788_v24 }
  0xf9   : > { %v4156_v20 = vpop.eup %4155  ;;  %v790_v60 = vmul.f32 1.442695, %v688_v18 }
  0xfa   : > { %v792_v28 = vmul.f32 1.442695, %v689_v19  ;;  %v4158_v10 = vpop.eup %4157  ;;  %v5139_v11 = vpop.xlane.xlu0 %579  ;;  %v938_v16 = vsel %vm457_vm0, %v4156_v20, 0.0 }
  0xfb   : > { %7792 = vst [vmem:[#allocation45_spill] sm:$0xff] %v5139_v11  ;;  %v5142_v56 = vpop.xlane.xlu1 %582  ;;  %4167 = vpow2.f32 %v790_v60  ;;  %v690_v26 = vsub.f32 %v4828_v34, %v5139_v11  ;;  %936 = vadd.xlane.f32.xlu1 %v935_v63  ;;  %939 = vadd.xlane.f32.xlu0 %v938_v16  ;;  %v941_v13 = vsel %vm457_vm0, %v4158_v10, 0.0 }
  0xfc   : > { %7793 = vst [vmem:[#allocation46_spill] sm:$0xff] %v5142_v56  ;;  %v691_v27 = vsub.f32 %v4831_v35, %v5142_v56  ;;  %4169 = vpow2.f32 %v792_v28 }
  0xfd   : > { %v4160_v24 = vpop.eup %4159  ;;  %v794_v3 = vmul.f32 1.442695, %v690_v26 }
  0xfe   : > { %v796_v54 = vmul.f32 1.442695, %v691_v27  ;;  %v4162_v18 = vpop.eup %4161  ;;  %v5149_v19 = vpop.xlane.xlu0 %585  ;;  %v944_v20 = vsel %vm457_vm0, %v4160_v24, 0.0 }
  0xff   : > { %7794 = vst [vmem:[#allocation47_spill] sm:$0xff] %v5149_v19  ;;  %v5152_v60 = vpop.xlane.xlu1 %588  ;;  %4171 = vpow2.f32 %v794_v3  ;;  %v692_v34 = vsub.f32 %v4838_v42, %v5149_v19  ;;  %942 = vadd.xlane.f32.xlu1 %v941_v13  ;;  %945 = vadd.xlane.f32.xlu0 %v944_v20  ;;  %v947_v63 = vsel %vm457_vm0, %v4162_v18, 0.0 }
 0x100   : > { %7795 = vst [vmem:[#allocation48_spill] sm:$0xff] %v5152_v60  ;;  %v693_v35 = vsub.f32 %v4841_v43, %v5152_v60  ;;  %4173 = vpow2.f32 %v796_v54 }
 0x101   : > { %v4164_v28 = vpop.eup %4163  ;;  %v798_v10 = vmul.f32 1.442695, %v692_v34 }
 0x102   : > { %v800_v16 = vmul.f32 1.442695, %v693_v35  ;;  %v4166_v26 = vpop.eup %4165  ;;  %v5159_v27 = vpop.xlane.xlu0 %591  ;;  %v950_v24 = vsel %vm457_vm0, %v4164_v28, 0.0 }
 0x103   : > { %7796 = vst [vmem:[#allocation49_spill] sm:$0xff] %v5159_v27  ;;  %v5162_v3 = vpop.xlane.xlu1 %594  ;;  %4175 = vpow2.f32 %v798_v10  ;;  %v694_v42 = vsub.f32 %v4848_v50, %v5159_v27  ;;  %948 = vadd.xlane.f32.xlu1 %v947_v63  ;;  %951 = vadd.xlane.f32.xlu0 %v950_v24  ;;  %v953_v13 = vsel %vm457_vm0, %v4166_v26, 0.0 }
 0x104   : > { %7797 = vst [vmem:[#allocation50_spill] sm:$0xff] %v5162_v3  ;;  %v695_v43 = vsub.f32 %v4851_v51, %v5162_v3  ;;  %4177 = vpow2.f32 %v800_v16 }
 0x105   : > { %v4168_v54 = vpop.eup %4167  ;;  %v802_v18 = vmul.f32 1.442695, %v694_v42 }
 0x106   : > { %v804_v20 = vmul.f32 1.442695, %v695_v43  ;;  %v4170_v34 = vpop.eup %4169  ;;  %v5169_v35 = vpop.xlane.xlu0 %597  ;;  %v956_v28 = vsel %vm457_vm0, %v4168_v54, 0.0 }
 0x107   : > { %7798 = vst [vmem:[#allocation51_spill] sm:$0xff] %v5169_v35  ;;  %v5172_v10 = vpop.xlane.xlu1 %600  ;;  %4179 = vpow2.f32 %v802_v18  ;;  %v696_v50 = vsub.f32 %v4858_v58, %v5169_v35  ;;  %954 = vadd.xlane.f32.xlu1 %v953_v13  ;;  %957 = vadd.xlane.f32.xlu0 %v956_v28  ;;  %v959_v63 = vsel %vm457_vm0, %v4170_v34, 0.0  ;;  %v5539_v35 = vld [vmem:[%s4625_s5] sm:$0xff] }
 0x108   : > { %7799 = vst [vmem:[#allocation52_spill] sm:$0xff] %v5172_v10  ;;  %v697_v51 = vsub.f32 %v4861_v59, %v5172_v10  ;;  %4181 = vpow2.f32 %v804_v20 }
 0x109   : > { %v4172_v16 = vpop.eup %4171  ;;  %v806_v26 = vmul.f32 1.442695, %v696_v50 }
 0x10a   : > { %v808_v24 = vmul.f32 1.442695, %v697_v51  ;;  %v4174_v42 = vpop.eup %4173  ;;  %v5179_v43 = vpop.xlane.xlu0 %603  ;;  %v962_v54 = vsel %vm457_vm0, %v4172_v16, 0.0 }
 0x10b   : > { %7800 = vst [vmem:[#allocation53_spill] sm:$0xff] %v5179_v43  ;;  %v5182_v18 = vpop.xlane.xlu1 %606  ;;  %4183 = vpow2.f32 %v806_v26  ;;  %v698_v58 = vsub.f32 %v4868_v6, %v5179_v43  ;;  %960 = vadd.xlane.f32.xlu1 %v959_v63  ;;  %963 = vadd.xlane.f32.xlu0 %v962_v54  ;;  %v965_v13 = vsel %vm457_vm0, %v4174_v42, 0.0 }
 0x10c   : > { %7801 = vst [vmem:[#allocation54_spill] sm:$0xff] %v5182_v18  ;;  %v699_v59 = vsub.f32 %v4871_v7, %v5182_v18  ;;  %4185 = vpow2.f32 %v808_v24 }
 0x10d   : > { %v4176_v20 = vpop.eup %4175  ;;  %v810_v34 = vmul.f32 1.442695, %v698_v58 }
 0x10e   : > { %v812_v28 = vmul.f32 1.442695, %v699_v59  ;;  %v4178_v50 = vpop.eup %4177  ;;  %v5189_v51 = vpop.xlane.xlu0 %609  ;;  %v968_v16 = vsel %vm457_vm0, %v4176_v20, 0.0 }
 0x10f   : > { %7802 = vst [vmem:[#allocation55_spill] sm:$0xff] %v5189_v51  ;;  %v5192_v26 = vpop.xlane.xlu1 %612  ;;  %4187 = vpow2.f32 %v810_v34  ;;  %v700_v6 = vsub.f32 %v4878_v22, %v5189_v51  ;;  %966 = vadd.xlane.f32.xlu1 %v965_v13  ;;  %969 = vadd.xlane.f32.xlu0 %v968_v16  ;;  %v971_v63 = vsel %vm457_vm0, %v4178_v50, 0.0  ;;  %v7806_v22 = vld [vmem:[#allocation5_spill] sm:$0xff] }
 0x110   : > { %7803 = vst [vmem:[#allocation56_spill] sm:$0xff] %v5192_v26  ;;  %v701_v7 = vsub.f32 %v4881_v23, %v5192_v26  ;;  %4189 = vpow2.f32 %v812_v28  ;;  %v7807_v23 = vld [vmem:[#allocation6_spill] sm:$0xff] }
 0x111   : > { %v4180_v24 = vpop.eup %4179  ;;  %v814_v42 = vmul.f32 1.442695, %v700_v6 }
 0x112   : > { %v816_v54 = vmul.f32 1.442695, %v701_v7  ;;  %v4182_v58 = vpop.eup %4181  ;;  %v5199_v59 = vpop.xlane.xlu0 %615  ;;  %v974_v20 = vsel %vm457_vm0, %v4180_v24, 0.0 }
 0x113   : > { %7804 = vst [vmem:[#allocation57_spill] sm:$0xff] %v5199_v59  ;;  %v5202_v34 = vpop.xlane.xlu1 %618  ;;  %4191 = vpow2.f32 %v814_v42  ;;  %v702_v13 = vsub.f32 %v7806_v22, %v5199_v59  ;;  %972 = vadd.xlane.f32.xlu1 %v971_v63  ;;  %975 = vadd.xlane.f32.xlu0 %v974_v20  ;;  %v977_v50 = vsel %vm457_vm0, %v4182_v58, 0.0  ;;  %v7810_v63 = vld [vmem:[#allocation7_spill] sm:$0xff] }
 0x114   : > { %7805 = vst [vmem:[#allocation58_spill] sm:$0xff] %v5202_v34  ;;  %v703_v28 = vsub.f32 %v7807_v23, %v5202_v34  ;;  %4193 = vpow2.f32 %v816_v54  ;;  %v7811_v54 = vld [vmem:[#allocation8_spill] sm:$0xff] }
 0x115   : > { %v4184_v16 = vpop.eup %4183  ;;  %v818_v6 = vmul.f32 1.442695, %v702_v13 }
 0x116   : > { %v820_v7 = vmul.f32 1.442695, %v703_v28  ;;  %v4186_v26 = vpop.eup %4185  ;;  %v5209_v18 = vpop.xlane.xlu0 %621  ;;  %v980_v24 = vsel %vm457_vm0, %v4184_v16, 0.0 }
 0x117   : > { %7808 = vst [vmem:[#allocation5_spill] sm:$0xff] %v5209_v18  ;;  %v5212_v42 = vpop.xlane.xlu1 %624  ;;  %4195 = vpow2.f32 %v818_v6  ;;  %v704_v20 = vsub.f32 %v7810_v63, %v5209_v18  ;;  %978 = vadd.xlane.f32.xlu1 %v977_v50  ;;  %981 = vadd.xlane.f32.xlu0 %v980_v24  ;;  %v983_v58 = vsel %vm457_vm0, %v4186_v26, 0.0  ;;  %v7814_v50 = vld [vmem:[#allocation9_spill] sm:$0xff] }
 0x118   : > { %7809 = vst [vmem:[#allocation6_spill] sm:$0xff] %v5212_v42  ;;  %v705_v22 = vsub.f32 %v7811_v54, %v5212_v42  ;;  %4197 = vpow2.f32 %v820_v7  ;;  %v7815_v7 = vld [vmem:[#allocation10_spill] sm:$0xff] }
 0x119   : > { %v4188_v13 = vpop.eup %4187  ;;  %v822_v23 = vmul.f32 1.442695, %v704_v20 }
 0x11a   : > { %v824_v28 = vmul.f32 1.442695, %v705_v22  ;;  %v4190_v34 = vpop.eup %4189  ;;  %v5219_v10 = vpop.xlane.xlu0 %627  ;;  %v986_v16 = vsel %vm457_vm0, %v4188_v13, 0.0 }
 0x11b   : > { %7812 = vst [vmem:[#allocation7_spill] sm:$0xff] %v5219_v10  ;;  %v5222_v6 = vpop.xlane.xlu1 %630  ;;  %4199 = vpow2.f32 %v822_v23  ;;  %v706_v24 = vsub.f32 %v7814_v50, %v5219_v10  ;;  %984 = vadd.xlane.f32.xlu1 %v983_v58  ;;  %987 = vadd.xlane.f32.xlu0 %v986_v16  ;;  %v989_v26 = vsel %vm457_vm0, %v4190_v34, 0.0  ;;  %v7818_v58 = vld [vmem:[#allocation11_spill] sm:$0xff] }
 0x11c   : > { %7813 = vst [vmem:[#allocation8_spill] sm:$0xff] %v5222_v6  ;;  %v707_v63 = vsub.f32 %v7815_v7, %v5222_v6  ;;  %4201 = vpow2.f32 %v824_v28  ;;  %v7819_v28 = vld [vmem:[#allocation12_spill] sm:$0xff] }
 0x11d   : > { %v4192_v20 = vpop.eup %4191  ;;  %v826_v54 = vmul.f32 1.442695, %v706_v24 }
 0x11e   : > { %v828_v22 = vmul.f32 1.442695, %v707_v63  ;;  %v4194_v42 = vpop.eup %4193  ;;  %v5229_v3 = vpop.xlane.xlu0 %633  ;;  %v992_v13 = vsel %vm457_vm0, %v4192_v20, 0.0 }
 0x11f   : > { %7816 = vst [vmem:[#allocation9_spill] sm:$0xff] %v5229_v3  ;;  %v5232_v23 = vpop.xlane.xlu1 %636  ;;  %4203 = vpow2.f32 %v826_v54  ;;  %v708_v16 = vsub.f32 %v7818_v58, %v5229_v3  ;;  %990 = vadd.xlane.f32.xlu1 %v989_v26  ;;  %993 = vadd.xlane.f32.xlu0 %v992_v13  ;;  %v995_v34 = vsel %vm457_vm0, %v4194_v42, 0.0  ;;  %v7822_v26 = vld [vmem:[#allocation13_spill] sm:$0xff] }
 0x120   : > { %7817 = vst [vmem:[#allocation10_spill] sm:$0xff] %v5232_v23  ;;  %v709_v50 = vsub.f32 %v7819_v28, %v5232_v23  ;;  %4205 = vpow2.f32 %v828_v22  ;;  %v7823_v22 = vld [vmem:[#allocation14_spill] sm:$0xff] }
 0x121   : > { %v4196_v24 = vpop.eup %4195  ;;  %v830_v7 = vmul.f32 1.442695, %v708_v16 }
 0x122   : > { %v832_v63 = vmul.f32 1.442695, %v709_v50  ;;  %v4198_v6 = vpop.eup %4197  ;;  %v5239_v10 = vpop.xlane.xlu0 %639  ;;  %v998_v20 = vsel %vm457_vm0, %v4196_v24, 0.0 }
 0x123   : > { %7820 = vst [vmem:[#allocation11_spill] sm:$0xff] %v5239_v10  ;;  %v5242_v54 = vpop.xlane.xlu1 %642  ;;  %4207 = vpow2.f32 %v830_v7  ;;  %v710_v13 = vsub.f32 %v7822_v26, %v5239_v10  ;;  %996 = vadd.xlane.f32.xlu1 %v995_v34  ;;  %999 = vadd.xlane.f32.xlu0 %v998_v20  ;;  %v1001_v42 = vsel %vm457_vm0, %v4198_v6, 0.0  ;;  %v7826_v34 = vld [vmem:[#allocation15_spill] sm:$0xff] }
 0x124   : > { %7821 = vst [vmem:[#allocation12_spill] sm:$0xff] %v5242_v54  ;;  %v711_v58 = vsub.f32 %v7823_v22, %v5242_v54  ;;  %4209 = vpow2.f32 %v832_v63  ;;  %v7827_v63 = vld [vmem:[#allocation16_spill] sm:$0xff] }
 0x125   : > { %v4200_v16 = vpop.eup %4199  ;;  %v834_v28 = vmul.f32 1.442695, %v710_v13 }
 0x126   : > { %v836_v50 = vmul.f32 1.442695, %v711_v58  ;;  %v4202_v23 = vpop.eup %4201  ;;  %v5249_v3 = vpop.xlane.xlu0 %645  ;;  %v1004_v24 = vsel %vm457_vm0, %v4200_v16, 0.0 }
 0x127   : > { %7824 = vst [vmem:[#allocation13_spill] sm:$0xff] %v5249_v3  ;;  %v5252_v7 = vpop.xlane.xlu1 %648  ;;  %4211 = vpow2.f32 %v834_v28  ;;  %v712_v20 = vsub.f32 %v7826_v34, %v5249_v3  ;;  %1002 = vadd.xlane.f32.xlu1 %v1001_v42  ;;  %1005 = vadd.xlane.f32.xlu0 %v1004_v24  ;;  %v1007_v6 = vsel %vm457_vm0, %v4202_v23, 0.0 }
 0x128   : > { %7825 = vst [vmem:[#allocation14_spill] sm:$0xff] %v5252_v7  ;;  %v713_v26 = vsub.f32 %v7827_v63, %v5252_v7  ;;  %4213 = vpow2.f32 %v836_v50 }
 0x129   : > { %v4204_v13 = vpop.eup %4203  ;;  %v838_v22 = vmul.f32 1.442695, %v712_v20 }
 0x12a   : > { %v840_v58 = vmul.f32 1.442695, %v713_v26  ;;  %v4206_v54 = vpop.eup %4205  ;;  %v1010_v16 = vsel %vm457_vm0, %v4204_v13, 0.0 }
 0x12b   : > { %4215 = vpow2.f32 %v838_v22  ;;  %1008 = vadd.xlane.f32.xlu1 %v1007_v6  ;;  %1011 = vadd.xlane.f32.xlu0 %v1010_v16  ;;  %v1013_v28 = vsel %vm457_vm0, %v4206_v54, 0.0  ;;  %v327_v16 = vld [vmem:[%s5271_s8 + $0x8] sm:$0xff] }
 0x12c   : > { %4217 = vpow2.f32 %v840_v58 }
 0x12d   : > { %v4208_v42 = vpop.eup %4207 }
 0x12e   : > { %v4210_v24 = vpop.eup %4209  ;;  %v1016_v34 = vsel %vm457_vm0, %v4208_v42, 0.0 }
 0x12f   : > { %1014 = vadd.xlane.f32.xlu1 %v1013_v28  ;;  %1017 = vadd.xlane.f32.xlu0 %v1016_v34  ;;  %v1019_v23 = vsel %vm457_vm0, %v4210_v24, 0.0  ;;  %v326_v28 = vld [vmem:[%s5271_s8] sm:$0xff]  ;;  %v328_v34 = vld [vmem:[%s5271_s8 + $0x10] sm:$0xff] }
 0x131   : > { %v4212_v50 = vpop.eup %4211 }
 0x132   : > { %v4214_v20 = vpop.eup %4213  ;;  %v1022_v63 = vsel %vm457_vm0, %v4212_v50, 0.0 }
 0x133   : > { %1020 = vadd.xlane.f32.xlu1 %v1019_v23  ;;  %1023 = vadd.xlane.f32.xlu0 %v1022_v63  ;;  %v1025_v26 = vsel %vm457_vm0, %v4214_v20, 0.0  ;;  %v335_v23 = vld [vmem:[%s5271_s8 + $0x48] sm:$0xff]  ;;  %v329_v63 = vld [vmem:[%s5271_s8 + $0x18] sm:$0xff] }
 0x135   : > { %v4216_v6 = vpop.eup %4215 }
 0x136   : > { %v4218_v13 = vpop.eup %4217  ;;  %v1028_v54 = vsel %vm457_vm0, %v4216_v6, 0.0 }
 0x137   : > { %1026 = vadd.xlane.f32.xlu1 %v1025_v26  ;;  %1029 = vadd.xlane.f32.xlu0 %v1028_v54  ;;  %v1031_v22 = vsel %vm457_vm0, %v4218_v13, 0.0  ;;  %v337_v26 = vld [vmem:[%s5271_s8 + $0x58] sm:$0xff]  ;;  %v330_v54 = vld [vmem:[%s5271_s8 + $0x20] sm:$0xff] }
 0x13b   : > { %1032 = vadd.xlane.f32.xlu1 %v1031_v22  ;;  %v339_v22 = vld [vmem:[%s5271_s8 + $0x68] sm:$0xff] }
 0x148   : > { %v5273_v58 = vpop.xlane.xlu0 %843 }
 0x149   : > { %7828 = vst [vmem:[#allocation15_spill] sm:$0xff] %v5273_v58 }
 0x14c   : > { %1230 = vperm.xlu1 %3930, %v327_v16   ;;  %v5277_v42 = vpop.xlane.xlu1 %846  ;;  %v5279_v24 = vpop.xlane.xlu0 %849 }
 0x14d   : > { %7829 = vst [vmem:[#allocation16_spill] sm:$0xff] %v5277_v42  ;;  %7830 = vst [vmem:[#allocation59_spill] sm:$0xff] %v5279_v24  ;;  %1227 = vperm.xlu0 %3929, %v326_v28  }
 0x150   : > { %1233 = vperm.xlu1 %3930, %v328_v34   ;;  %v5283_v50 = vpop.xlane.xlu1 %852  ;;  %v5285_v20 = vpop.xlane.xlu0 %855  ;;  %v331_v34 = vld [vmem:[%s5271_s8 + $0x28] sm:$0xff] }
 0x151   : > { %7831 = vst [vmem:[#allocation60_spill] sm:$0xff] %v5283_v50  ;;  %7832 = vst [vmem:[#allocation61_spill] sm:$0xff] %v5285_v20  ;;  %1254 = vperm.xlu0 %3929, %v335_v23   ;;  %v341_v23 = vld [vmem:[%s5271_s8 + $0x78] sm:$0xff]  ;;  %v5490_v50 = vld [vmem:[%s4625_s5 + $0x10] sm:$0xff] }
 0x154   : > { %1236 = vperm.xlu1 %3930, %v329_v63   ;;  %v5289_v6 = vpop.xlane.xlu1 %858  ;;  %v5291_v13 = vpop.xlane.xlu0 %861 }
 0x155   : > { %7833 = vst [vmem:[#allocation62_spill] sm:$0xff] %v5289_v6  ;;  %7834 = vst [vmem:[#allocation63_spill] sm:$0xff] %v5291_v13  ;;  %1260 = vperm.xlu0 %3929, %v337_v26   ;;  %v332_v26 = vld [vmem:[%s5271_s8 + $0x30] sm:$0xff]  ;;  %v343_v13 = vld [vmem:[%s5271_s8 + $0x88] sm:$0xff] }
 0x158   : > { %1239 = vperm.xlu1 %3930, %v330_v54   ;;  %v5295_v16 = vpop.xlane.xlu1 %864  ;;  %v5297_v28 = vpop.xlane.xlu0 %867 }
 0x159   : > { %7835 = vst [vmem:[#allocation64_spill] sm:$0xff] %v5295_v16  ;;  %7836 = vst [vmem:[#allocation65_spill] sm:$0xff] %v5297_v28  ;;  %1266 = vperm.xlu0 %3929, %v339_v22   ;;  %v333_v22 = vld [vmem:[%s5271_s8 + $0x38] sm:$0xff] }
 0x15a   : > { %v345_v28 = vld [vmem:[%s5271_s8 + $0x98] sm:$0xff] }
 0x15c   : > { %1242 = vperm.xlu1 %3930, %v331_v34   ;;  %v5301_v63 = vpop.xlane.xlu1 %870  ;;  %v5303_v20 = vpop.xlane.xlu0 %873 }
 0x15d   : > { %7837 = vst [vmem:[#allocation66_spill] sm:$0xff] %v5301_v63  ;;  %7838 = vst [vmem:[#allocation67_spill] sm:$0xff] %v5303_v20  ;;  %1272 = vperm.xlu0 %3929, %v341_v23   ;;  %v334_v23 = vld [vmem:[%s5271_s8 + $0x40] sm:$0xff]  ;;  %v347_v20 = vld [vmem:[%s5271_s8 + $0xa8] sm:$0xff] }
 0x160   : > { %1245 = vperm.xlu1 %3930, %v332_v26   ;;  %v5307_v54 = vpop.xlane.xlu1 %876  ;;  %v5309_v24 = vpop.xlane.xlu0 %879 }
 0x161   : > { %7839 = vst [vmem:[#allocation68_spill] sm:$0xff] %v5307_v54  ;;  %7840 = vst [vmem:[#allocation69_spill] sm:$0xff] %v5309_v24  ;;  %1278 = vperm.xlu0 %3929, %v343_v13   ;;  %v336_v13 = vld [vmem:[%s5271_s8 + $0x50] sm:$0xff]  ;;  %v349_v24 = vld [vmem:[%s5271_s8 + $0xb8] sm:$0xff] }
 0x164   : > { %1248 = vperm.xlu1 %3930, %v333_v22   ;;  %v5313_v34 = vpop.xlane.xlu1 %882  ;;  %v5315_v7 = vpop.xlane.xlu0 %885 }
 0x165   : > { %7841 = vst [vmem:[#allocation70_spill] sm:$0xff] %v5313_v34  ;;  %7842 = vst [vmem:[#allocation71_spill] sm:$0xff] %v5315_v7  ;;  %1284 = vperm.xlu0 %3929, %v345_v28   ;;  %v338_v28 = vld [vmem:[%s5271_s8 + $0x60] sm:$0xff]  ;;  %v351_v7 = vld [vmem:[%s5271_s8 + $0xc8] sm:$0xff] }
 0x168   : > { %1251 = vperm.xlu1 %3930, %v334_v23   ;;  %v5319_v26 = vpop.xlane.xlu1 %888  ;;  %v5321_v42 = vpop.xlane.xlu0 %891 }
 0x169   : > { %7843 = vst [vmem:[#allocation72_spill] sm:$0xff] %v5319_v26  ;;  %7844 = vst [vmem:[#allocation73_spill] sm:$0xff] %v5321_v42  ;;  %1290 = vperm.xlu0 %3929, %v347_v20   ;;  %v340_v20 = vld [vmem:[%s5271_s8 + $0x70] sm:$0xff]  ;;  %v353_v42 = vld [vmem:[%s5271_s8 + $0xd8] sm:$0xff] }
 0x16c   : > { %1257 = vperm.xlu1 %3930, %v336_v13   ;;  %v5325_v22 = vpop.xlane.xlu1 %894  ;;  %v5327_v34 = vpop.xlane.xlu0 %897 }
 0x16d   : > { %7845 = vst [vmem:[#allocation74_spill] sm:$0xff] %v5325_v22  ;;  %7846 = vst [vmem:[#allocation75_spill] sm:$0xff] %v5327_v34  ;;  %1296 = vperm.xlu0 %3929, %v349_v24   ;;  %v342_v24 = vld [vmem:[%s5271_s8 + $0x80] sm:$0xff]  ;;  %v355_v34 = vld [vmem:[%s5271_s8 + $0xe8] sm:$0xff] }
 0x170   : > { %1263 = vperm.xlu1 %3930, %v338_v28   ;;  %v5331_v23 = vpop.xlane.xlu1 %900  ;;  %v5333_v26 = vpop.xlane.xlu0 %903 }
 0x171   : > { %7847 = vst [vmem:[#allocation76_spill] sm:$0xff] %v5331_v23  ;;  %7848 = vst [vmem:[#allocation77_spill] sm:$0xff] %v5333_v26  ;;  %1302 = vperm.xlu0 %3929, %v351_v7   ;;  %v344_v7 = vld [vmem:[%s5271_s8 + $0x90] sm:$0xff]  ;;  %v357_v26 = vld [vmem:[%s5271_s8 + $0xf8] sm:$0xff] }
 0x174   : > { %1269 = vperm.xlu1 %3930, %v340_v20   ;;  %v5337_v13 = vpop.xlane.xlu1 %906  ;;  %v5339_v22 = vpop.xlane.xlu0 %909 }
 0x175   : > { %7849 = vst [vmem:[#allocation78_spill] sm:$0xff] %v5337_v13  ;;  %7850 = vst [vmem:[#allocation79_spill] sm:$0xff] %v5339_v22  ;;  %1308 = vperm.xlu0 %3929, %v353_v42   ;;  %v346_v42 = vld [vmem:[%s5271_s8 + $0xa0] sm:$0xff]  ;;  %v359_v22 = vld [vmem:[%s5271_s8 + $0x108] sm:$0xff] }
 0x178   : > { %1275 = vperm.xlu1 %3930, %v342_v24   ;;  %v5343_v28 = vpop.xlane.xlu1 %912  ;;  %v5345_v23 = vpop.xlane.xlu0 %915 }
 0x179   : > { %7851 = vst [vmem:[#allocation80_spill] sm:$0xff] %v5343_v28  ;;  %7852 = vst [vmem:[#allocation81_spill] sm:$0xff] %v5345_v23  ;;  %1314 = vperm.xlu0 %3929, %v355_v34   ;;  %v348_v34 = vld [vmem:[%s5271_s8 + $0xb0] sm:$0xff]  ;;  %v361_v23 = vld [vmem:[%s5271_s8 + $0x118] sm:$0xff] }
 0x17c   : > { %1281 = vperm.xlu1 %3930, %v344_v7   ;;  %v5349_v20 = vpop.xlane.xlu1 %918  ;;  %v5351_v13 = vpop.xlane.xlu0 %921 }
 0x17d   : > { %7853 = vst [vmem:[#allocation82_spill] sm:$0xff] %v5349_v20  ;;  %7854 = vst [vmem:[#allocation83_spill] sm:$0xff] %v5351_v13  ;;  %1320 = vperm.xlu0 %3929, %v357_v26   ;;  %v350_v26 = vld [vmem:[%s5271_s8 + $0xc0] sm:$0xff]  ;;  %v363_v13 = vld [vmem:[%s5271_s8 + $0x128] sm:$0xff] }
 0x180   : > { %1287 = vperm.xlu1 %3930, %v346_v42   ;;  %v5355_v24 = vpop.xlane.xlu1 %924  ;;  %v5357_v28 = vpop.xlane.xlu0 %927 }
 0x181   : > { %7855 = vst [vmem:[#allocation84_spill] sm:$0xff] %v5355_v24  ;;  %7856 = vst [vmem:[#allocation85_spill] sm:$0xff] %v5357_v28  ;;  %1326 = vperm.xlu0 %3929, %v359_v22   ;;  %v352_v22 = vld [vmem:[%s5271_s8 + $0xd0] sm:$0xff]  ;;  %v365_v28 = vld [vmem:[%s5271_s8 + $0x138] sm:$0xff] }
 0x184   : > { %1293 = vperm.xlu1 %3930, %v348_v34   ;;  %v5361_v7 = vpop.xlane.xlu1 %930  ;;  %v5363_v20 = vpop.xlane.xlu0 %933 }
 0x185   : > { %7857 = vst [vmem:[#allocation86_spill] sm:$0xff] %v5361_v7  ;;  %7858 = vst [vmem:[#allocation87_spill] sm:$0xff] %v5363_v20  ;;  %1332 = vperm.xlu0 %3929, %v361_v23   ;;  %v354_v23 = vld [vmem:[%s5271_s8 + $0xe0] sm:$0xff]  ;;  %v367_v20 = vld [vmem:[%s5271_s8 + $0x148] sm:$0xff] }
 0x188   : > { %1299 = vperm.xlu1 %3930, %v350_v26   ;;  %v5367_v42 = vpop.xlane.xlu1 %936  ;;  %v5369_v24 = vpop.xlane.xlu0 %939 }
 0x189   : > { %7859 = vst [vmem:[#allocation88_spill] sm:$0xff] %v5367_v42  ;;  %7860 = vst [vmem:[#allocation89_spill] sm:$0xff] %v5369_v24  ;;  %1338 = vperm.xlu0 %3929, %v363_v13   ;;  %v356_v13 = vld [vmem:[%s5271_s8 + $0xf0] sm:$0xff]  ;;  %v369_v24 = vld [vmem:[%s5271_s8 + $0x158] sm:$0xff] }
 0x18c   : > { %1305 = vperm.xlu1 %3930, %v352_v22   ;;  %v5373_v34 = vpop.xlane.xlu1 %942  ;;  %v5375_v7 = vpop.xlane.xlu0 %945 }
 0x18d   : > { %7861 = vst [vmem:[#allocation90_spill] sm:$0xff] %v5373_v34  ;;  %7862 = vst [vmem:[#allocation91_spill] sm:$0xff] %v5375_v7  ;;  %1344 = vperm.xlu0 %3929, %v365_v28   ;;  %v358_v28 = vld [vmem:[%s5271_s8 + $0x100] sm:$0xff]  ;;  %v371_v7 = vld [vmem:[%s5271_s8 + $0x168] sm:$0xff] }
 0x190   : > { %1311 = vperm.xlu1 %3930, %v354_v23   ;;  %v5379_v26 = vpop.xlane.xlu1 %948  ;;  %v5381_v42 = vpop.xlane.xlu0 %951 }
 0x191   : > { %7863 = vst [vmem:[#allocation92_spill] sm:$0xff] %v5379_v26  ;;  %7864 = vst [vmem:[#allocation93_spill] sm:$0xff] %v5381_v42  ;;  %1350 = vperm.xlu0 %3929, %v367_v20   ;;  %v360_v20 = vld [vmem:[%s5271_s8 + $0x110] sm:$0xff]  ;;  %v373_v42 = vld [vmem:[%s5271_s8 + $0x178] sm:$0xff] }
 0x194   : > { %1317 = vperm.xlu1 %3930, %v356_v13   ;;  %v5385_v22 = vpop.xlane.xlu1 %954  ;;  %v5387_v34 = vpop.xlane.xlu0 %957 }
 0x195   : > { %7865 = vst [vmem:[#allocation94_spill] sm:$0xff] %v5385_v22  ;;  %7866 = vst [vmem:[#allocation95_spill] sm:$0xff] %v5387_v34  ;;  %1356 = vperm.xlu0 %3929, %v369_v24   ;;  %v362_v24 = vld [vmem:[%s5271_s8 + $0x120] sm:$0xff]  ;;  %v375_v34 = vld [vmem:[%s5271_s8 + $0x188] sm:$0xff] }
 0x198   : > { %1323 = vperm.xlu1 %3930, %v358_v28   ;;  %v5391_v23 = vpop.xlane.xlu1 %960  ;;  %v5393_v26 = vpop.xlane.xlu0 %963 }
 0x199   : > { %7867 = vst [vmem:[#allocation96_spill] sm:$0xff] %v5391_v23  ;;  %7868 = vst [vmem:[#allocation97_spill] sm:$0xff] %v5393_v26  ;;  %1362 = vperm.xlu0 %3929, %v371_v7   ;;  %v364_v7 = vld [vmem:[%s5271_s8 + $0x130] sm:$0xff]  ;;  %v377_v26 = vld [vmem:[%s5271_s8 + $0x198] sm:$0xff] }
 0x19c   : > { %1329 = vperm.xlu1 %3930, %v360_v20   ;;  %v5397_v13 = vpop.xlane.xlu1 %966  ;;  %v5399_v22 = vpop.xlane.xlu0 %969 }
 0x19d   : > { %7869 = vst [vmem:[#allocation98_spill] sm:$0xff] %v5397_v13  ;;  %7870 = vst [vmem:[#allocation99_spill] sm:$0xff] %v5399_v22  ;;  %1368 = vperm.xlu0 %3929, %v373_v42   ;;  %v366_v42 = vld [vmem:[%s5271_s8 + $0x140] sm:$0xff]  ;;  %v379_v22 = vld [vmem:[%s5271_s8 + $0x1a8] sm:$0xff] }
 0x1a0   : > { %1335 = vperm.xlu1 %3930, %v362_v24   ;;  %v5403_v28 = vpop.xlane.xlu1 %972  ;;  %v5405_v23 = vpop.xlane.xlu0 %975 }
 0x1a1   : > { %7871 = vst [vmem:[#allocation100_spill] sm:$0xff] %v5403_v28  ;;  %7872 = vst [vmem:[#allocation101_spill] sm:$0xff] %v5405_v23  ;;  %1374 = vperm.xlu0 %3929, %v375_v34   ;;  %v368_v34 = vld [vmem:[%s5271_s8 + $0x150] sm:$0xff]  ;;  %v381_v23 = vld [vmem:[%s5271_s8 + $0x1b8] sm:$0xff] }
 0x1a4   : > { %1341 = vperm.xlu1 %3930, %v364_v7   ;;  %v5409_v20 = vpop.xlane.xlu1 %978  ;;  %v5411_v13 = vpop.xlane.xlu0 %981 }
 0x1a5   : > { %7873 = vst [vmem:[#allocation102_spill] sm:$0xff] %v5409_v20  ;;  %7874 = vst [vmem:[#allocation103_spill] sm:$0xff] %v5411_v13  ;;  %1380 = vperm.xlu0 %3929, %v377_v26   ;;  %v370_v26 = vld [vmem:[%s5271_s8 + $0x160] sm:$0xff]  ;;  %v383_v13 = vld [vmem:[%s5271_s8 + $0x1c8] sm:$0xff] }
 0x1a8   : > { %1347 = vperm.xlu1 %3930, %v366_v42   ;;  %v5415_v24 = vpop.xlane.xlu1 %984  ;;  %v5417_v28 = vpop.xlane.xlu0 %987 }
 0x1a9   : > { %7875 = vst [vmem:[#allocation104_spill] sm:$0xff] %v5415_v24  ;;  %7876 = vst [vmem:[#allocation105_spill] sm:$0xff] %v5417_v28  ;;  %1386 = vperm.xlu0 %3929, %v379_v22   ;;  %v372_v22 = vld [vmem:[%s5271_s8 + $0x170] sm:$0xff]  ;;  %v385_v28 = vld [vmem:[%s5271_s8 + $0x1d8] sm:$0xff] }
 0x1ac   : > { %1353 = vperm.xlu1 %3930, %v368_v34   ;;  %v5421_v7 = vpop.xlane.xlu1 %990  ;;  %v5423_v20 = vpop.xlane.xlu0 %993 }
 0x1ad   : > { %7877 = vst [vmem:[#allocation106_spill] sm:$0xff] %v5421_v7  ;;  %7878 = vst [vmem:[#allocation107_spill] sm:$0xff] %v5423_v20  ;;  %1392 = vperm.xlu0 %3929, %v381_v23   ;;  %v374_v23 = vld [vmem:[%s5271_s8 + $0x180] sm:$0xff]  ;;  %v387_v20 = vld [vmem:[%s5271_s8 + $0x1e8] sm:$0xff] }
 0x1b0   : > { %1359 = vperm.xlu1 %3930, %v370_v26   ;;  %v5427_v42 = vpop.xlane.xlu1 %996  ;;  %v5429_v24 = vpop.xlane.xlu0 %999 }
 0x1b1   : > { %7879 = vst [vmem:[#allocation108_spill] sm:$0xff] %v5427_v42  ;;  %7880 = vst [vmem:[#allocation109_spill] sm:$0xff] %v5429_v24  ;;  %1398 = vperm.xlu0 %3929, %v383_v13   ;;  %v376_v13 = vld [vmem:[%s5271_s8 + $0x190] sm:$0xff]  ;;  %v389_v24 = vld [vmem:[%s5271_s8 + $0x1f8] sm:$0xff] }
 0x1b4   : > { %1365 = vperm.xlu1 %3930, %v372_v22   ;;  %v5433_v34 = vpop.xlane.xlu1 %1002  ;;  %v5435_v7 = vpop.xlane.xlu0 %1005 }
 0x1b5   : > { %7881 = vst [vmem:[#allocation110_spill] sm:$0xff] %v5433_v34  ;;  %7882 = vst [vmem:[#allocation111_spill] sm:$0xff] %v5435_v7  ;;  %1404 = vperm.xlu0 %3929, %v385_v28   ;;  %v378_v28 = vld [vmem:[%s5271_s8 + $0x1a0] sm:$0xff] }
 0x1b8   : > { %1371 = vperm.xlu1 %3930, %v374_v23   ;;  %v5439_v26 = vpop.xlane.xlu1 %1008  ;;  %v5441_v42 = vpop.xlane.xlu0 %1011  ;;  %v380_v23 = vld [vmem:[%s5271_s8 + $0x1b0] sm:$0xff] }
 0x1b9   : > { %7883 = vst [vmem:[#allocation112_spill] sm:$0xff] %v5439_v26  ;;  %7884 = vst [vmem:[#allocation113_spill] sm:$0xff] %v5441_v42  ;;  %1410 = vperm.xlu0 %3929, %v387_v20   ;;  %v382_v42 = vld [vmem:[%s5271_s8 + $0x1c0] sm:$0xff] }
 0x1bc   : > { %1377 = vperm.xlu1 %3930, %v376_v13   ;;  %v5445_v22 = vpop.xlane.xlu1 %1014  ;;  %v5447_v34 = vpop.xlane.xlu0 %1017 }
 0x1bd   : > { %7885 = vst [vmem:[#allocation114_spill] sm:$0xff] %v5445_v22  ;;  %7886 = vst [vmem:[#allocation115_spill] sm:$0xff] %v5447_v34  ;;  %1416 = vperm.xlu0 %3929, %v389_v24   ;;  %v384_v22 = vld [vmem:[%s5271_s8 + $0x1d0] sm:$0xff]  ;;  %v7646_v34 = vlaneseq }
 0x1c0   : > { %1383 = vperm.xlu1 %3930, %v378_v28   ;;  %v5450_v7 = vpop.xlane.xlu1 %1020  ;;  %v5453_v26 = vpop.xlane.xlu0 %1023 }
 0x1c1   : > { %7887 = vst [vmem:[#allocation116_spill] sm:$0xff] %v5450_v7  ;;  %7888 = vst [vmem:[#allocation117_spill] sm:$0xff] %v5453_v26  ;;  %v386_v7 = vld [vmem:[%s5271_s8 + $0x1e0] sm:$0xff] }
 0x1c4   : > { %1389 = vperm.xlu1 %3930, %v380_v23   ;;  %v5455_v20 = vpop.xlane.xlu1 %1026  ;;  %v5458_v54 = vpop.xlane.xlu0 %1029  ;;  %v388_v23 = vld [vmem:[%s5271_s8 + $0x1f0] sm:$0xff] }
 0x1c5   : > { %7889 = vst [vmem:[#allocation118_spill] sm:$0xff] %v5455_v20  ;;  %7890 = vst [vmem:[#allocation119_spill] sm:$0xff] %v5458_v54  ;;  %v5470_v20 = vand.u32 127, %v7646_v34 }
 0x1c7   : > { %7892 = vst [vmem:[#allocation121_spill] sm:$0xff] %v5470_v20 }
 0x1c8   : > { %1395 = vperm.xlu1 %3930, %v382_v42   ;;  %v5460_v13 = vpop.xlane.xlu1 %1032 }
 0x1c9   : > { %7891 = vst [vmem:[#allocation120_spill] sm:$0xff] %v5460_v13 }
 0x1cc   : > { %1401 = vperm.xlu1 %3930, %v384_v22   ;;  %v1231_v24 = vpop.permute.xlu1 %1230  ;;  %v5463_v28 = vpop.permute.xlu0 %1227 }
 0x1cd   : > { %vm1419_vm1 = vcmp.eq.s32.totalorder %v5470_v20, %v1231_v24  ;;  %vm1418_vm7 = vcmp.eq.s32.totalorder %v5470_v20, %v5463_v28 }
 0x1d0   : > { %1407 = vperm.xlu1 %3930, %v386_v7   ;;  %v1234_v26 = vpop.permute.xlu1 %1233  ;;  %v5466_v63 = vpop.permute.xlu0 %1254  ;;  %v5480_v7 = vld [vmem:[%s4625_s5 + $0x8] sm:$0xff] }
 0x1d1   : > { %v1483_v16 = vsel %vm1419_vm1, %v5480_v7, 0.0  ;;  %vm1420_vm2 = vcmp.eq.s32.totalorder %v5470_v20, %v1234_v26  ;;  %vm1427_vm15 = vcmp.eq.s32.totalorder %v5470_v20, %v5466_v63 }
 0x1d2   : > { %v1549_v34 = vsel %vm457_vm0, %v1483_v16, 0.0  ;;  %v1484_v24 = vsel %vm1420_vm2, %v5490_v50, 0.0  ;;  %v5498_v16 = vld [vmem:[%s4625_s5 + $0x20] sm:$0xff] }
 0x1d3   : > { %v1552_v58 = vsel %vm457_vm0, %v1484_v24, 0.0  ;;  %v5508_v24 = vld [vmem:[%s4625_s5 + $0x30] sm:$0xff] }
 0x1d4   : > { %1413 = vperm.xlu1 %3930, %v388_v23   ;;  %v5472_v42 = vpop.permute.xlu1 %1236  ;;  %v5474_v13 = vpop.permute.xlu0 %1260 }
 0x1d5   : > { %vm1421_vm9 = vcmp.eq.s32.totalorder %v5470_v20, %v5472_v42  ;;  %v5561_v42 = vld [vmem:[%s4625_s5 + $0x80] sm:$0xff]  ;;  %vm1429_vm2 = vcmp.eq.s32.totalorder %v5470_v20, %v5474_v13 }
 0x1d6   : > { %v1485_v27 = vsel %vm1421_vm9, %v5552_v40, 0.0  ;;  %v1493_v13 = vsel %vm1429_vm2, %v5610_v4, 0.0 }
 0x1d8   : > { %v1240_v22 = vpop.permute.xlu1 %1239  ;;  %v5477_v54 = vpop.permute.xlu0 %1266 }
 0x1d9   : > { %vm1422_vm3 = vcmp.eq.s32.totalorder %v5470_v20, %v1240_v22 }
 0x1dc   : > { %v5485_v6 = vpop.permute.xlu1 %1242  ;;  %1550 = vadd.xlane.f32.xlu0 %v1549_v34  ;;  %v5487_v23 = vpop.permute.xlu0 %1272  ;;  %v1486_v34 = vsel %vm1422_vm3, %v5498_v16, 0.0 }
 0x1dd   : > { %v1558_v10 = vsel %vm457_vm0, %v1486_v34, 0.0  ;;  %vm1423_vm11 = vcmp.eq.s32.totalorder %v5470_v20, %v5485_v6 }
 0x1de   : > { %v1487_v6 = vsel %vm1423_vm11, %v5567_v36, 0.0 }
 0x1e0   : > { %v1246_v3 = vpop.permute.xlu1 %1245  ;;  %1553 = vadd.xlane.f32.xlu0 %v1552_v58  ;;  %v5495_v26 = vpop.permute.xlu0 %1278 }
 0x1e1   : > { %vm1424_vm4 = vcmp.eq.s32.totalorder %v5470_v20, %v1246_v3  ;;  %v5516_v3 = vld [vmem:[%s4625_s5 + $0x40] sm:$0xff] }
 0x1e2   : > { %v1488_v58 = vsel %vm1424_vm4, %v5508_v24, 0.0  ;;  %vm1431_vm4 = vcmp.eq.s32.totalorder %v5470_v20, %v5477_v54 }
 0x1e3   : > { %v1564_v18 = vsel %vm457_vm0, %v1488_v58, 0.0  ;;  %v5524_v58 = vld [vmem:[%s4625_s5 + $0x50] sm:$0xff]  ;;  %v1495_v54 = vsel %vm1431_vm4, %v5625_v61, 0.0 }
 0x1e4   : > { %v5503_v60 = vpop.permute.xlu1 %1248  ;;  %1559 = vadd.xlane.f32.xlu0 %v1558_v10  ;;  %v5505_v22 = vpop.permute.xlu0 %1284 }
 0x1e5   : > { %vm1425_vm13 = vcmp.eq.s32.totalorder %v5470_v20, %v5503_v60 }
 0x1e6   : > { %v1489_v60 = vsel %vm1425_vm13, %v5582_v33, 0.0 }
 0x1e8   : > { %v1252_v56 = vpop.permute.xlu1 %1251  ;;  %1565 = vadd.xlane.f32.xlu0 %v1564_v18  ;;  %v5512_v59 = vpop.permute.xlu0 %1290 }
 0x1e9   : > { %vm1426_vm5 = vcmp.eq.s32.totalorder %v5470_v20, %v1252_v56 }
 0x1ea   : > { %v1490_v10 = vsel %vm1426_vm5, %v5516_v3, 0.0 }
 0x1eb   : > { %v1570_v34 = vsel %vm457_vm0, %v1490_v10, 0.0  ;;  %v5532_v10 = vld [vmem:[%s4625_s5 + $0x60] sm:$0xff] }
 0x1ec   : > { %v1258_v52 = vpop.permute.xlu1 %1257  ;;  %1571 = vadd.xlane.f32.xlu0 %v1570_v34  ;;  %v5521_v51 = vpop.permute.xlu0 %1296 }
 0x1ed   : > { %vm1428_vm6 = vcmp.eq.s32.totalorder %v5470_v20, %v1258_v52 }
 0x1ee   : > { %v1492_v18 = vsel %vm1428_vm6, %v5524_v58, 0.0  ;;  %vm1433_vm6 = vcmp.eq.s32.totalorder %v5470_v20, %v5487_v23 }
 0x1ef   : > { %v1576_v56 = vsel %vm457_vm0, %v1492_v18, 0.0  ;;  %v1482_v18 = vsel %vm1418_vm7, %v5539_v35, 0.0 }
 0x1f0   : > { %v1264_v48 = vpop.permute.xlu1 %1263  ;;  %1577 = vadd.xlane.f32.xlu0 %v1576_v56  ;;  %v5535_v34 = vpop.permute.xlu0 %1302 }
 0x1f1   : > { %vm1430_vm8 = vcmp.eq.s32.totalorder %v5470_v20, %v1264_v48  ;;  %v5546_v48 = vld [vmem:[%s4625_s5 + $0x70] sm:$0xff] }
 0x1f2   : > { %v1494_v52 = vsel %vm1430_vm8, %v5532_v10, 0.0  ;;  %vm1435_vm8 = vcmp.eq.s32.totalorder %v5470_v20, %v5495_v26 }
 0x1f3   : > { %v1582_v43 = vsel %vm457_vm0, %v1494_v52, 0.0  ;;  %v1546_v52 = vsel %vm457_vm0, %v1482_v18, 0.0  ;;  %v1499_v26 = vsel %vm1435_vm8, %v5653_v8, 0.0 }
 0x1f4   : > { %v1270_v44 = vpop.permute.xlu1 %1269  ;;  %1583 = vadd.xlane.f32.xlu0 %v1582_v43 }
 0x1f5   : > { %vm1432_vm10 = vcmp.eq.s32.totalorder %v5470_v20, %v1270_v44  ;;  %v5557_v44 = vpop.permute.xlu0 %1308 }
 0x1f6   : > { %v1496_v28 = vsel %vm1432_vm10, %v5546_v48, 0.0  ;;  %vm1437_vm10 = vcmp.eq.s32.totalorder %v5470_v20, %v5505_v22 }
 0x1f7   : > { %v1588_v56 = vsel %vm457_vm0, %v1496_v28, 0.0  ;;  %v1501_v22 = vsel %vm1437_vm10, %v5668_v32, 0.0 }
 0x1f8   : > { %v1276_v43 = vpop.permute.xlu1 %1275  ;;  %1589 = vadd.xlane.f32.xlu0 %v1588_v56  ;;  %1547 = vadd.xlane.f32.xlu1 %v1546_v52  ;;  %v1555_v56 = vsel %vm457_vm0, %v1485_v27, 0.0 }
 0x1f9   : > { %vm1434_vm12 = vcmp.eq.s32.totalorder %v5470_v20, %v1276_v43  ;;  %v5574_v43 = vld [vmem:[%s4625_s5 + $0x90] sm:$0xff]  ;;  %v5577_v19 = vpop.permute.xlu0 %1314 }
 0x1fa   : > { %v1498_v18 = vsel %vm1434_vm12, %v5561_v42, 0.0  ;;  %vm1439_vm12 = vcmp.eq.s32.totalorder %v5470_v20, %v5512_v59 }
 0x1fb   : > { %v1594_v28 = vsel %vm457_vm0, %v1498_v18, 0.0 }
 0x1fc   : > { %v1282_v52 = vpop.permute.xlu1 %1281  ;;  %1595 = vadd.xlane.f32.xlu0 %v1594_v28  ;;  %1556 = vadd.xlane.f32.xlu1 %v1555_v56  ;;  %v1561_v28 = vsel %vm457_vm0, %v1487_v6, 0.0  ;;  %v1567_v6 = vsel %vm457_vm0, %v1489_v60, 0.0 }
 0x1fd   : > { %vm1436_vm14 = vcmp.eq.s32.totalorder %v5470_v20, %v1282_v52  ;;  %v5589_v52 = vld [vmem:[%s4625_s5 + $0xa0] sm:$0xff]  ;;  %v5600_v63 = vpop.permute.xlu0 %1320 }
 0x1fe   : > { %v1500_v18 = vsel %vm1436_vm14, %v5574_v43, 0.0  ;;  %vm1441_vm14 = vcmp.eq.s32.totalorder %v5470_v20, %v5521_v51 }
 0x1ff   : > { %v1600_v27 = vsel %vm457_vm0, %v1500_v18, 0.0 }
 0x200   : > { %v1288_v56 = vpop.permute.xlu1 %1287  ;;  %1601 = vadd.xlane.f32.xlu0 %v1600_v27  ;;  %1562 = vadd.xlane.f32.xlu1 %v1561_v28  ;;  %v5595_v28 = vld [vmem:[%s4625_s5 + $0x48] sm:$0xff] }
 0x201   : > { %vm1438_vm1 = vcmp.eq.s32.totalorder %v5470_v20, %v1288_v56  ;;  %v1491_v29 = vsel %vm1427_vm15, %v5595_v28, 0.0  ;;  %v5604_v56 = vld [vmem:[%s4625_s5 + $0xb0] sm:$0xff]  ;;  %v5620_v25 = vpop.permute.xlu0 %1326 }
 0x202   : > { %v1502_v18 = vsel %vm1438_vm1, %v5589_v52, 0.0  ;;  %vm1443_vm1 = vcmp.eq.s32.totalorder %v5470_v20, %v5535_v34 }
 0x203   : > { %v1606_v11 = vsel %vm457_vm0, %v1502_v18, 0.0 }
 0x204   : > { %v1294_v27 = vpop.permute.xlu1 %1293  ;;  %1607 = vadd.xlane.f32.xlu0 %v1606_v11  ;;  %1568 = vadd.xlane.f32.xlu1 %v1567_v6  ;;  %v1573_v11 = vsel %vm457_vm0, %v1491_v29, 0.0 }
 0x205   : > { %vm1440_vm3 = vcmp.eq.s32.totalorder %v5470_v20, %v1294_v27  ;;  %v5617_v27 = vld [vmem:[%s4625_s5 + $0xc0] sm:$0xff]  ;;  %v5643_v23 = vpop.permute.xlu0 %1332 }
 0x206   : > { %v1504_v60 = vsel %vm1440_vm3, %v5604_v56, 0.0  ;;  %vm1445_vm3 = vcmp.eq.s32.totalorder %v5470_v20, %v5557_v44 }
 0x207   : > { %v1612_v18 = vsel %vm457_vm0, %v1504_v60, 0.0 }
 0x208   : > { %v1300_v6 = vpop.permute.xlu1 %1299  ;;  %1613 = vadd.xlane.f32.xlu0 %v1612_v18  ;;  %1574 = vadd.xlane.f32.xlu1 %v1573_v11  ;;  %v1579_v18 = vsel %vm457_vm0, %v1493_v13, 0.0  ;;  %v1585_v13 = vsel %vm457_vm0, %v1495_v54, 0.0 }
 0x209   : > { %vm1442_vm5 = vcmp.eq.s32.totalorder %v5470_v20, %v1300_v6  ;;  %v5632_v6 = vld [vmem:[%s4625_s5 + $0xd0] sm:$0xff]  ;;  %v5663_v53 = vpop.permute.xlu0 %1338 }
 0x20a   : > { %v1506_v60 = vsel %vm1442_vm5, %v5617_v27, 0.0  ;;  %vm1447_vm5 = vcmp.eq.s32.totalorder %v5470_v20, %v5577_v19 }
 0x20b   : > { %v1618_v29 = vsel %vm457_vm0, %v1506_v60, 0.0 }
 0x20c   : > { %v1306_v11 = vpop.permute.xlu1 %1305  ;;  %1619 = vadd.xlane.f32.xlu0 %v1618_v29  ;;  %1580 = vadd.xlane.f32.xlu1 %v1579_v18  ;;  %v5638_v18 = vld [vmem:[%s4625_s5 + $0x78] sm:$0xff] }
 0x20d   : > { %vm1444_vm7 = vcmp.eq.s32.totalorder %v5470_v20, %v1306_v11  ;;  %v1497_v57 = vsel %vm1433_vm6, %v5638_v18, 0.0  ;;  %v5647_v11 = vld [vmem:[%s4625_s5 + $0xe0] sm:$0xff]  ;;  %v5686_v59 = vpop.permute.xlu0 %1344 }
 0x20e   : > { %v1508_v60 = vsel %vm1444_vm7, %v5632_v6, 0.0  ;;  %vm1449_vm7 = vcmp.eq.s32.totalorder %v5470_v20, %v5600_v63 }
 0x20f   : > { %v1624_v14 = vsel %vm457_vm0, %v1508_v60, 0.0 }
 0x210   : > { %v1312_v29 = vpop.permute.xlu1 %1311  ;;  %1625 = vadd.xlane.f32.xlu0 %v1624_v14  ;;  %1586 = vadd.xlane.f32.xlu1 %v1585_v13  ;;  %v1591_v14 = vsel %vm457_vm0, %v1497_v57, 0.0 }
 0x211   : > { %vm1446_vm9 = vcmp.eq.s32.totalorder %v5470_v20, %v1312_v29  ;;  %v5660_v29 = vld [vmem:[%s4625_s5 + $0xf0] sm:$0xff] }
 0x212   : > { %v1510_v54 = vsel %vm1446_vm9, %v5647_v11, 0.0  ;;  %vm1451_vm9 = vcmp.eq.s32.totalorder %v5470_v20, %v5620_v25 }
 0x213   : > { %v1630_v60 = vsel %vm457_vm0, %v1510_v54, 0.0 }
 0x214   : > { %v1318_v13 = vpop.permute.xlu1 %1317  ;;  %1631 = vadd.xlane.f32.xlu0 %v1630_v60  ;;  %1592 = vadd.xlane.f32.xlu1 %v1591_v14  ;;  %v1597_v60 = vsel %vm457_vm0, %v1499_v26, 0.0  ;;  %v1603_v26 = vsel %vm457_vm0, %v1501_v22, 0.0 }
 0x215   : > { %vm1448_vm11 = vcmp.eq.s32.totalorder %v5470_v20, %v1318_v13  ;;  %v5675_v13 = vld [vmem:[%s4625_s5 + $0x100] sm:$0xff] }
 0x216   : > { %v1512_v54 = vsel %vm1448_vm11, %v5660_v29, 0.0  ;;  %vm1453_vm11 = vcmp.eq.s32.totalorder %v5470_v20, %v5643_v23 }
 0x217   : > { %v1636_v57 = vsel %vm457_vm0, %v1512_v54, 0.0 }
 0x218   : > { %v1324_v14 = vpop.permute.xlu1 %1323  ;;  %1637 = vadd.xlane.f32.xlu0 %v1636_v57  ;;  %1598 = vadd.xlane.f32.xlu1 %v1597_v60  ;;  %v5681_v60 = vld [vmem:[%s4625_s5 + $0xa8] sm:$0xff] }
 0x219   : > { %vm1450_vm13 = vcmp.eq.s32.totalorder %v5470_v20, %v1324_v14  ;;  %7895 = vst [vmem:[#allocation124_spill] sm:$0xff] %v5681_v60  ;;  %v1503_v32 = vsel %vm1439_vm12, %v5681_v60, 0.0  ;;  %v5690_v14 = vld [vmem:[%s4625_s5 + $0x110] sm:$0xff]  ;;  %v5696_v60 = vld [vmem:[%s4625_s5 + $0xb8] sm:$0xff] }
 0x21a   : > { %v1514_v54 = vsel %vm1450_vm13, %v5675_v13, 0.0  ;;  %7896 = vst [vmem:[#allocation125_spill] sm:$0xff] %v5690_v14  ;;  %7897 = vst [vmem:[#allocation126_spill] sm:$0xff] %v5696_v60  ;;  %v1505_v51 = vsel %vm1441_vm14, %v5696_v60, 0.0  ;;  %v5711_v60 = vld [vmem:[%s4625_s5 + $0xc8] sm:$0xff]  ;;  %vm1455_vm13 = vcmp.eq.s32.totalorder %v5470_v20, %v5663_v53 }
 0x21b   : > { %v1642_v8 = vsel %vm457_vm0, %v1514_v54, 0.0  ;;  %7899 = vst [vmem:[#allocation128_spill] sm:$0xff] %v5711_v60  ;;  %v1507_v34 = vsel %vm1443_vm1, %v5711_v60, 0.0 }
 0x21c   : > { %v1330_v57 = vpop.permute.xlu1 %1329  ;;  %1643 = vadd.xlane.f32.xlu0 %v1642_v8  ;;  %1604 = vadd.xlane.f32.xlu1 %v1603_v26  ;;  %v1609_v8 = vsel %vm457_vm0, %v1503_v32, 0.0 }
 0x21d   : > { %vm1452_vm15 = vcmp.eq.s32.totalorder %v5470_v20, %v1330_v57  ;;  %v5703_v57 = vld [vmem:[%s4625_s5 + $0x120] sm:$0xff] }
 0x21e   : > { %v1516_v22 = vsel %vm1452_vm15, %v5690_v14, 0.0  ;;  %7898 = vst [vmem:[#allocation127_spill] sm:$0xff] %v5703_v57  ;;  %v5706_v14 = vpop.permute.xlu0 %1350  ;;  %vm1457_vm15 = vcmp.eq.s32.totalorder %v5470_v20, %v5686_v59 }
 0x21f   : > { %v1648_v54 = vsel %vm457_vm0, %v1516_v22, 0.0 }
 0x220   : > { %v1336_v26 = vpop.permute.xlu1 %1335  ;;  %1649 = vadd.xlane.f32.xlu0 %v1648_v54  ;;  %1610 = vadd.xlane.f32.xlu1 %v1609_v8  ;;  %v1615_v54 = vsel %vm457_vm0, %v1505_v51, 0.0  ;;  %v1621_v51 = vsel %vm457_vm0, %v1507_v34, 0.0 }
 0x221   : > { %vm1454_vm2 = vcmp.eq.s32.totalorder %v5470_v20, %v1336_v26  ;;  %v5718_v26 = vld [vmem:[%s4625_s5 + $0x130] sm:$0xff] }
 0x222   : > { %v1518_v22 = vsel %vm1454_vm2, %v5703_v57, 0.0  ;;  %v5729_v44 = vpop.permute.xlu0 %1356  ;;  %vm1459_vm2 = vcmp.eq.s32.totalorder %v5470_v20, %v5706_v14 }
 0x223   : > { %v1654_v32 = vsel %vm457_vm0, %v1518_v22, 0.0 }
 0x224   : > { %v1342_v8 = vpop.permute.xlu1 %1341  ;;  %1655 = vadd.xlane.f32.xlu0 %v1654_v32  ;;  %1616 = vadd.xlane.f32.xlu1 %v1615_v54  ;;  %v5724_v54 = vld [vmem:[%s4625_s5 + $0xd8] sm:$0xff] }
 0x225   : > { %vm1456_vm4 = vcmp.eq.s32.totalorder %v5470_v20, %v1342_v8  ;;  %7900 = vst [vmem:[#allocation129_spill] sm:$0xff] %v5724_v54  ;;  %v1509_v60 = vsel %vm1445_vm3, %v5724_v54, 0.0  ;;  %v5733_v8 = vld [vmem:[%s4625_s5 + $0x140] sm:$0xff]  ;;  %v5739_v54 = vld [vmem:[%s4625_s5 + $0xe8] sm:$0xff] }
 0x226   : > { %v1520_v22 = vsel %vm1456_vm4, %v5718_v26, 0.0  ;;  %7901 = vst [vmem:[#allocation130_spill] sm:$0xff] %v5733_v8  ;;  %7902 = vst [vmem:[#allocation131_spill] sm:$0xff] %v5739_v54  ;;  %v1511_v19 = vsel %vm1447_vm5, %v5739_v54, 0.0  ;;  %v5754_v54 = vld [vmem:[%s4625_s5 + $0xf8] sm:$0xff]  ;;  %vm1461_vm4 = vcmp.eq.s32.totalorder %v5470_v20, %v5729_v44 }
 0x227   : > { %v1660_v57 = vsel %vm457_vm0, %v1520_v22, 0.0  ;;  %7904 = vst [vmem:[#allocation133_spill] sm:$0xff] %v5754_v54  ;;  %v1513_v63 = vsel %vm1449_vm7, %v5754_v54, 0.0 }
 0x228   : > { %v1348_v32 = vpop.permute.xlu1 %1347  ;;  %1661 = vadd.xlane.f32.xlu0 %v1660_v57  ;;  %1622 = vadd.xlane.f32.xlu1 %v1621_v51  ;;  %v1627_v57 = vsel %vm457_vm0, %v1509_v60, 0.0 }
 0x229   : > { %vm1458_vm6 = vcmp.eq.s32.totalorder %v5470_v20, %v1348_v32  ;;  %v5746_v32 = vld [vmem:[%s4625_s5 + $0x150] sm:$0xff] }
 0x22a   : > { %v1522_v34 = vsel %vm1458_vm6, %v5733_v8, 0.0  ;;  %7903 = vst [vmem:[#allocation132_spill] sm:$0xff] %v5746_v32  ;;  %v5749_v8 = vpop.permute.xlu0 %1362 }
 0x22b   : > { %v1666_v22 = vsel %vm457_vm0, %v1522_v34, 0.0  ;;  %vm1463_vm6 = vcmp.eq.s32.totalorder %v5470_v20, %v5749_v8 }
 0x22c   : > { %v1354_v51 = vpop.permute.xlu1 %1353  ;;  %1667 = vadd.xlane.f32.xlu0 %v1666_v22  ;;  %1628 = vadd.xlane.f32.xlu1 %v1627_v57  ;;  %v1633_v22 = vsel %vm457_vm0, %v1511_v19, 0.0  ;;  %v1639_v19 = vsel %vm457_vm0, %v1513_v63, 0.0 }
 0x22d   : > { %vm1460_vm8 = vcmp.eq.s32.totalorder %v5470_v20, %v1354_v51  ;;  %v5761_v51 = vld [vmem:[%s4625_s5 + $0x160] sm:$0xff] }
 0x22e   : > { %v1524_v34 = vsel %vm1460_vm8, %v5746_v32, 0.0  ;;  %v5772_v25 = vpop.permute.xlu0 %1368 }
 0x22f   : > { %v1672_v60 = vsel %vm457_vm0, %v1524_v34, 0.0  ;;  %vm1465_vm8 = vcmp.eq.s32.totalorder %v5470_v20, %v5772_v25  ;;  %v5873_v25 = vld [vmem:[%s4625_s5 + $0x1e0] sm:$0xff] }
 0x230   : > { %v1360_v57 = vpop.permute.xlu1 %1359  ;;  %1673 = vadd.xlane.f32.xlu0 %v1672_v60  ;;  %1634 = vadd.xlane.f32.xlu1 %v1633_v22  ;;  %v5767_v22 = vld [vmem:[%s4625_s5 + $0x108] sm:$0xff]  ;;  %7919 = vst [vmem:[#allocation148_spill] sm:$0xff] %v5873_v25 }
 0x231   : > { %vm1462_vm10 = vcmp.eq.s32.totalorder %v5470_v20, %v1360_v57  ;;  %7905 = vst [vmem:[#allocation134_spill] sm:$0xff] %v5767_v22  ;;  %v1515_v54 = vsel %vm1451_vm9, %v5767_v22, 0.0  ;;  %v5776_v57 = vld [vmem:[%s4625_s5 + $0x170] sm:$0xff]  ;;  %v5782_v22 = vld [vmem:[%s4625_s5 + $0x118] sm:$0xff] }
 0x232   : > { %v1526_v34 = vsel %vm1462_vm10, %v5761_v51, 0.0  ;;  %7906 = vst [vmem:[#allocation135_spill] sm:$0xff] %v5776_v57  ;;  %7907 = vst [vmem:[#allocation136_spill] sm:$0xff] %v5782_v22  ;;  %v1517_v23 = vsel %vm1453_vm11, %v5782_v22, 0.0  ;;  %v5797_v22 = vld [vmem:[%s4625_s5 + $0x128] sm:$0xff] }
 0x233   : > { %v1678_v32 = vsel %vm457_vm0, %v1526_v34, 0.0  ;;  %7909 = vst [vmem:[#allocation138_spill] sm:$0xff] %v5797_v22  ;;  %v1519_v53 = vsel %vm1455_vm13, %v5797_v22, 0.0 }
 0x234   : > { %v1366_v60 = vpop.permute.xlu1 %1365  ;;  %1679 = vadd.xlane.f32.xlu0 %v1678_v32  ;;  %1640 = vadd.xlane.f32.xlu1 %v1639_v19  ;;  %v1645_v32 = vsel %vm457_vm0, %v1515_v54, 0.0 }
 0x235   : > { %vm1464_vm12 = vcmp.eq.s32.totalorder %v5470_v20, %v1366_v60  ;;  %v5789_v60 = vld [vmem:[%s4625_s5 + $0x180] sm:$0xff] }
 0x236   : > { %v1528_v63 = vsel %vm1464_vm12, %v5776_v57, 0.0  ;;  %7908 = vst [vmem:[#allocation137_spill] sm:$0xff] %v5789_v60  ;;  %v5792_v57 = vpop.permute.xlu0 %1374 }
 0x237   : > { %v1684_v34 = vsel %vm457_vm0, %v1528_v63, 0.0  ;;  %vm1467_vm10 = vcmp.eq.s32.totalorder %v5470_v20, %v5792_v57 }
 0x238   : > { %v1372_v19 = vpop.permute.xlu1 %1371  ;;  %1685 = vadd.xlane.f32.xlu0 %v1684_v34  ;;  %1646 = vadd.xlane.f32.xlu1 %v1645_v32  ;;  %v1651_v34 = vsel %vm457_vm0, %v1517_v23, 0.0  ;;  %v1657_v23 = vsel %vm457_vm0, %v1519_v53, 0.0 }
 0x239   : > { %vm1466_vm14 = vcmp.eq.s32.totalorder %v5470_v20, %v1372_v19  ;;  %v5804_v19 = vld [vmem:[%s4625_s5 + $0x190] sm:$0xff] }
 0x23a   : > { %v1530_v63 = vsel %vm1466_vm14, %v5789_v60, 0.0  ;;  %v5815_v59 = vpop.permute.xlu0 %1380 }
 0x23b   : > { %v1690_v54 = vsel %vm457_vm0, %v1530_v63, 0.0  ;;  %vm1469_vm12 = vcmp.eq.s32.totalorder %v5470_v20, %v5815_v59 }
 0x23c   : > { %v1378_v32 = vpop.permute.xlu1 %1377  ;;  %1691 = vadd.xlane.f32.xlu0 %v1690_v54  ;;  %1652 = vadd.xlane.f32.xlu1 %v1651_v34  ;;  %v5810_v34 = vld [vmem:[%s4625_s5 + $0x138] sm:$0xff] }
 0x23d   : > { %vm1468_vm1 = vcmp.eq.s32.totalorder %v5470_v20, %v1378_v32  ;;  %7910 = vst [vmem:[#allocation139_spill] sm:$0xff] %v5810_v34  ;;  %v1521_v22 = vsel %vm1457_vm15, %v5810_v34, 0.0  ;;  %v5819_v32 = vld [vmem:[%s4625_s5 + $0x1a0] sm:$0xff]  ;;  %v5825_v34 = vld [vmem:[%s4625_s5 + $0x148] sm:$0xff] }
 0x23e   : > { %v1532_v63 = vsel %vm1468_vm1, %v5804_v19, 0.0  ;;  %7911 = vst [vmem:[#allocation140_spill] sm:$0xff] %v5819_v32  ;;  %7912 = vst [vmem:[#allocation141_spill] sm:$0xff] %v5825_v34  ;;  %v1523_v14 = vsel %vm1459_vm2, %v5825_v34, 0.0  ;;  %v5840_v34 = vld [vmem:[%s4625_s5 + $0x158] sm:$0xff]  ;;  %vm1805_vm1 = vcmp.ge.f32.partialorder %v5490_v50, %v4949_v62 }
 0x23f   : > { %v1696_v60 = vsel %vm457_vm0, %v1532_v63, 0.0  ;;  %7914 = vst [vmem:[#allocation143_spill] sm:$0xff] %v5840_v34  ;;  %v1525_v44 = vsel %vm1461_vm4, %v5840_v34, 0.0 }
 0x240   : > { %v1384_v54 = vpop.permute.xlu1 %1383  ;;  %1697 = vadd.xlane.f32.xlu0 %v1696_v60  ;;  %1658 = vadd.xlane.f32.xlu1 %v1657_v23  ;;  %v1663_v60 = vsel %vm457_vm0, %v1521_v22, 0.0 }
 0x241   : > { %vm1470_vm3 = vcmp.eq.s32.totalorder %v5470_v20, %v1384_v54  ;;  %v5832_v54 = vld [vmem:[%s4625_s5 + $0x1b0] sm:$0xff] }
 0x242   : > { %v1534_v53 = vsel %vm1470_vm3, %v5819_v32, 0.0  ;;  %7913 = vst [vmem:[#allocation142_spill] sm:$0xff] %v5832_v54  ;;  %v5835_v32 = vpop.permute.xlu0 %1386  ;;  %vm1807_vm3 = vcmp.ge.f32.partialorder %v5498_v16, %v4963_v0 }
 0x243   : > { %v1702_v63 = vsel %vm457_vm0, %v1534_v53, 0.0  ;;  %vm1471_vm15 = vcmp.eq.s32.totalorder %v5470_v20, %v5835_v32 }
 0x244   : > { %v1390_v23 = vpop.permute.xlu1 %1389  ;;  %1703 = vadd.xlane.f32.xlu0 %v1702_v63  ;;  %1664 = vadd.xlane.f32.xlu1 %v1663_v60  ;;  %v1669_v63 = vsel %vm457_vm0, %v1523_v14, 0.0  ;;  %v1675_v14 = vsel %vm457_vm0, %v1525_v44, 0.0 }
 0x245   : > { %vm1472_vm5 = vcmp.eq.s32.totalorder %v5470_v20, %v1390_v23  ;;  %v5847_v23 = vld [vmem:[%s4625_s5 + $0x1c0] sm:$0xff] }
 0x246   : > { %v1536_v53 = vsel %vm1472_vm5, %v5832_v54, 0.0  ;;  %7915 = vst [vmem:[#allocation144_spill] sm:$0xff] %v5847_v23  ;;  %v1393_v8 = vpop.permute.xlu0 %1392  ;;  %vm1809_vm5 = vcmp.ge.f32.partialorder %v5508_v24, %v4971_v15 }
 0x247   : > { %v1708_v22 = vsel %vm457_vm0, %v1536_v53, 0.0  ;;  %vm1473_vm2 = vcmp.eq.s32.totalorder %v5470_v20, %v1393_v8 }
 0x248   : > { %v1396_v60 = vpop.permute.xlu1 %1395  ;;  %1709 = vadd.xlane.f32.xlu0 %v1708_v22  ;;  %1670 = vadd.xlane.f32.xlu1 %v1669_v63  ;;  %v5853_v63 = vld [vmem:[%s4625_s5 + $0x168] sm:$0xff] }
 0x249   : > { %vm1474_vm7 = vcmp.eq.s32.totalorder %v5470_v20, %v1396_v60  ;;  %7916 = vst [vmem:[#allocation145_spill] sm:$0xff] %v5853_v63  ;;  %v1527_v34 = vsel %vm1463_vm6, %v5853_v63, 0.0  ;;  %v5860_v60 = vld [vmem:[%s4625_s5 + $0x1d0] sm:$0xff] }
 0x24a   : > { %v1538_v53 = vsel %vm1474_vm7, %v5847_v23, 0.0  ;;  %7917 = vst [vmem:[#allocation146_spill] sm:$0xff] %v5860_v60  ;;  %v5866_v23 = vld [vmem:[%s4625_s5 + $0x178] sm:$0xff]  ;;  %vm1811_vm7 = vcmp.ge.f32.partialorder %v5516_v3, %v4979_v9 }
 0x24b   : > { %v1714_v54 = vsel %vm457_vm0, %v1538_v53, 0.0  ;;  %7918 = vst [vmem:[#allocation147_spill] sm:$0xff] %v5866_v23  ;;  %v1529_v63 = vsel %vm1465_vm8, %v5866_v23, 0.0  ;;  %v5879_v23 = vld [vmem:[%s4625_s5 + $0x188] sm:$0xff] }
 0x24c   : > { %v1402_v22 = vpop.permute.xlu1 %1401  ;;  %1715 = vadd.xlane.f32.xlu0 %v1714_v54  ;;  %1676 = vadd.xlane.f32.xlu1 %v1675_v14  ;;  %v1681_v54 = vsel %vm457_vm0, %v1527_v34, 0.0  ;;  %7920 = vst [vmem:[#allocation149_spill] sm:$0xff] %v5879_v23  ;;  %v1531_v57 = vsel %vm1467_vm10, %v5879_v23, 0.0 }
 0x24d   : > { %vm1476_vm9 = vcmp.eq.s32.totalorder %v5470_v20, %v1402_v22 }
 0x24e   : > { %v1540_v53 = vsel %vm1476_vm9, %v5860_v60, 0.0  ;;  %v5883_v60 = vcvt.s32.f32 %v5470_v20  ;;  %vm1813_vm9 = vcmp.ge.f32.partialorder %v5524_v58, %v4989_v5 }
 0x24f   : > { %v1720_v44 = vsel %vm457_vm0, %v1540_v53, 0.0  ;;  %v1399_v53 = vpop.permute.xlu0 %1398 }
 0x250   : > { %v1408_v14 = vpop.permute.xlu1 %1407  ;;  %1721 = vadd.xlane.f32.xlu0 %v1720_v44  ;;  %1682 = vadd.xlane.f32.xlu1 %v1681_v54  ;;  %v1687_v44 = vsel %vm457_vm0, %v1529_v63, 0.0  ;;  %v5891_v63 = vld [vmem:[%s4625_s5 + $0x1f0] sm:$0xff]  ;;  %vm1475_vm4 = vcmp.eq.s32.totalorder %v5470_v20, %v1399_v53 }
 0x251   : > { %vm1478_vm11 = vcmp.eq.s32.totalorder %v5470_v20, %v1408_v14  ;;  %v7921_v14 = vld [vmem:[#allocation17_spill] sm:$0xff] }
 0x252   : > { %v1542_v22 = vsel %vm1478_vm11, %v5873_v25, 0.0  ;;  %vm1803_vm14 = vcmp.ge.f32.partialorder %v5539_v35, %v7921_v14  ;;  %v5898_v25 = vld [vmem:[%s4625_s5 + $0x198] sm:$0xff]  ;;  %vm1815_vm11 = vcmp.ge.f32.partialorder %v5532_v10, %v4999_v12 }
 0x253   : > { %v1726_v34 = vsel %vm457_vm0, %v1542_v22, 0.0  ;;  %v1867_v23 = vsel %vm1803_vm14, %v5883_v60, 5.0  ;;  %v1533_v59 = vsel %vm1469_vm12, %v5898_v25, 0.0  ;;  %v1405_v35 = vpop.permute.xlu0 %1404  ;;  %vm1817_vm12 = vcmp.ge.f32.partialorder %v5546_v48, %v5009_v17  ;;  %v7974_v17 = vld [vmem:[#allocation138_spill] sm:$0xff] }
 0x254   : > { %v1414_v54 = vpop.permute.xlu1 %1413  ;;  %1727 = vadd.xlane.f32.xlu0 %v1726_v34  ;;  %1688 = vadd.xlane.f32.xlu1 %v1687_v44  ;;  %v1693_v44 = vsel %vm457_vm0, %v1531_v57, 0.0  ;;  %v1699_v57 = vsel %vm457_vm0, %v1533_v59, 0.0  ;;  %v1871_v59 = vsel %vm1807_vm3, %v5883_v60, 5.0  ;;  %vm1477_vm6 = vcmp.eq.s32.totalorder %v5470_v20, %v1405_v35 }
 0x255   : > { %vm1480_vm13 = vcmp.eq.s32.totalorder %v5470_v20, %v1414_v54  ;;  %v1931_v54 = vsel %vm457_vm0, %v1867_v23, inf  ;;  %v1943_v16 = vsel %vm457_vm0, %v1871_v59, inf  ;;  %v1875_v59 = vsel %vm1811_vm7, %v5883_v60, 5.0 }
 0x256   : > { %v1544_v22 = vsel %vm1480_vm13, %v5891_v63, 0.0  ;;  %v1955_v3 = vsel %vm457_vm0, %v1875_v59, inf  ;;  %v1879_v59 = vsel %vm1815_vm11, %v5883_v60, 5.0  ;;  %vm1804_vm13 = vcmp.ge.f32.partialorder %v5480_v7, %v4955_v39 }
 0x257   : > { %v1732_v34 = vsel %vm457_vm0, %v1544_v22, 0.0  ;;  %v1869_v22 = vsel %vm1805_vm1, %v5883_v60, 5.0  ;;  %v1411_v50 = vpop.permute.xlu0 %1410  ;;  %v1967_v10 = vsel %vm457_vm0, %v1879_v59, inf  ;;  %vm1819_vm14 = vcmp.ge.f32.partialorder %v5561_v42, %v5019_v21  ;;  %v7957_v21 = vld [vmem:[#allocation132_spill] sm:$0xff] }
 0x258   : > { %1733 = vadd.xlane.f32.xlu0 %v1732_v34  ;;  %1694 = vadd.xlane.f32.xlu1 %v1693_v44  ;;  %v5909_v34 = vld [vmem:[%s4625_s5 + $0x1a8] sm:$0xff]  ;;  %v1937_v32 = vsel %vm457_vm0, %v1869_v22, inf  ;;  %v1873_v22 = vsel %vm1809_vm5, %v5883_v60, 5.0  ;;  %vm1479_vm8 = vcmp.eq.s32.totalorder %v5470_v20, %v1411_v50  ;;  %v1883_v59 = vsel %vm1819_vm14, %v5883_v60, 5.0 }
 0x259   : > { %v1535_v44 = vsel %vm1471_vm15, %v5909_v34, 0.0  ;;  %v1949_v24 = vsel %vm457_vm0, %v1873_v22, inf  ;;  %v1877_v22 = vsel %vm1813_vm9, %v5883_v60, 5.0  ;;  %vm1821_vm1 = vcmp.ge.f32.partialorder %v5574_v43, %v5029_v38  ;;  %v7952_v38 = vld [vmem:[#allocation130_spill] sm:$0xff] }
 0x25a   : > { %v1705_v23 = vsel %vm457_vm0, %v1535_v44, 0.0  ;;  %v5929_v44 = vld [vmem:[%s4625_s5 + $0x1c8] sm:$0xff]  ;;  %v1961_v58 = vsel %vm457_vm0, %v1877_v22, inf  ;;  %v1881_v22 = vsel %vm1817_vm12, %v5883_v60, 5.0  ;;  %vm1823_vm3 = vcmp.ge.f32.partialorder %v5589_v52, %v5039_v46  ;;  %v7946_v46 = vld [vmem:[#allocation128_spill] sm:$0xff] }
 0x25b   : > { %v1973_v7 = vsel %vm457_vm0, %v1881_v22, inf  ;;  %v1885_v22 = vsel %vm1821_vm1, %v5883_v60, 5.0  ;;  %vm1825_vm5 = vcmp.ge.f32.partialorder %v5604_v56, %v5049_v30  ;;  %vm1827_vm7 = vcmp.ge.f32.partialorder %v5617_v27, %v5059_v37  ;;  %v7936_v37 = vld [vmem:[#allocation124_spill] sm:$0xff]  ;;  %v7941_v30 = vld [vmem:[#allocation126_spill] sm:$0xff] }
 0x25c   : > { %1932 = vmin.xlane.f32.xlu0 %v1931_v54  ;;  %1700 = vadd.xlane.f32.xlu1 %v1699_v57  ;;  %v5919_v54 = vld [vmem:[%s4625_s5 + $0x1b8] sm:$0xff]  ;;  %vm1829_vm9 = vcmp.ge.f32.partialorder %v5632_v6, %v5069_v41  ;;  %vm1831_vm11 = vcmp.ge.f32.partialorder %v5647_v11, %v5079_v45  ;;  %vm1818_vm12 = vcmp.ge.f32.partialorder %v5638_v18, %v5012_v47  ;;  %v7929_v11 = vld [vmem:[#allocation122_spill] sm:$0xff]  ;;  %v7932_v45 = vld [vmem:[#allocation123_spill] sm:$0xff] }
 0x25d   : > { %v1537_v57 = vsel %vm1473_vm2, %v5919_v54, 0.0  ;;  %vm1820_vm14 = vcmp.ge.f32.partialorder %v7929_v11, %v5022_v31  ;;  %v7935_v41 = vld [vmem:[#allocation26_spill] sm:$0xff] }
 0x25e   : > { %v1711_v8 = vsel %vm457_vm0, %v1537_v57, 0.0  ;;  %v5939_v57 = vld [vmem:[%s4625_s5 + $0x1d8] sm:$0xff] }
 0x260   : > { %1938 = vmin.xlane.f32.xlu0 %v1937_v32  ;;  %1706 = vadd.xlane.f32.xlu1 %v1705_v23  ;;  %v1539_v32 = vsel %vm1475_vm4, %v5929_v44, 0.0  ;;  %v1417_v23 = vpop.permute.xlu0 %1416 }
 0x261   : > { %v1717_v53 = vsel %vm457_vm0, %v1539_v32, 0.0  ;;  %v5951_v32 = vld [vmem:[%s4625_s5 + $0x1e8] sm:$0xff]  ;;  %vm1481_vm10 = vcmp.eq.s32.totalorder %v5470_v20, %v1417_v23  ;;  %v7931_v20 = vld [vmem:[#allocation24_spill] sm:$0xff] }
 0x264   : > { %1944 = vmin.xlane.f32.xlu0 %v1943_v16  ;;  %1712 = vadd.xlane.f32.xlu1 %v1711_v8  ;;  %v1541_v16 = vsel %vm1477_vm6, %v5939_v57, 0.0  ;;  %vm1812_vm6 = vcmp.ge.f32.partialorder %v5595_v28, %v4982_v1 }
 0x265   : > { %v1723_v8 = vsel %vm457_vm0, %v1541_v16, 0.0  ;;  %v5963_v16 = vld [vmem:[%s4625_s5 + $0x1f8] sm:$0xff] }
 0x268   : > { %1950 = vmin.xlane.f32.xlu0 %v1949_v24  ;;  %1718 = vadd.xlane.f32.xlu1 %v1717_v53  ;;  %v1543_v24 = vsel %vm1479_vm8, %v5951_v32, 0.0  ;;  %vm1814_vm8 = vcmp.ge.f32.partialorder %v5610_v4, %v4992_v55 }
 0x269   : > { %v5943_v35 = vpop.xlane.xlu0 %1550  ;;  %v1729_v53 = vsel %vm457_vm0, %v1543_v24, 0.0  ;;  %v1868_v24 = vsel %vm1804_vm13, %v5883_v60, 5.0  ;;  %vm1833_vm13 = vcmp.ge.f32.partialorder %v5660_v29, %v5089_v49  ;;  %v7933_v29 = vld [vmem:[#allocation37_spill] sm:$0xff] }
 0x26a   : > { %v1934_v48 = vsel %vm457_vm0, %v1868_v24, inf  ;;  %vm1835_vm1 = vcmp.ge.f32.partialorder %v5675_v13, %v7933_v29 }
 0x26c   : > { %1956 = vmin.xlane.f32.xlu0 %v1955_v3  ;;  %1724 = vadd.xlane.f32.xlu1 %v1723_v8  ;;  %v1545_v3 = vsel %vm1481_vm10, %v5963_v16, 0.0  ;;  %vm1816_vm10 = vcmp.ge.f32.partialorder %v5625_v61, %v5002_v2 }
 0x26d   : > { %v5955_v50 = vpop.xlane.xlu0 %1553  ;;  %v1735_v23 = vsel %vm457_vm0, %v1545_v3, 0.0 }
 0x270   : > { %1962 = vmin.xlane.f32.xlu0 %v1961_v58  ;;  %1730 = vadd.xlane.f32.xlu1 %v1729_v53  ;;  %v7922_v53 = vld [vmem:[#allocation18_spill] sm:$0xff] }
 0x271   : > { %v5966_v8 = vpop.xlane.xlu0 %1559  ;;  %vm1806_vm15 = vcmp.ge.f32.partialorder %v5552_v40, %v7922_v53  ;;  %v1979_v40 = vsel %vm457_vm0, %v1883_v59, inf  ;;  %v1887_v59 = vsel %vm1823_vm3, %v5883_v60, 5.0 }
 0x272   : > { %v1870_v3 = vsel %vm1806_vm15, %v5883_v60, 5.0  ;;  %vm1822_vm15 = vcmp.ge.f32.partialorder %v7932_v45, %v7931_v20  ;;  %v7937_v45 = vld [vmem:[#allocation39_spill] sm:$0xff] }
 0x273   : > { %v1940_v42 = vsel %vm457_vm0, %v1870_v3, inf  ;;  %v1886_v11 = vsel %vm1822_vm15, %v5883_v60, 5.0 }
 0x274   : > { %1968 = vmin.xlane.f32.xlu0 %v1967_v10  ;;  %1736 = vadd.xlane.f32.xlu1 %v1735_v23  ;;  %v7923_v23 = vld [vmem:[#allocation19_spill] sm:$0xff]  ;;  %v1988_v13 = vsel %vm457_vm0, %v1886_v11, inf }
 0x275   : > { %v5976_v58 = vpop.xlane.xlu0 %1565  ;;  %vm1808_vm2 = vcmp.ge.f32.partialorder %v5567_v36, %v7923_v23  ;;  %v1985_v36 = vsel %vm457_vm0, %v1885_v22, inf  ;;  %v1876_v22 = vsel %vm1812_vm6, %v5883_v60, 5.0 }
 0x276   : > { %v1872_v24 = vsel %vm1808_vm2, %v5883_v60, 5.0  ;;  %v1958_v56 = vsel %vm457_vm0, %v1876_v22, inf  ;;  %vm1824_vm2 = vcmp.ge.f32.partialorder %v7936_v37, %v7935_v41  ;;  %v7942_v37 = vld [vmem:[#allocation41_spill] sm:$0xff] }
 0x277   : > { %v1946_v43 = vsel %vm457_vm0, %v1872_v24, inf }
 0x278   : > { %1974 = vmin.xlane.f32.xlu0 %v1973_v7  ;;  %1935 = vmin.xlane.f32.xlu1 %v1934_v48  ;;  %v7924_v48 = vld [vmem:[#allocation20_spill] sm:$0xff] }
 0x279   : > { %v5986_v10 = vpop.xlane.xlu0 %1571  ;;  %vm1810_vm4 = vcmp.ge.f32.partialorder %v5582_v33, %v7924_v48  ;;  %v1991_v33 = vsel %vm457_vm0, %v1887_v59, inf  ;;  %v1878_v59 = vsel %vm1814_vm8, %v5883_v60, 5.0 }
 0x27a   : > { %v1874_v3 = vsel %vm1810_vm4, %v5883_v60, 5.0  ;;  %v1964_v27 = vsel %vm457_vm0, %v1878_v59, inf }
 0x27b   : > { %v1952_v52 = vsel %vm457_vm0, %v1874_v3, inf }
 0x27c   : > { %1980 = vmin.xlane.f32.xlu0 %v1979_v40  ;;  %1941 = vmin.xlane.f32.xlu1 %v1940_v42  ;;  %v1889_v42 = vsel %vm1825_vm5, %v5883_v60, 5.0 }
 0x27d   : > { %v5996_v7 = vpop.xlane.xlu0 %1577  ;;  %v1997_v28 = vsel %vm457_vm0, %v1889_v42, inf  ;;  %v1880_v42 = vsel %vm1816_vm10, %v5883_v60, 5.0 }
 0x27e   : > { %v1970_v6 = vsel %vm457_vm0, %v1880_v42, inf  ;;  %v1884_v42 = vsel %vm1820_vm14, %v5883_v60, 5.0 }
 0x280   : > { %1986 = vmin.xlane.f32.xlu0 %v1985_v36  ;;  %1947 = vmin.xlane.f32.xlu1 %v1946_v43  ;;  %v1891_v43 = vsel %vm1827_vm7, %v5883_v60, 5.0 }
 0x281   : > { %v6006_v40 = vpop.xlane.xlu0 %1583  ;;  %v2003_v4 = vsel %vm457_vm0, %v1891_v43, inf  ;;  %v1882_v43 = vsel %vm1818_vm12, %v5883_v60, 5.0 }
 0x284   : > { %1992 = vmin.xlane.f32.xlu0 %v1991_v33  ;;  %1953 = vmin.xlane.f32.xlu1 %v1952_v52  ;;  %v1893_v52 = vsel %vm1829_vm9, %v5883_v60, 5.0 }
 0x285   : > { %v6016_v24 = vpop.xlane.xlu1 %1547  ;;  %v6018_v36 = vpop.xlane.xlu0 %1589  ;;  %v2009_v61 = vsel %vm457_vm0, %v1893_v52, inf  ;;  %v1897_v52 = vsel %vm1833_vm13, %v5883_v60, 5.0 }
 0x286   : > { %7925 = vst [vmem:[#allocation17_spill] sm:$0xff] %v6018_v36  ;;  %v7960_v36 = vld [vmem:[#allocation133_spill] sm:$0xff] }
 0x288   : > { %1998 = vmin.xlane.f32.xlu0 %v1997_v28  ;;  %1959 = vmin.xlane.f32.xlu1 %v1958_v56  ;;  %v1895_v56 = vsel %vm1831_vm11, %v5883_v60, 5.0 }
 0x289   : > { %v6028_v3 = vpop.xlane.xlu1 %1556  ;;  %v6030_v33 = vpop.xlane.xlu0 %1595  ;;  %v2015_v18 = vsel %vm457_vm0, %v1895_v56, inf  ;;  %v2021_v56 = vsel %vm457_vm0, %v1897_v52, inf }
 0x28a   : > { %7926 = vst [vmem:[#allocation18_spill] sm:$0xff] %v6030_v33  ;;  %v7955_v33 = vld [vmem:[#allocation131_spill] sm:$0xff] }
 0x28c   : > { %2004 = vmin.xlane.f32.xlu0 %v2003_v4  ;;  %1965 = vmin.xlane.f32.xlu1 %v1964_v27  ;;  %v1976_v27 = vsel %vm457_vm0, %v1882_v43, inf  ;;  %v1982_v43 = vsel %vm457_vm0, %v1884_v42, inf  ;;  %v1888_v42 = vsel %vm1824_vm2, %v5883_v60, 5.0 }
 0x28d   : > { %v6040_v22 = vpop.xlane.xlu1 %1562  ;;  %v6042_v28 = vpop.xlane.xlu0 %1601 }
 0x28e   : > { %7927 = vst [vmem:[#allocation19_spill] sm:$0xff] %v6042_v28  ;;  %v7950_v28 = vld [vmem:[#allocation129_spill] sm:$0xff] }
 0x290   : > { %2010 = vmin.xlane.f32.xlu0 %v2009_v61  ;;  %1971 = vmin.xlane.f32.xlu1 %v1970_v6 }
 0x291   : > { %v6052_v59 = vpop.xlane.xlu1 %1568  ;;  %v6054_v4 = vpop.xlane.xlu0 %1607 }
 0x292   : > { %7928 = vst [vmem:[#allocation20_spill] sm:$0xff] %v6054_v4  ;;  %v7943_v4 = vld [vmem:[#allocation127_spill] sm:$0xff] }
 0x293   : > { %vm1839_vm5 = vcmp.ge.f32.partialorder %v7943_v4, %v7942_v37 }
 0x294   : > { %2016 = vmin.xlane.f32.xlu0 %v2015_v18  ;;  %1977 = vmin.xlane.f32.xlu1 %v1976_v27  ;;  %v1899_v18 = vsel %vm1835_vm1, %v5883_v60, 5.0 }
 0x295   : > { %v6064_v61 = vpop.xlane.xlu1 %1574  ;;  %v6066_v6 = vpop.xlane.xlu0 %1613  ;;  %v2027_v52 = vsel %vm457_vm0, %v1899_v18, inf }
 0x296   : > { %7930 = vst [vmem:[#allocation122_spill] sm:$0xff] %v6066_v6  ;;  %v7938_v6 = vld [vmem:[#allocation125_spill] sm:$0xff] }
 0x297   : > { %vm1837_vm3 = vcmp.ge.f32.partialorder %v7938_v6, %v7937_v45  ;;  %v1994_v6 = vsel %vm457_vm0, %v1888_v42, inf }
 0x298   : > { %2022 = vmin.xlane.f32.xlu0 %v2021_v56  ;;  %1983 = vmin.xlane.f32.xlu1 %v1982_v43  ;;  %v1901_v56 = vsel %vm1837_vm3, %v5883_v60, 5.0 }
 0x299   : > { %v6076_v27 = vpop.xlane.xlu1 %1580  ;;  %v6078_v49 = vpop.xlane.xlu0 %1619  ;;  %v2033_v11 = vsel %vm457_vm0, %v1901_v56, inf }
 0x29a   : > { %7934 = vst [vmem:[#allocation24_spill] sm:$0xff] %v6078_v49  ;;  %v7940_v49 = vld [vmem:[#allocation28_spill] sm:$0xff] }
 0x29b   : > { %vm1826_vm4 = vcmp.ge.f32.partialorder %v7941_v30, %v7940_v49  ;;  %v7947_v30 = vld [vmem:[#allocation43_spill] sm:$0xff] }
 0x29c   : > { %1989 = vmin.xlane.f32.xlu1 %v1988_v13  ;;  %2028 = vmin.xlane.f32.xlu0 %v2027_v52  ;;  %v1890_v18 = vsel %vm1826_vm4, %v5883_v60, 5.0  ;;  %v1903_v13 = vsel %vm1839_vm5, %v5883_v60, 5.0  ;;  %vm1841_vm7 = vcmp.ge.f32.partialorder %v5718_v26, %v7947_v30 }
 0x29d   : > { %v6088_v43 = vpop.xlane.xlu1 %1586  ;;  %v6090_v29 = vpop.xlane.xlu0 %1625  ;;  %v2000_v4 = vsel %vm457_vm0, %v1890_v18, inf  ;;  %v2039_v42 = vsel %vm457_vm0, %v1903_v13, inf }
 0x29e   : > { %7939 = vst [vmem:[#allocation123_spill] sm:$0xff] %v6090_v29  ;;  %v7945_v29 = vld [vmem:[#allocation30_spill] sm:$0xff] }
 0x29f   : > { %vm1828_vm6 = vcmp.ge.f32.partialorder %v7946_v46, %v7945_v29  ;;  %v7951_v46 = vld [vmem:[#allocation45_spill] sm:$0xff] }
 0x2a0   : > { %1995 = vmin.xlane.f32.xlu1 %v1994_v6  ;;  %2034 = vmin.xlane.f32.xlu0 %v2033_v11  ;;  %v1892_v56 = vsel %vm1828_vm6, %v5883_v60, 5.0  ;;  %v1905_v6 = vsel %vm1841_vm7, %v5883_v60, 5.0  ;;  %vm1843_vm9 = vcmp.ge.f32.partialorder %v7952_v38, %v7951_v46 }
 0x2a1   : > { %v6100_v52 = vpop.xlane.xlu1 %1592  ;;  %v6102_v45 = vpop.xlane.xlu0 %1631  ;;  %v2006_v26 = vsel %vm457_vm0, %v1892_v56, inf  ;;  %v2045_v18 = vsel %vm457_vm0, %v1905_v6, inf }
 0x2a2   : > { %7944 = vst [vmem:[#allocation26_spill] sm:$0xff] %v6102_v45  ;;  %v7949_v45 = vld [vmem:[#allocation32_spill] sm:$0xff] }
 0x2a3   : > { %vm1830_vm8 = vcmp.ge.f32.partialorder %v7950_v28, %v7949_v45  ;;  %v7956_v28 = vld [vmem:[#allocation47_spill] sm:$0xff]  ;;  %v7969_v45 = vld [vmem:[#allocation136_spill] sm:$0xff] }
 0x2a4   : > { %2001 = vmin.xlane.f32.xlu1 %v2000_v4  ;;  %2040 = vmin.xlane.f32.xlu0 %v2039_v42  ;;  %v1894_v13 = vsel %vm1830_vm8, %v5883_v60, 5.0  ;;  %v1907_v4 = vsel %vm1843_vm9, %v5883_v60, 5.0  ;;  %vm1845_vm11 = vcmp.ge.f32.partialorder %v7957_v21, %v7956_v28 }
 0x2a5   : > { %v6112_v11 = vpop.xlane.xlu1 %1598  ;;  %v6114_v37 = vpop.xlane.xlu0 %1637  ;;  %v2012_v38 = vsel %vm457_vm0, %v1894_v13, inf  ;;  %v2051_v56 = vsel %vm457_vm0, %v1907_v4, inf }
 0x2a6   : > { %7948 = vst [vmem:[#allocation124_spill] sm:$0xff] %v6114_v37  ;;  %v7954_v37 = vld [vmem:[#allocation34_spill] sm:$0xff] }
 0x2a7   : > { %vm1832_vm10 = vcmp.ge.f32.partialorder %v7955_v33, %v7954_v37  ;;  %v7961_v33 = vld [vmem:[#allocation49_spill] sm:$0xff]  ;;  %v7964_v37 = vld [vmem:[#allocation134_spill] sm:$0xff] }
 0x2a8   : > { %2007 = vmin.xlane.f32.xlu1 %v2006_v26  ;;  %2046 = vmin.xlane.f32.xlu0 %v2045_v18  ;;  %v1896_v6 = vsel %vm1832_vm10, %v5883_v60, 5.0  ;;  %v1909_v26 = vsel %vm1845_vm11, %v5883_v60, 5.0  ;;  %vm1847_vm13 = vcmp.ge.f32.partialorder %v5761_v51, %v7961_v33 }
 0x2a9   : > { %v6124_v42 = vpop.xlane.xlu1 %1604  ;;  %v6126_v30 = vpop.xlane.xlu0 %1643  ;;  %v2018_v21 = vsel %vm457_vm0, %v1896_v6, inf  ;;  %v2057_v13 = vsel %vm457_vm0, %v1909_v26, inf }
 0x2aa   : > { %7953 = vst [vmem:[#allocation125_spill] sm:$0xff] %v6126_v30  ;;  %v7959_v30 = vld [vmem:[#allocation36_spill] sm:$0xff] }
 0x2ab   : > { %vm1834_vm12 = vcmp.ge.f32.partialorder %v7960_v36, %v7959_v30  ;;  %v7965_v36 = vld [vmem:[#allocation51_spill] sm:$0xff] }
 0x2ac   : > { %2013 = vmin.xlane.f32.xlu1 %v2012_v38  ;;  %2052 = vmin.xlane.f32.xlu0 %v2051_v56  ;;  %v1898_v4 = vsel %vm1834_vm12, %v5883_v60, 5.0  ;;  %v1911_v38 = vsel %vm1847_vm13, %v5883_v60, 5.0  ;;  %v7966_v30 = vld [vmem:[#allocation135_spill] sm:$0xff] }
 0x2ad   : > { %v6136_v18 = vpop.xlane.xlu1 %1610  ;;  %v6138_v46 = vpop.xlane.xlu0 %1649  ;;  %vm1849_vm15 = vcmp.ge.f32.partialorder %v7966_v30, %v7965_v36  ;;  %v2024_v51 = vsel %vm457_vm0, %v1898_v4, inf  ;;  %v2063_v6 = vsel %vm457_vm0, %v1911_v38, inf }
 0x2ae   : > { %7958 = vst [vmem:[#allocation28_spill] sm:$0xff] %v6138_v46  ;;  %v7963_v46 = vld [vmem:[#allocation38_spill] sm:$0xff] }
 0x2af   : > { %vm1836_vm14 = vcmp.ge.f32.partialorder %v7964_v37, %v7963_v46  ;;  %v7970_v37 = vld [vmem:[#allocation53_spill] sm:$0xff] }
 0x2b0   : > { %2019 = vmin.xlane.f32.xlu1 %v2018_v21  ;;  %2058 = vmin.xlane.f32.xlu0 %v2057_v13  ;;  %v1900_v26 = vsel %vm1836_vm14, %v5883_v60, 5.0  ;;  %v1913_v21 = vsel %vm1849_vm15, %v5883_v60, 5.0  ;;  %v7971_v46 = vld [vmem:[#allocation137_spill] sm:$0xff] }
 0x2b1   : > { %v6148_v56 = vpop.xlane.xlu1 %1616  ;;  %v6150_v28 = vpop.xlane.xlu0 %1655  ;;  %vm1851_vm2 = vcmp.ge.f32.partialorder %v7971_v46, %v7970_v37  ;;  %v2030_v30 = vsel %vm457_vm0, %v1900_v26, inf  ;;  %v2069_v4 = vsel %vm457_vm0, %v1913_v21, inf }
 0x2b2   : > { %7962 = vst [vmem:[#allocation126_spill] sm:$0xff] %v6150_v28  ;;  %v7968_v28 = vld [vmem:[#allocation40_spill] sm:$0xff] }
 0x2b3   : > { %vm1838_vm1 = vcmp.ge.f32.partialorder %v7969_v45, %v7968_v28  ;;  %v7975_v45 = vld [vmem:[#allocation55_spill] sm:$0xff] }
 0x2b4   : > { %2025 = vmin.xlane.f32.xlu1 %v2024_v51  ;;  %2064 = vmin.xlane.f32.xlu0 %v2063_v6  ;;  %v1902_v38 = vsel %vm1838_vm1, %v5883_v60, 5.0  ;;  %v1915_v51 = vsel %vm1851_vm2, %v5883_v60, 5.0  ;;  %vm1853_vm4 = vcmp.ge.f32.partialorder %v5804_v19, %v7975_v45  ;;  %v7979_v28 = vld [vmem:[#allocation139_spill] sm:$0xff] }
 0x2b5   : > { %v6160_v13 = vpop.xlane.xlu1 %1622  ;;  %v6162_v33 = vpop.xlane.xlu0 %1661  ;;  %v2036_v46 = vsel %vm457_vm0, %v1902_v38, inf  ;;  %v2075_v26 = vsel %vm457_vm0, %v1915_v51, inf }
 0x2b6   : > { %7967 = vst [vmem:[#allocation127_spill] sm:$0xff] %v6162_v33  ;;  %v7973_v33 = vld [vmem:[#allocation42_spill] sm:$0xff] }
 0x2b7   : > { %vm1840_vm3 = vcmp.ge.f32.partialorder %v7974_v17, %v7973_v33  ;;  %v7980_v17 = vld [vmem:[#allocation57_spill] sm:$0xff]  ;;  %v7981_v33 = vld [vmem:[#allocation140_spill] sm:$0xff] }
 0x2b8   : > { %2031 = vmin.xlane.f32.xlu1 %v2030_v30  ;;  %2070 = vmin.xlane.f32.xlu0 %v2069_v4  ;;  %v1904_v21 = vsel %vm1840_vm3, %v5883_v60, 5.0  ;;  %v1917_v30 = vsel %vm1853_vm4, %v5883_v60, 5.0  ;;  %vm1855_vm6 = vcmp.ge.f32.partialorder %v7981_v33, %v7980_v17 }
 0x2b9   : > { %v6172_v6 = vpop.xlane.xlu1 %1628  ;;  %v6174_v36 = vpop.xlane.xlu0 %1667  ;;  %v2042_v19 = vsel %vm457_vm0, %v1904_v21, inf  ;;  %v2081_v38 = vsel %vm457_vm0, %v1917_v30, inf }
 0x2ba   : > { %7972 = vst [vmem:[#allocation30_spill] sm:$0xff] %v6174_v36  ;;  %v7978_v36 = vld [vmem:[#allocation44_spill] sm:$0xff] }
 0x2bb   : > { %vm1842_vm5 = vcmp.ge.f32.partialorder %v7979_v28, %v7978_v36  ;;  %v7986_v28 = vld [vmem:[#allocation5_spill] sm:$0xff]  ;;  %v7987_v36 = vld [vmem:[#allocation142_spill] sm:$0xff] }
 0x2bc   : > { %2037 = vmin.xlane.f32.xlu1 %v2036_v46  ;;  %2076 = vmin.xlane.f32.xlu0 %v2075_v26  ;;  %v1906_v51 = vsel %vm1842_vm5, %v5883_v60, 5.0  ;;  %v1919_v46 = vsel %vm1855_vm6, %v5883_v60, 5.0  ;;  %vm1857_vm8 = vcmp.ge.f32.partialorder %v7987_v36, %v7986_v28 }
 0x2bd   : > { %v6184_v4 = vpop.xlane.xlu1 %1634  ;;  %v6186_v37 = vpop.xlane.xlu0 %1673  ;;  %v2048_v33 = vsel %vm457_vm0, %v1906_v51, inf  ;;  %v2087_v21 = vsel %vm457_vm0, %v1919_v46, inf }
 0x2be   : > { %7976 = vst [vmem:[#allocation128_spill] sm:$0xff] %v6184_v4  ;;  %7977 = vst [vmem:[#allocation129_spill] sm:$0xff] %v6186_v37  ;;  %v7984_v37 = vld [vmem:[#allocation46_spill] sm:$0xff]  ;;  %v7985_v4 = vld [vmem:[#allocation141_spill] sm:$0xff] }
 0x2bf   : > { %vm1844_vm7 = vcmp.ge.f32.partialorder %v7985_v4, %v7984_v37  ;;  %v7992_v4 = vld [vmem:[#allocation7_spill] sm:$0xff]  ;;  %v7993_v37 = vld [vmem:[#allocation144_spill] sm:$0xff] }
 0x2c0   : > { %2043 = vmin.xlane.f32.xlu1 %v2042_v19  ;;  %2082 = vmin.xlane.f32.xlu0 %v2081_v38  ;;  %v1908_v30 = vsel %vm1844_vm7, %v5883_v60, 5.0  ;;  %v1921_v19 = vsel %vm1857_vm8, %v5883_v60, 5.0  ;;  %vm1859_vm10 = vcmp.ge.f32.partialorder %v7993_v37, %v7992_v4 }
 0x2c1   : > { %v6196_v26 = vpop.xlane.xlu1 %1640  ;;  %v6198_v45 = vpop.xlane.xlu0 %1679  ;;  %v2054_v36 = vsel %vm457_vm0, %v1908_v30, inf  ;;  %v2093_v51 = vsel %vm457_vm0, %v1921_v19, inf }
 0x2c2   : > { %7982 = vst [vmem:[#allocation130_spill] sm:$0xff] %v6196_v26  ;;  %7983 = vst [vmem:[#allocation131_spill] sm:$0xff] %v6198_v45  ;;  %v7990_v45 = vld [vmem:[#allocation48_spill] sm:$0xff]  ;;  %v7991_v26 = vld [vmem:[#allocation143_spill] sm:$0xff] }
 0x2c3   : > { %vm1846_vm9 = vcmp.ge.f32.partialorder %v7991_v26, %v7990_v45  ;;  %v7998_v26 = vld [vmem:[#allocation9_spill] sm:$0xff]  ;;  %v7999_v45 = vld [vmem:[#allocation146_spill] sm:$0xff] }
 0x2c4   : > { %2049 = vmin.xlane.f32.xlu1 %v2048_v33  ;;  %2088 = vmin.xlane.f32.xlu0 %v2087_v21  ;;  %v1910_v46 = vsel %vm1846_vm9, %v5883_v60, 5.0  ;;  %v1923_v33 = vsel %vm1859_vm10, %v5883_v60, 5.0  ;;  %vm1861_vm12 = vcmp.ge.f32.partialorder %v7999_v45, %v7998_v26 }
 0x2c5   : > { %v6208_v38 = vpop.xlane.xlu1 %1646  ;;  %v6210_v17 = vpop.xlane.xlu0 %1685  ;;  %v2060_v37 = vsel %vm457_vm0, %v1910_v46, inf  ;;  %v2099_v30 = vsel %vm457_vm0, %v1923_v33, inf }
 0x2c6   : > { %7988 = vst [vmem:[#allocation132_spill] sm:$0xff] %v6208_v38  ;;  %7989 = vst [vmem:[#allocation133_spill] sm:$0xff] %v6210_v17  ;;  %v7996_v17 = vld [vmem:[#allocation50_spill] sm:$0xff]  ;;  %v7997_v38 = vld [vmem:[#allocation145_spill] sm:$0xff] }
 0x2c7   : > { %vm1848_vm11 = vcmp.ge.f32.partialorder %v7997_v38, %v7996_v17  ;;  %v8004_v38 = vld [vmem:[#allocation11_spill] sm:$0xff]  ;;  %v8005_v17 = vld [vmem:[#allocation148_spill] sm:$0xff] }
 0x2c8   : > { %2055 = vmin.xlane.f32.xlu1 %v2054_v36  ;;  %2094 = vmin.xlane.f32.xlu0 %v2093_v51  ;;  %v1912_v19 = vsel %vm1848_vm11, %v5883_v60, 5.0  ;;  %v1925_v36 = vsel %vm1861_vm12, %v5883_v60, 5.0  ;;  %vm1863_vm14 = vcmp.ge.f32.partialorder %v8005_v17, %v8004_v38 }
 0x2c9   : > { %v6220_v21 = vpop.xlane.xlu1 %1652  ;;  %v6222_v28 = vpop.xlane.xlu0 %1691  ;;  %v2066_v45 = vsel %vm457_vm0, %v1912_v19, inf  ;;  %v2105_v46 = vsel %vm457_vm0, %v1925_v36, inf }
 0x2ca   : > { %7994 = vst [vmem:[#allocation134_spill] sm:$0xff] %v6220_v21  ;;  %7995 = vst [vmem:[#allocation135_spill] sm:$0xff] %v6222_v28  ;;  %v8002_v28 = vld [vmem:[#allocation52_spill] sm:$0xff]  ;;  %v8003_v21 = vld [vmem:[#allocation147_spill] sm:$0xff] }
 0x2cb   : > { %vm1850_vm13 = vcmp.ge.f32.partialorder %v8003_v21, %v8002_v28  ;;  %v8009_v21 = vld [vmem:[#allocation13_spill] sm:$0xff] }
 0x2cc   : > { %2061 = vmin.xlane.f32.xlu1 %v2060_v37  ;;  %2100 = vmin.xlane.f32.xlu0 %v2099_v30  ;;  %v1914_v33 = vsel %vm1850_vm13, %v5883_v60, 5.0  ;;  %v1927_v37 = vsel %vm1863_vm14, %v5883_v60, 5.0  ;;  %vm1865_vm1 = vcmp.ge.f32.partialorder %v5891_v63, %v8009_v21  ;;  %v8015_v21 = vld [vmem:[#allocation58_spill] sm:$0xff] }
 0x2cd   : > { %v6232_v51 = vpop.xlane.xlu1 %1658  ;;  %v6234_v4 = vpop.xlane.xlu0 %1697  ;;  %v2072_v17 = vsel %vm457_vm0, %v1914_v33, inf  ;;  %v2111_v19 = vsel %vm457_vm0, %v1927_v37, inf  ;;  %vm1856_vm3 = vcmp.ge.f32.partialorder %v5909_v34, %v8015_v21  ;;  %v8019_v21 = vld [vmem:[#allocation64_spill] sm:$0xff] }
 0x2ce   : > { %8000 = vst [vmem:[#allocation136_spill] sm:$0xff] %v6232_v51  ;;  %8001 = vst [vmem:[#allocation137_spill] sm:$0xff] %v6234_v4  ;;  %v8007_v4 = vld [vmem:[#allocation54_spill] sm:$0xff]  ;;  %v8008_v51 = vld [vmem:[#allocation149_spill] sm:$0xff] }
 0x2cf   : > { %vm1852_vm15 = vcmp.ge.f32.partialorder %v8008_v51, %v8007_v4  ;;  %v8012_v51 = vld [vmem:[#allocation56_spill] sm:$0xff] }
 0x2d0   : > { %2067 = vmin.xlane.f32.xlu1 %v2066_v45  ;;  %2106 = vmin.xlane.f32.xlu0 %v2105_v46  ;;  %v1916_v36 = vsel %vm1852_vm15, %v5883_v60, 5.0  ;;  %v1929_v45 = vsel %vm1865_vm1, %v5883_v60, 5.0  ;;  %v8010_v46 = vld [vmem:[#allocation15_spill] sm:$0xff]  ;;  %vm1854_vm2 = vcmp.ge.f32.partialorder %v5898_v25, %v8012_v51  ;;  %v1920_v25 = vsel %vm1856_vm3, %v5883_v60, 5.0 }
 0x2d1   : > { %v6244_v30 = vpop.xlane.xlu1 %1664  ;;  %v6246_v26 = vpop.xlane.xlu0 %1703  ;;  %4219 = vlog2.f32 %v8010_v46  ;;  %v2078_v63 = vsel %vm457_vm0, %v1916_v36, inf  ;;  %v2117_v33 = vsel %vm457_vm0, %v1929_v45, inf  ;;  %v1918_v37 = vsel %vm1854_vm2, %v5883_v60, 5.0  ;;  %v8016_v36 = vld [vmem:[#allocation62_spill] sm:$0xff] }
 0x2d2   : > { %8006 = vst [vmem:[#allocation138_spill] sm:$0xff] %v6246_v26 }
 0x2d4   : > { %2073 = vmin.xlane.f32.xlu1 %v2072_v17  ;;  %2112 = vmin.xlane.f32.xlu0 %v2111_v19  ;;  %v8013_v17 = vld [vmem:[#allocation60_spill] sm:$0xff] }
 0x2d5   : > { %v6257_v28 = vpop.xlane.xlu1 %1670  ;;  %v6259_v38 = vpop.xlane.xlu0 %1709  ;;  %4221 = vlog2.f32 %v8013_v17 }
 0x2d6   : > { %8011 = vst [vmem:[#allocation139_spill] sm:$0xff] %v6259_v38  ;;  %v2084_v38 = vsel %vm457_vm0, %v1918_v37, inf  ;;  %4223 = vlog2.f32 %v8016_v36  ;;  %v8022_v36 = vld [vmem:[#allocation8_spill] sm:$0xff] }
 0x2d7   : > { %4225 = vlog2.f32 %v8019_v21  ;;  %vm1860_vm5 = vcmp.ge.f32.partialorder %v5929_v44, %v8022_v36 }
 0x2d8   : > { %2079 = vmin.xlane.f32.xlu1 %v2078_v63  ;;  %2118 = vmin.xlane.f32.xlu0 %v2117_v33  ;;  %v8018_v33 = vld [vmem:[#allocation6_spill] sm:$0xff] }
 0x2d9   : > { %v6267_v19 = vpop.xlane.xlu1 %1676  ;;  %v6269_v46 = vpop.xlane.xlu0 %1715  ;;  %vm1858_vm4 = vcmp.ge.f32.partialorder %v5919_v54, %v8018_v33 }
 0x2da   : > { %8014 = vst [vmem:[#allocation140_spill] sm:$0xff] %v6269_v46  ;;  %v2090_v46 = vsel %vm457_vm0, %v1920_v25, inf  ;;  %v1922_v34 = vsel %vm1858_vm4, %v5883_v60, 5.0  ;;  %v1924_v25 = vsel %vm1860_vm5, %v5883_v60, 5.0 }
 0x2db   : > { %v4220_v17 = vpop.eup %4219  ;;  %v2096_v54 = vsel %vm457_vm0, %v1922_v34, inf }
 0x2dc   : > { %2085 = vmin.xlane.f32.xlu1 %v2084_v38 }
 0x2dd   : > { %v6276_v45 = vpop.xlane.xlu1 %1682  ;;  %v6278_v63 = vpop.xlane.xlu0 %1721 }
 0x2de   : > { %8017 = vst [vmem:[#allocation141_spill] sm:$0xff] %v6278_v63  ;;  %v1035_v63 = vmul.f32 0.6931472, %v4220_v17  ;;  %v2102_v17 = vsel %vm457_vm0, %v1924_v25, inf }
 0x2df   : > { %v4222_v51 = vpop.eup %4221 }
 0x2e0   : > { %2091 = vmin.xlane.f32.xlu1 %v2090_v46  ;;  %v8023_v46 = vld [vmem:[#allocation66_spill] sm:$0xff]  ;;  %v1162_v4 = vadd.f32 %v1035_v63, %v7921_v14  ;;  %v4224_v44 = vpop.eup %4223  ;;  %v8029_v63 = vld [vmem:[#allocation12_spill] sm:$0xff] }
 0x2e1   : > { %v6285_v38 = vpop.xlane.xlu1 %1688  ;;  %v6287_v37 = vpop.xlane.xlu0 %1727  ;;  %4227 = vlog2.f32 %v8023_v46  ;;  %v8027_v46 = vld [vmem:[#allocation68_spill] sm:$0xff]  ;;  %vm1864_vm7 = vcmp.ge.f32.partialorder %v5951_v32, %v8029_v63  ;;  %v1045_v25 = vmul.f32 0.6931472, %v4224_v44 }
 0x2e2   : > { %8020 = vst [vmem:[#allocation142_spill] sm:$0xff] %v6285_v38  ;;  %8021 = vst [vmem:[#allocation143_spill] sm:$0xff] %v6287_v37  ;;  %v8026_v38 = vld [vmem:[#allocation10_spill] sm:$0xff]  ;;  %v1041_v37 = vmul.f32 0.6931472, %v4222_v51  ;;  %v1738_v34 = vsub.f32 %v1162_v4, %v6016_v24  ;;  %4229 = vlog2.f32 %v8027_v46  ;;  %v8030_v4 = vld [vmem:[#allocation16_spill] sm:$0xff] }
 0x2e3   : > { %vm1862_vm6 = vcmp.ge.f32.partialorder %v5939_v57, %v8026_v38  ;;  %v390_v57 = vld [vmem:[%s6306_s11] sm:$0xff]  ;;  %4231 = vlog2.f32 %v8030_v4  ;;  %v1928_v46 = vsel %vm1864_vm7, %v5883_v60, 5.0  ;;  %v1167_v44 = vadd.f32 %v1045_v25, %v7923_v23  ;;  %v395_v4 = vld [vmem:[%s6306_s11 + $0x28] sm:$0xff] }
 0x2e4   : > { %2097 = vmin.xlane.f32.xlu1 %v2096_v54  ;;  %v1926_v54 = vsel %vm1862_vm6, %v5883_v60, 5.0  ;;  %v1165_v38 = vadd.f32 %v1041_v37, %v7922_v53  ;;  %v8032_v53 = vld [vmem:[#allocation14_spill] sm:$0xff] }
 0x2e5   : > { %v6294_v33 = vpop.xlane.xlu1 %1694  ;;  %v6296_v21 = vpop.xlane.xlu0 %1733  ;;  %v2108_v24 = vsel %vm457_vm0, %v1926_v54, inf  ;;  %vm1866_vm8 = vcmp.ge.f32.partialorder %v5963_v16, %v8032_v53  ;;  %v403_v53 = vld [vmem:[%s6306_s11 + $0x68] sm:$0xff] }
 0x2e6   : > { %8024 = vst [vmem:[#allocation144_spill] sm:$0xff] %v6294_v33  ;;  %8025 = vst [vmem:[#allocation145_spill] sm:$0xff] %v6296_v21  ;;  %v4226_v21 = vpop.eup %4225  ;;  %v1741_v36 = vsub.f32 %v1165_v38, %v6028_v3  ;;  %v393_v33 = vld [vmem:[%s6306_s11 + $0x18] sm:$0xff]  ;;  %v2114_v3 = vsel %vm457_vm0, %v1928_v46, inf  ;;  %v8033_v38 = vld [vmem:[#allocation59_spill] sm:$0xff] }
 0x2e7   : > { %v1049_v37 = vmul.f32 0.6931472, %v4226_v21 }
 0x2e8   : > { %2103 = vmin.xlane.f32.xlu1 %v2102_v17  ;;  %v2379_v17 = vmul.f32 %v1738_v34, %v390_v57  ;;  %v2382_v54 = vmul.f32 %v1741_v36, %v393_v33  ;;  %v1743_v57 = vsub.f32 %v1167_v44, %v6040_v22  ;;  %v8035_v36 = vld [vmem:[#allocation61_spill] sm:$0xff]  ;;  %v397_v44 = vld [vmem:[%s6306_s11 + $0x38] sm:$0xff] }
 0x2e9   : > { %v6312_v51 = vpop.xlane.xlu1 %1700  ;;  %v6314_v14 = vpop.xlane.xlu0 %1932  ;;  %v1169_v25 = vadd.f32 %v1049_v37, %v7924_v48 }
 0x2ea   : > { %8028 = vst [vmem:[#allocation146_spill] sm:$0xff] %v6312_v51  ;;  %v8031_v51 = vld [vmem:[#allocation70_spill] sm:$0xff]  ;;  %v2384_v22 = vmul.f32 %v1743_v57, %v395_v4  ;;  %v8038_v4 = vld [vmem:[#allocation76_spill] sm:$0xff] }
 0x2eb   : > { %4233 = vlog2.f32 %v8031_v51  ;;  %v4228_v34 = vpop.eup %4227  ;;  %v1930_v51 = vsel %vm1866_vm8, %v5883_v60, 5.0  ;;  %v1745_v46 = vsub.f32 %v1169_v25, %v6052_v59  ;;  %v8036_v60 = vld [vmem:[#allocation74_spill] sm:$0xff] }
 0x2ec   : > { %2109 = vmin.xlane.f32.xlu1 %v2108_v24  ;;  %4235 = vlog2.f32 %v8033_v38  ;;  %v8034_v24 = vld [vmem:[#allocation72_spill] sm:$0xff]  ;;  %v1053_v23 = vmul.f32 0.6931472, %v4228_v34  ;;  %v2120_v33 = vsel %vm457_vm0, %v1930_v51, inf  ;;  %v8037_v51 = vld [vmem:[#allocation63_spill] sm:$0xff]  ;;  %v399_v25 = vld [vmem:[%s6306_s11 + $0x48] sm:$0xff] }
 0x2ed   : > { %v6325_v26 = vpop.xlane.xlu1 %1706  ;;  %v6327_v32 = vpop.xlane.xlu0 %1938  ;;  %4237 = vlog2.f32 %v8034_v24  ;;  %v2386_v57 = vmul.f32 %v1745_v46, %v397_v44 }
 0x2ee   : > { %2446 = vperm.xlu0 %3929, %v2379_v17   ;;  %v4230_v17 = vpop.eup %4229  ;;  %4239 = vlog2.f32 %v8035_v36  ;;  %v1171_v37 = vadd.f32 %v1053_v23, %v4982_v1 }
 0x2ef   : > { %4241 = vlog2.f32 %v8036_v60  ;;  %v4232_v34 = vpop.eup %4231  ;;  %v1057_v48 = vmul.f32 0.6931472, %v4230_v17 }
 0x2f0   : > { %2115 = vmin.xlane.f32.xlu1 %v2114_v3  ;;  %4243 = vlog2.f32 %v8037_v51  ;;  %v1747_v59 = vsub.f32 %v1171_v37, %v6064_v61  ;;  %v1037_v24 = vmul.f32 0.6931472, %v4232_v34  ;;  %v8041_v34 = vld [vmem:[#allocation78_spill] sm:$0xff]  ;;  %v401_v51 = vld [vmem:[%s6306_s11 + $0x58] sm:$0xff] }
 0x2f1   : > { %v6338_v16 = vpop.xlane.xlu1 %1712  ;;  %v6340_v21 = vpop.xlane.xlu0 %1944  ;;  %4245 = vlog2.f32 %v8038_v4  ;;  %v1173_v1 = vadd.f32 %v1057_v48, %v4992_v55 }
 0x2f2   : > { %2461 = vperm.xlu0 %3929, %v2382_v54   ;;  %v2388_v46 = vmul.f32 %v1747_v59, %v399_v25  ;;  %v1163_v37 = vadd.f32 %v1037_v24, %v4955_v39  ;;  %v391_v25 = vld [vmem:[%s6306_s11 + $0x8] sm:$0xff] }
 0x2f3   : > { %v1749_v61 = vsub.f32 %v1173_v1, %v6076_v27  ;;  %v8043_v27 = vld [vmem:[#allocation67_spill] sm:$0xff]  ;;  %v8044_v1 = vld [vmem:[#allocation80_spill] sm:$0xff] }
 0x2f4   : > { %2121 = vmin.xlane.f32.xlu1 %v2120_v33  ;;  %v1739_v59 = vsub.f32 %v1163_v37, %v5943_v35 }
 0x2f5   : > { %v6348_v3 = vpop.xlane.xlu1 %1718  ;;  %v6350_v38 = vpop.xlane.xlu0 %1950 }
 0x2f6   : > { %2471 = vperm.xlu0 %3929, %v2384_v22   ;;  %v4234_v54 = vpop.eup %4233  ;;  %v8040_v22 = vld [vmem:[#allocation65_spill] sm:$0xff]  ;;  %v2380_v37 = vmul.f32 %v1739_v59, %v391_v25 }
 0x2f7   : > { %v4236_v60 = vpop.eup %4235  ;;  %v1061_v17 = vmul.f32 0.6931472, %v4234_v54  ;;  %4247 = vlog2.f32 %v8040_v22 }
 0x2f8   : > { %v4238_v23 = vpop.eup %4237  ;;  %v1039_v44 = vmul.f32 0.6931472, %v4236_v60  ;;  %4249 = vlog2.f32 %v8041_v34  ;;  %v2390_v60 = vmul.f32 %v1749_v61, %v401_v51  ;;  %v8046_v51 = vld [vmem:[#allocation69_spill] sm:$0xff] }
 0x2f9   : > { %v6357_v33 = vpop.xlane.xlu1 %1724  ;;  %v6359_v36 = vpop.xlane.xlu0 %1956  ;;  %v1065_v48 = vmul.f32 0.6931472, %v4238_v23  ;;  %4251 = vlog2.f32 %v8043_v27  ;;  %v8047_v27 = vld [vmem:[#allocation82_spill] sm:$0xff] }
 0x2fa   : > { %8039 = vst [vmem:[#allocation147_spill] sm:$0xff] %v6357_v33  ;;  %2481 = vperm.xlu0 %3929, %v2386_v57   ;;  %v4240_v55 = vpop.eup %4239  ;;  %v1175_v57 = vadd.f32 %v1061_v17, %v5002_v2  ;;  %4253 = vlog2.f32 %v8044_v1  ;;  %v1164_v34 = vadd.f32 %v1039_v44, %v4949_v62 }
 0x2fb   : > { %v4242_v22 = vpop.eup %4241  ;;  %v1043_v24 = vmul.f32 0.6931472, %v4240_v55  ;;  %4255 = vlog2.f32 %v8046_v51  ;;  %v392_v55 = vld [vmem:[%s6306_s11 + $0x10] sm:$0xff] }
 0x2fc   : > { %v1751_v39 = vsub.f32 %v1175_v57, %v6088_v43  ;;  %v4244_v17 = vpop.eup %4243  ;;  %v1069_v35 = vmul.f32 0.6931472, %v4242_v22  ;;  %v1740_v43 = vsub.f32 %v1164_v34, %v5955_v50  ;;  %4257 = vlog2.f32 %v8047_v27  ;;  %v405_v22 = vld [vmem:[%s6306_s11 + $0x78] sm:$0xff] }
 0x2fd   : > { %v6367_v4 = vpop.xlane.xlu1 %1730  ;;  %v6369_v54 = vpop.xlane.xlu0 %1962  ;;  %v1047_v44 = vmul.f32 0.6931472, %v4244_v17  ;;  %v1166_v1 = vadd.f32 %v1043_v24, %v4963_v0  ;;  %v8050_v17 = vld [vmem:[#allocation84_spill] sm:$0xff] }
 0x2fe   : > { %8042 = vst [vmem:[#allocation148_spill] sm:$0xff] %v6367_v4  ;;  %2491 = vperm.xlu0 %3929, %v2388_v46   ;;  %v1177_v46 = vadd.f32 %v1065_v48, %v5012_v47  ;;  %v4246_v61 = vpop.eup %4245  ;;  %v2392_v57 = vmul.f32 %v1751_v39, %v403_v53  ;;  %v1179_v59 = vadd.f32 %v1069_v35, %v5022_v31  ;;  %v394_v39 = vld [vmem:[%s6306_s11 + $0x20] sm:$0xff] }
 0x2ff   : > { %v1073_v48 = vmul.f32 0.6931472, %v4246_v61  ;;  %v1742_v25 = vsub.f32 %v1166_v1, %v5966_v8  ;;  %v407_v61 = vld [vmem:[%s6306_s11 + $0x88] sm:$0xff] }
 0x300   : > { %v1753_v62 = vsub.f32 %v1177_v46, %v6100_v52  ;;  %v2381_v52 = vmul.f32 %v1740_v43, %v392_v55  ;;  %v1755_v24 = vsub.f32 %v1179_v59, %v6112_v11  ;;  %v1168_v46 = vadd.f32 %v1047_v44, %v4971_v15  ;;  %v8052_v1 = vld [vmem:[#allocation86_spill] sm:$0xff] }
 0x301   : > { %v6379_v23 = vpop.xlane.xlu1 %1736  ;;  %v6381_v2 = vpop.xlane.xlu0 %1968  ;;  %v1181_v43 = vadd.f32 %v1073_v48, %v7931_v20  ;;  %v2383_v11 = vmul.f32 %v1742_v25, %v394_v39  ;;  %v398_v39 = vld [vmem:[%s6306_s11 + $0x40] sm:$0xff] }
 0x302   : > { %8045 = vst [vmem:[#allocation149_spill] sm:$0xff] %v6379_v23  ;;  %2501 = vperm.xlu0 %3929, %v2390_v60   ;;  %v4248_v50 = vpop.eup %4247  ;;  %v8049_v60 = vld [vmem:[#allocation71_spill] sm:$0xff]  ;;  %v2394_v0 = vmul.f32 %v1753_v62, %v405_v22  ;;  %v1744_v55 = vsub.f32 %v1168_v46, %v5976_v58  ;;  %v2396_v15 = vmul.f32 %v1755_v24, %v407_v61  ;;  %v411_v46 = vld [vmem:[%s6306_s11 + $0xa8] sm:$0xff] }
 0x303   : > { %v4250_v53 = vpop.eup %4249  ;;  %4259 = vlog2.f32 %v8049_v60  ;;  %v1051_v34 = vmul.f32 0.6931472, %v4248_v50  ;;  %v396_v62 = vld [vmem:[%s6306_s11 + $0x30] sm:$0xff]  ;;  %v1757_v44 = vsub.f32 %v1181_v43, %v6124_v42  ;;  %v409_v50 = vld [vmem:[%s6306_s11 + $0x98] sm:$0xff] }
 0x304   : > { %4261 = vlog2.f32 %v8050_v17  ;;  %v4252_v8 = vpop.eup %4251  ;;  %v1077_v35 = vmul.f32 0.6931472, %v4250_v53  ;;  %v2385_v42 = vmul.f32 %v1744_v55, %v396_v62  ;;  %v8053_v60 = vld [vmem:[#allocation75_spill] sm:$0xff] }
 0x305   : > { %v6391_v23 = vpop.xlane.xlu1 %1935  ;;  %2451 = vperm.xlu1 %3930, %v2380_v37   ;;  %v6393_v47 = vpop.xlane.xlu0 %1974  ;;  %v1055_v27 = vmul.f32 0.6931472, %v4252_v8  ;;  %v1170_v22 = vadd.f32 %v1051_v34, %v4979_v9  ;;  %v2398_v9 = vmul.f32 %v1757_v44, %v409_v50  ;;  %v8054_v34 = vld [vmem:[#allocation88_spill] sm:$0xff]  ;;  %v400_v55 = vld [vmem:[%s6306_s11 + $0x50] sm:$0xff] }
 0x306   : > { %8048 = vst [vmem:[#allocation15_spill] sm:$0xff] %v6393_v47  ;;  %2511 = vperm.xlu0 %3929, %v2392_v57   ;;  %v4254_v51 = vpop.eup %4253  ;;  %v8051_v57 = vld [vmem:[#allocation73_spill] sm:$0xff]  ;;  %v1183_v53 = vadd.f32 %v1077_v35, %v7935_v41 }
 0x307   : > { %4263 = vlog2.f32 %v8051_v57  ;;  %v4256_v58 = vpop.eup %4255  ;;  %v1081_v48 = vmul.f32 0.6931472, %v4254_v51  ;;  %v1746_v25 = vsub.f32 %v1170_v22, %v5986_v10  ;;  %v1172_v17 = vadd.f32 %v1055_v27, %v4989_v5  ;;  %v413_v27 = vld [vmem:[%s6306_s11 + $0xb8] sm:$0xff] }
 0x308   : > { %4265 = vlog2.f32 %v8052_v1  ;;  %v1059_v24 = vmul.f32 0.6931472, %v4256_v58 }
 0x309   : > { %v6403_v37 = vpop.xlane.xlu1 %1941  ;;  %2456 = vperm.xlu1 %3930, %v2381_v52   ;;  %v6405_v31 = vpop.xlane.xlu0 %1980  ;;  %4267 = vlog2.f32 %v8053_v60  ;;  %v1185_v35 = vadd.f32 %v1081_v48, %v7940_v49  ;;  %v1748_v51 = vsub.f32 %v1172_v17, %v5996_v7  ;;  %v8058_v60 = vld [vmem:[#allocation92_spill] sm:$0xff] }
 0x30a   : > { %2521 = vperm.xlu0 %3929, %v2394_v0   ;;  %v4258_v52 = vpop.eup %4257  ;;  %v1759_v0 = vsub.f32 %v1183_v53, %v6136_v18  ;;  %4269 = vlog2.f32 %v8054_v34  ;;  %v2387_v18 = vmul.f32 %v1746_v25, %v398_v39  ;;  %v1174_v44 = vadd.f32 %v1059_v24, %v4999_v12  ;;  %v8057_v53 = vld [vmem:[#allocation79_spill] sm:$0xff]  ;;  %v8059_v39 = vld [vmem:[#allocation21_spill] sm:$0xff]  ;;  %v8060_v17 = vld [vmem:[#allocation32_spill] sm:$0xff] }
 0x30b   : > { %v1085_v8 = vmul.f32 0.6931472, %v4258_v52  ;;  %v1761_v57 = vsub.f32 %v1185_v35, %v6148_v56  ;;  %v2389_v56 = vmul.f32 %v1748_v51, %v400_v55  ;;  %v402_v52 = vld [vmem:[%s6306_s11 + $0x60] sm:$0xff] }
 0x30c   : > { %v2400_v5 = vmul.f32 %v1759_v0, %v411_v46  ;;  %v1750_v48 = vsub.f32 %v1174_v44, %v6006_v40  ;;  %v415_v0 = vld [vmem:[%s6306_s11 + $0xc8] sm:$0xff] }
 0x30d   : > { %v6415_v59 = vpop.xlane.xlu1 %1947  ;;  %2466 = vperm.xlu1 %3930, %v2383_v11   ;;  %v6417_v20 = vpop.xlane.xlu0 %1986  ;;  %v8055_v11 = vld [vmem:[#allocation77_spill] sm:$0xff]  ;;  %v1187_v50 = vadd.f32 %v1085_v8, %v7945_v29  ;;  %v2402_v12 = vmul.f32 %v1761_v57, %v413_v27  ;;  %v8064_v57 = vld [vmem:[#allocation22_spill] sm:$0xff] }
 0x30e   : > { %2531 = vperm.xlu0 %3929, %v2396_v15   ;;  %v4260_v10 = vpop.eup %4259  ;;  %4271 = vlog2.f32 %v8055_v11  ;;  %v8056_v15 = vld [vmem:[#allocation90_spill] sm:$0xff]  ;;  %v8061_v8 = vld [vmem:[#allocation17_spill] sm:$0xff] }
 0x30f   : > { %v4262_v43 = vpop.eup %4261  ;;  %v1063_v62 = vmul.f32 0.6931472, %v4260_v10  ;;  %4273 = vlog2.f32 %v8056_v15  ;;  %v417_v15 = vld [vmem:[%s6306_s11 + $0xd8] sm:$0xff] }
 0x310   : > { %v1089_v22 = vmul.f32 0.6931472, %v4262_v43  ;;  %4275 = vlog2.f32 %v8057_v53  ;;  %v8062_v43 = vld [vmem:[#allocation81_spill] sm:$0xff] }
 0x311   : > { %v6427_v61 = vpop.xlane.xlu1 %1953  ;;  %2476 = vperm.xlu1 %3930, %v2385_v42   ;;  %v6429_v41 = vpop.xlane.xlu0 %1992  ;;  %v1763_v42 = vsub.f32 %v1187_v50, %v6160_v13  ;;  %4277 = vlog2.f32 %v8058_v60  ;;  %v2391_v13 = vmul.f32 %v1750_v48, %v402_v52  ;;  %v8065_v50 = vld [vmem:[#allocation34_spill] sm:$0xff]  ;;  %v8067_v52 = vld [vmem:[#allocation83_spill] sm:$0xff] }
 0x312   : > { %2541 = vperm.xlu0 %3929, %v2398_v9   ;;  %v4264_v7 = vpop.eup %4263  ;;  %v1176_v9 = vadd.f32 %v1063_v62, %v8059_v39  ;;  %v1189_v46 = vadd.f32 %v1089_v22, %v8060_v17  ;;  %4279 = vlog2.f32 %v8062_v43  ;;  %v8066_v48 = vld [vmem:[#allocation18_spill] sm:$0xff] }
 0x313   : > { %v4266_v58 = vpop.eup %4265  ;;  %v1067_v25 = vmul.f32 0.6931472, %v4264_v7  ;;  %v2404_v51 = vmul.f32 %v1763_v42, %v415_v0  ;;  %v8070_v0 = vld [vmem:[#allocation23_spill] sm:$0xff]  ;;  %v419_v17 = vld [vmem:[%s6306_s11 + $0xe8] sm:$0xff] }
 0x314   : > { %v4268_v40 = vpop.eup %4267  ;;  %v1093_v34 = vmul.f32 0.6931472, %v4266_v58  ;;  %v1752_v35 = vsub.f32 %v1176_v9, %v8061_v8  ;;  %v1765_v11 = vsub.f32 %v1189_v46, %v6172_v6  ;;  %v8069_v9 = vld [vmem:[#allocation96_spill] sm:$0xff] }
 0x315   : > { %v6439_v1 = vpop.xlane.xlu1 %1959  ;;  %2486 = vperm.xlu1 %3930, %v2387_v18   ;;  %v6441_v49 = vpop.xlane.xlu0 %1998  ;;  %v404_v18 = vld [vmem:[%s6306_s11 + $0x70] sm:$0xff]  ;;  %v1071_v55 = vmul.f32 0.6931472, %v4268_v40  ;;  %v1178_v62 = vadd.f32 %v1067_v25, %v8064_v57  ;;  %v8068_v25 = vld [vmem:[#allocation128_spill] sm:$0xff] }
 0x316   : > { %2551 = vperm.xlu0 %3929, %v2400_v5   ;;  %v4270_v10 = vpop.eup %4269  ;;  %v8063_v5 = vld [vmem:[#allocation94_spill] sm:$0xff]  ;;  %v1191_v58 = vadd.f32 %v1093_v34, %v8065_v50  ;;  %v2393_v6 = vmul.f32 %v1752_v35, %v404_v18  ;;  %v2406_v42 = vmul.f32 %v1765_v11, %v417_v15  ;;  %v8072_v8 = vld [vmem:[#allocation36_spill] sm:$0xff]  ;;  %v408_v57 = vld [vmem:[%s6306_s11 + $0x90] sm:$0xff] }
 0x317   : > { %4281 = vlog2.f32 %v8063_v5  ;;  %v1097_v22 = vmul.f32 0.6931472, %v4270_v10  ;;  %v1754_v53 = vsub.f32 %v1178_v62, %v8066_v48  ;;  %v1180_v40 = vadd.f32 %v1071_v55, %v8070_v0  ;;  %v8074_v5 = vld [vmem:[#allocation85_spill] sm:$0xff]  ;;  %v8075_v62 = vld [vmem:[#allocation130_spill] sm:$0xff] }
 0x318   : > { %v4272_v7 = vpop.eup %4271  ;;  %4283 = vlog2.f32 %v8067_v52  ;;  %v1767_v60 = vsub.f32 %v1191_v58, %v8068_v25  ;;  %v8076_v50 = vld [vmem:[#allocation98_spill] sm:$0xff]  ;;  %v8077_v58 = vld [vmem:[#allocation25_spill] sm:$0xff] }
 0x319   : > { %v6451_v24 = vpop.xlane.xlu1 %1965  ;;  %2496 = vperm.xlu1 %3930, %v2389_v56   ;;  %v6453_v29 = vpop.xlane.xlu0 %2004  ;;  %v1075_v39 = vmul.f32 0.6931472, %v4272_v7  ;;  %4285 = vlog2.f32 %v8069_v9  ;;  %v1193_v35 = vadd.f32 %v1097_v22, %v8072_v8  ;;  %v8080_v9 = vld [vmem:[#allocation20_spill] sm:$0xff] }
 0x31a   : > { %2561 = vperm.xlu0 %3929, %v2402_v12   ;;  %v4274_v56 = vpop.eup %4273  ;;  %v406_v12 = vld [vmem:[%s6306_s11 + $0x80] sm:$0xff]  ;;  %4287 = vlog2.f32 %v8074_v5  ;;  %v2408_v55 = vmul.f32 %v1767_v60, %v419_v17 }
 0x31b   : > { %v4276_v10 = vpop.eup %4275  ;;  %v2395_v18 = vmul.f32 %v1754_v53, %v406_v12  ;;  %v1769_v15 = vsub.f32 %v1193_v35, %v8075_v62  ;;  %4289 = vlog2.f32 %v8076_v50  ;;  %v8079_v12 = vld [vmem:[#allocation38_spill] sm:$0xff]  ;;  %v410_v17 = vld [vmem:[%s6306_s11 + $0xa0] sm:$0xff] }
 0x31c   : > { %v4278_v43 = vpop.eup %4277  ;;  %v1079_v7 = vmul.f32 0.6931472, %v4276_v10  ;;  %v8082_v10 = vld [vmem:[#allocation132_spill] sm:$0xff] }
 0x31d   : > { %v6463_v44 = vpop.xlane.xlu1 %1971  ;;  %2506 = vperm.xlu1 %3930, %v2391_v13   ;;  %v6465_v27 = vpop.xlane.xlu0 %2010  ;;  %v1101_v13 = vmul.f32 0.6931472, %v4274_v56  ;;  %v421_v56 = vld [vmem:[%s6306_s11 + $0xf8] sm:$0xff]  ;;  %v1105_v52 = vmul.f32 0.6931472, %v4278_v43  ;;  %v423_v43 = vld [vmem:[%s6306_s11 + $0x108] sm:$0xff] }
 0x31e   : > { %2571 = vperm.xlu0 %3929, %v2404_v51   ;;  %v8073_v51 = vld [vmem:[#allocation19_spill] sm:$0xff]  ;;  %v4280_v53 = vpop.eup %4279 }
 0x31f   : > { %v1756_v11 = vsub.f32 %v1180_v40, %v8073_v51  ;;  %v8081_v40 = vld [vmem:[#allocation87_spill] sm:$0xff]  ;;  %v1083_v35 = vmul.f32 0.6931472, %v4280_v53  ;;  %v8087_v53 = vld [vmem:[#allocation89_spill] sm:$0xff] }
 0x320   : > { %4291 = vlog2.f32 %v8081_v40  ;;  %v8084_v51 = vld [vmem:[#allocation27_spill] sm:$0xff]  ;;  %v8089_v40 = vld [vmem:[#allocation102_spill] sm:$0xff] }
 0x321   : > { %v6475_v46 = vpop.xlane.xlu1 %1977  ;;  %2516 = vperm.xlu1 %3930, %v2393_v6   ;;  %v6477_v34 = vpop.xlane.xlu0 %2016  ;;  %v1182_v6 = vadd.f32 %v1075_v39, %v8077_v58  ;;  %v2397_v60 = vmul.f32 %v1756_v11, %v408_v57  ;;  %v2410_v39 = vmul.f32 %v1769_v15, %v421_v56  ;;  %v1184_v5 = vadd.f32 %v1079_v7, %v8084_v51 }
 0x322   : > { %8071 = vst [vmem:[#allocation60_spill] sm:$0xff] %v6475_v46  ;;  %2581 = vperm.xlu0 %3929, %v2406_v42   ;;  %v1195_v42 = vadd.f32 %v1101_v13, %v8079_v12  ;;  %v4282_v25 = vpop.eup %4281  ;;  %v412_v12 = vld [vmem:[%s6306_s11 + $0xb0] sm:$0xff] }
 0x323   : > { %v1758_v0 = vsub.f32 %v1182_v6, %v8080_v9  ;;  %v4284_v11 = vpop.eup %4283  ;;  %v1109_v57 = vmul.f32 0.6931472, %v4282_v25  ;;  %v8086_v6 = vld [vmem:[#allocation122_spill] sm:$0xff]  ;;  %v425_v25 = vld [vmem:[%s6306_s11 + $0x118] sm:$0xff] }
 0x324   : > { %v1771_v8 = vsub.f32 %v1195_v42, %v8082_v10  ;;  %v4286_v15 = vpop.eup %4285  ;;  %v1760_v56 = vsub.f32 %v1184_v5, %v8086_v6  ;;  %v8088_v42 = vld [vmem:[#allocation134_spill] sm:$0xff]  ;;  %v8090_v10 = vld [vmem:[#allocation29_spill] sm:$0xff] }
 0x325   : > { %v6487_v48 = vpop.xlane.xlu1 %1983  ;;  %2526 = vperm.xlu1 %3930, %v2395_v18   ;;  %v6489_v22 = vpop.xlane.xlu0 %2022  ;;  %v8083_v18 = vld [vmem:[#allocation100_spill] sm:$0xff]  ;;  %v2399_v58 = vmul.f32 %v1758_v0, %v410_v17  ;;  %v1113_v17 = vmul.f32 0.6931472, %v4286_v15  ;;  %v414_v6 = vld [vmem:[%s6306_s11 + $0xc0] sm:$0xff]  ;;  %v427_v15 = vld [vmem:[%s6306_s11 + $0x128] sm:$0xff] }
 0x326   : > { %8078 = vst [vmem:[#allocation62_spill] sm:$0xff] %v6489_v22  ;;  %2591 = vperm.xlu0 %3929, %v2408_v55   ;;  %4293 = vlog2.f32 %v8083_v18  ;;  %v8085_v55 = vld [vmem:[#allocation40_spill] sm:$0xff]  ;;  %v2412_v7 = vmul.f32 %v1771_v8, %v423_v43  ;;  %v1186_v18 = vadd.f32 %v1083_v35, %v8090_v10  ;;  %v4288_v0 = vpop.eup %4287  ;;  %v2401_v43 = vmul.f32 %v1760_v56, %v412_v12  ;;  %v8096_v10 = vld [vmem:[#allocation31_spill] sm:$0xff] }
 0x327   : > { %v1197_v50 = vadd.f32 %v1105_v52, %v8085_v55  ;;  %4295 = vlog2.f32 %v8087_v53  ;;  %v4290_v8 = vpop.eup %4289  ;;  %v8092_v55 = vld [vmem:[#allocation24_spill] sm:$0xff] }
 0x328   : > { %4297 = vlog2.f32 %v8089_v40  ;;  %v8094_v53 = vld [vmem:[#allocation136_spill] sm:$0xff]  ;;  %v8095_v40 = vld [vmem:[#allocation105_spill] sm:$0xff]  ;;  %v1117_v12 = vmul.f32 0.6931472, %v4290_v8 }
 0x329   : > { %v6499_v62 = vpop.xlane.xlu1 %1989  ;;  %2536 = vperm.xlu1 %3930, %v2397_v60   ;;  %v6501_v13 = vpop.xlane.xlu0 %2028  ;;  %v1773_v9 = vsub.f32 %v1197_v50, %v8088_v42  ;;  %v1087_v60 = vmul.f32 0.6931472, %v4284_v11  ;;  %v1762_v11 = vsub.f32 %v1186_v18, %v8092_v55  ;;  %v8093_v50 = vld [vmem:[#allocation91_spill] sm:$0xff] }
 0x32a   : > { %2601 = vperm.xlu0 %3929, %v2410_v39   ;;  %v8091_v39 = vld [vmem:[#allocation42_spill] sm:$0xff]  ;;  %4299 = vlog2.f32 %v8093_v50  ;;  %v4292_v56 = vpop.eup %4291  ;;  %v416_v55 = vld [vmem:[%s6306_s11 + $0xd0] sm:$0xff] }
 0x32b   : > { %v1199_v5 = vadd.f32 %v1109_v57, %v8091_v39  ;;  %v2414_v35 = vmul.f32 %v1773_v9, %v425_v25  ;;  %4301 = vlog2.f32 %v8095_v40  ;;  %v1188_v47 = vadd.f32 %v1087_v60, %v8096_v10  ;;  %v8098_v39 = vld [vmem:[#allocation123_spill] sm:$0xff]  ;;  %v429_v10 = vld [vmem:[%s6306_s11 + $0x138] sm:$0xff] }
 0x32c   : > { %v2403_v25 = vmul.f32 %v1762_v11, %v414_v6 }
 0x32d   : > { %v6511_v51 = vpop.xlane.xlu1 %1995  ;;  %2546 = vperm.xlu1 %3930, %v2399_v58   ;;  %v6513_v52 = vpop.xlane.xlu0 %2034  ;;  %v1775_v42 = vsub.f32 %v1199_v5, %v8094_v53  ;;  %v1091_v58 = vmul.f32 0.6931472, %v4288_v0  ;;  %v1764_v0 = vsub.f32 %v1188_v47, %v8098_v39  ;;  %v8099_v5 = vld [vmem:[#allocation93_spill] sm:$0xff]  ;;  %v1095_v53 = vmul.f32 0.6931472, %v4292_v56  ;;  %v8101_v47 = vld [vmem:[#allocation46_spill] sm:$0xff] }
 0x32e   : > { %2611 = vperm.xlu0 %3929, %v2412_v7   ;;  %v8097_v7 = vld [vmem:[#allocation44_spill] sm:$0xff]  ;;  %4303 = vlog2.f32 %v8099_v5  ;;  %v1203_v6 = vadd.f32 %v1117_v12, %v8101_v47  ;;  %v418_v56 = vld [vmem:[%s6306_s11 + $0xe0] sm:$0xff] }
 0x32f   : > { %v1201_v18 = vadd.f32 %v1113_v17, %v8097_v7  ;;  %v2416_v60 = vmul.f32 %v1775_v42, %v427_v15  ;;  %v2405_v42 = vmul.f32 %v1764_v0, %v416_v55  ;;  %v8102_v15 = vld [vmem:[#allocation26_spill] sm:$0xff]  ;;  %v8105_v55 = vld [vmem:[#allocation48_spill] sm:$0xff] }
 0x330   : > { %v4294_v9 = vpop.eup %4293 }
 0x331   : > { %v6523_v46 = vpop.xlane.xlu1 %2001  ;;  %2556 = vperm.xlu1 %3930, %v2401_v43   ;;  %v6525_v57 = vpop.xlane.xlu0 %2040  ;;  %v1777_v50 = vsub.f32 %v1201_v18, %v6244_v30  ;;  %v8100_v43 = vld [vmem:[#allocation33_spill] sm:$0xff]  ;;  %v1121_v11 = vmul.f32 0.6931472, %v4294_v9  ;;  %v8103_v30 = vld [vmem:[#allocation95_spill] sm:$0xff]  ;;  %v1779_v18 = vsub.f32 %v1203_v6, %v6257_v28 }
 0x332   : > { %2621 = vperm.xlu0 %3929, %v2414_v35   ;;  %v1190_v40 = vadd.f32 %v1091_v58, %v8100_v43  ;;  %v4296_v8 = vpop.eup %4295  ;;  %4305 = vlog2.f32 %v8103_v30  ;;  %v431_v43 = vld [vmem:[%s6306_s11 + $0x148] sm:$0xff]  ;;  %v8107_v28 = vld [vmem:[#allocation97_spill] sm:$0xff] }
 0x333   : > { %v4298_v35 = vpop.eup %4297  ;;  %v2418_v58 = vmul.f32 %v1777_v50, %v429_v10  ;;  %v1099_v39 = vmul.f32 0.6931472, %v4296_v8  ;;  %v8106_v10 = vld [vmem:[#allocation124_spill] sm:$0xff]  ;;  %4307 = vlog2.f32 %v8107_v28  ;;  %v420_v8 = vld [vmem:[%s6306_s11 + $0xf0] sm:$0xff]  ;;  %v8109_v30 = vld [vmem:[#allocation37_spill] sm:$0xff] }
 0x334   : > { %v1766_v7 = vsub.f32 %v1190_v40, %v8102_v15  ;;  %v4300_v9 = vpop.eup %4299  ;;  %v1125_v0 = vmul.f32 0.6931472, %v4298_v35  ;;  %v8108_v15 = vld [vmem:[#allocation107_spill] sm:$0xff]  ;;  %v433_v35 = vld [vmem:[%s6306_s11 + $0x158] sm:$0xff] }
 0x335   : > { %v6534_v4 = vpop.xlane.xlu1 %2007  ;;  %2566 = vperm.xlu1 %3930, %v2403_v25   ;;  %v6536_v17 = vpop.xlane.xlu0 %2046  ;;  %v8104_v25 = vld [vmem:[#allocation35_spill] sm:$0xff]  ;;  %4309 = vlog2.f32 %v8108_v15 }
 0x336   : > { %2631 = vperm.xlu0 %3929, %v2416_v60   ;;  %v1192_v5 = vadd.f32 %v1095_v53, %v8104_v25  ;;  %v1205_v60 = vadd.f32 %v1121_v11, %v8105_v55  ;;  %v4302_v40 = vpop.eup %4301  ;;  %v2407_v50 = vmul.f32 %v1766_v7, %v418_v56  ;;  %v2420_v53 = vmul.f32 %v1779_v18, %v431_v43 }
 0x337   : > { %v1194_v25 = vadd.f32 %v1099_v39, %v8109_v30  ;;  %v435_v30 = vld [vmem:[%s6306_s11 + $0x168] sm:$0xff] }
 0x338   : > { %v1768_v47 = vsub.f32 %v1192_v5, %v8106_v10  ;;  %v1781_v6 = vsub.f32 %v1205_v60, %v6267_v19  ;;  %v4304_v56 = vpop.eup %4303  ;;  %v8111_v5 = vld [vmem:[#allocation50_spill] sm:$0xff]  ;;  %v8112_v19 = vld [vmem:[#allocation125_spill] sm:$0xff] }
 0x339   : > { %v6545_v63 = vpop.xlane.xlu1 %2013  ;;  %2576 = vperm.xlu1 %3930, %v2405_v42   ;;  %v6547_v12 = vpop.xlane.xlu0 %2052  ;;  %v1103_v42 = vmul.f32 0.6931472, %v4300_v9  ;;  %v1207_v55 = vadd.f32 %v1125_v0, %v8111_v5  ;;  %v1770_v43 = vsub.f32 %v1194_v25, %v8112_v19  ;;  %v8113_v9 = vld [vmem:[#allocation99_spill] sm:$0xff]  ;;  %v422_v60 = vld [vmem:[%s6306_s11 + $0x100] sm:$0xff]  ;;  %v1107_v28 = vmul.f32 0.6931472, %v4304_v56 }
 0x33a   : > { %2641 = vperm.xlu0 %3929, %v2418_v58   ;;  %v1131_v58 = vmul.f32 0.6931472, %v4302_v40  ;;  %v2409_v18 = vmul.f32 %v1768_v47, %v420_v8  ;;  %4311 = vlog2.f32 %v8113_v9  ;;  %v2422_v39 = vmul.f32 %v1781_v6, %v433_v35  ;;  %v8117_v8 = vld [vmem:[#allocation53_spill] sm:$0xff]  ;;  %v4411_v25 = vld [vmem:[%s5271_s8 + $0x88] sm:$0xff] }
 0x33b   : > { %v1783_v10 = vsub.f32 %v1207_v55, %v6276_v45  ;;  %v2140_v5 = vcvt.s32.f32 %v4411_v25  ;;  %v2411_v6 = vmul.f32 %v1770_v43, %v422_v60  ;;  %v8118_v45 = vld [vmem:[#allocation28_spill] sm:$0xff]  ;;  %v8119_v56 = vld [vmem:[#allocation101_spill] sm:$0xff]  ;;  %v8120_v55 = vld [vmem:[#allocation135_spill] sm:$0xff] }
 0x33c   : > { %v4306_v47 = vpop.eup %4305  ;;  %4313 = vlog2.f32 %v8119_v56 }
 0x33d   : > { %v6557_v11 = vpop.xlane.xlu1 %2019  ;;  %2586 = vperm.xlu1 %3930, %v2407_v50   ;;  %v6559_v7 = vpop.xlane.xlu0 %2058  ;;  %v8114_v50 = vld [vmem:[#allocation39_spill] sm:$0xff]  ;;  %v2424_v9 = vmul.f32 %v1783_v10, %v435_v30  ;;  %vm2204_vm0 = vcmp.eq.f32.partialorder %v6487_v48, %v2140_v5  ;;  %v7740_v48 = vmov 0.0  }
 0x33e   : > { %8110 = vst [vmem:[#allocation64_spill] sm:$0xff] %v6559_v7  ;;  %2651 = vperm.xlu0 %3929, %v2420_v53   ;;  %v1196_v15 = vadd.f32 %v1103_v42, %v8114_v50  ;;  %v1210_v53 = vadd.f32 %v1131_v58, %v8117_v8  ;;  %v424_v42 = vld [vmem:[%s6306_s11 + $0x110] sm:$0xff]  ;;  %v8121_v7 = vld [vmem:[#allocation41_spill] sm:$0xff]  ;;  %v4308_v60 = vpop.eup %4307  ;;  %v3676_v5 = vsel %vm2204_vm0, 1.0, %v7740_v48 }
 0x33f   : > { %v1198_v22 = vadd.f32 %v1107_v28, %v8121_v7  ;;  %v438_v58 = vld [vmem:[%s6306_s11 + $0x180] sm:$0xff]  ;;  %v4310_v10 = vpop.eup %4309  ;;  %v8123_v30 = vld [vmem:[#allocation103_spill] sm:$0xff] }
 0x340   : > { %v1772_v35 = vsub.f32 %v1196_v15, %v8118_v45  ;;  %v1786_v19 = vsub.f32 %v1210_v53, %v8120_v55  ;;  %4315 = vlog2.f32 %v8123_v30  ;;  %v426_v7 = vld [vmem:[%s6306_s11 + $0x120] sm:$0xff] }
 0x341   : > { %v6568_v40 = vpop.xlane.xlu1 %2025  ;;  %2596 = vperm.xlu1 %3930, %v2409_v18   ;;  %v6570_v0 = vpop.xlane.xlu0 %2064  ;;  %v4412_v18 = vld [vmem:[%s5271_s8 + $0x80] sm:$0xff] }
 0x342   : > { %8115 = vst [vmem:[#allocation66_spill] sm:$0xff] %v6568_v40  ;;  %8116 = vst [vmem:[#allocation68_spill] sm:$0xff] %v6570_v0  ;;  %2661 = vperm.xlu0 %3929, %v2422_v39   ;;  %v2139_v50 = vcvt.s32.f32 %v4412_v18  ;;  %v1111_v0 = vmul.f32 0.6931472, %v4306_v47  ;;  %v4413_v39 = vld [vmem:[%s5271_s8 + $0x8] sm:$0xff]  ;;  %v2413_v53 = vmul.f32 %v1772_v35, %v424_v42  ;;  %v2427_v28 = vmul.f32 %v1786_v19, %v438_v58  ;;  %v4414_v45 = vld [vmem:[%s5271_s8] sm:$0xff] }
 0x343   : > { %v2124_v15 = vcvt.s32.f32 %v4413_v39  ;;  %v8124_v47 = vld [vmem:[#allocation126_spill] sm:$0xff]  ;;  %v2123_v56 = vcvt.s32.f32 %v4414_v45  ;;  %v8125_v55 = vld [vmem:[#allocation109_spill] sm:$0xff]  ;;  %v8126_v18 = vld [vmem:[#allocation43_spill] sm:$0xff]  ;;  %v1135_v42 = vmul.f32 0.6931472, %v4310_v10 }
 0x344   : > { %v1774_v25 = vsub.f32 %v1198_v22, %v8124_v47  ;;  %vm2203_vm9 = vcmp.eq.f32.partialorder %v6405_v31, %v2139_v50  ;;  %4317 = vlog2.f32 %v8125_v55  ;;  %v1200_v39 = vadd.f32 %v1111_v0, %v8126_v18  ;;  %v4312_v22 = vpop.eup %4311  ;;  %v8127_v19 = vld [vmem:[#allocation127_spill] sm:$0xff]  ;;  %v8128_v0 = vld [vmem:[#allocation106_spill] sm:$0xff]  ;;  %v8129_v47 = vld [vmem:[#allocation45_spill] sm:$0xff] }
 0x345   : > { %v6581_v8 = vpop.xlane.xlu1 %2031  ;;  %2606 = vperm.xlu1 %3930, %v2411_v6   ;;  %v6583_v43 = vpop.xlane.xlu0 %2070  ;;  %v1115_v6 = vmul.f32 0.6931472, %v4308_v60  ;;  %vm2188_vm10 = vcmp.eq.f32.partialorder %v6391_v23, %v2124_v15  ;;  %v3675_v58 = vsel %vm2203_vm9, 1.0, %v7740_v48  ;;  %4319 = vlog2.f32 %v8128_v0  ;;  %v428_v60 = vld [vmem:[%s6306_s11 + $0x130] sm:$0xff]  ;;  %v4415_v55 = vld [vmem:[%s5271_s8 + $0x98] sm:$0xff] }
 0x346   : > { %8122 = vst [vmem:[#allocation16_spill] sm:$0xff] %v6583_v43  ;;  %2671 = vperm.xlu0 %3929, %v2424_v9   ;;  %v2415_v31 = vmul.f32 %v1774_v25, %v426_v7  ;;  %v1776_v50 = vsub.f32 %v1200_v39, %v8127_v19  ;;  %vm2187_vm11 = vcmp.eq.f32.partialorder %v6314_v14, %v2123_v56  ;;  %v3660_v23 = vsel %vm2188_vm10, 1.0, %v7740_v48  ;;  %v4314_v25 = vpop.eup %4313  ;;  %v8130_v7 = vld [vmem:[#allocation55_spill] sm:$0xff]  ;;  %v8131_v56 = vld [vmem:[#allocation30_spill] sm:$0xff] }
 0x347   : > { %v3931_v30 = vpack.i.bf16 %v3676_v5, %v3675_v58  ;;  %v1202_v45 = vadd.f32 %v1115_v6, %v8129_v47  ;;  %v2142_v18 = vcvt.s32.f32 %v4415_v55  ;;  %v3659_v6 = vsel %vm2187_vm11, 1.0, %v7740_v48  ;;  %v430_v5 = vld [vmem:[%s6306_s11 + $0x140] sm:$0xff]  ;;  %v440_v55 = vld [vmem:[%s6306_s11 + $0x190] sm:$0xff] }
 0x348   : > { %v2417_v14 = vmul.f32 %v1776_v50, %v428_v60  ;;  %v3941_v58 = vpack.i.bf16 %v3660_v23, %v3659_v6  ;;  %v1123_v43 = vmul.f32 0.6931472, %v4314_v25  ;;  %v4417_v60 = vld [vmem:[%s5271_s8 + $0x18] sm:$0xff]  ;;  %v4418_v25 = vld [vmem:[%s5271_s8 + $0x10] sm:$0xff] }
 0x349   : > { %v6595_v9 = vpop.xlane.xlu1 %2037  ;;  %2616 = vperm.xlu1 %3930, %v2413_v53   ;;  %v6597_v35 = vpop.xlane.xlu0 %2076  ;;  %v1119_v53 = vmul.f32 0.6931472, %v4312_v22  ;;  %v1778_v39 = vsub.f32 %v1202_v45, %v8131_v56  ;;  %v8132_v22 = vld [vmem:[#allocation137_spill] sm:$0xff]  ;;  %v2126_v45 = vcvt.s32.f32 %v4417_v60  ;;  %vm2206_vm12 = vcmp.eq.f32.partialorder %v6499_v62, %v2142_v18 }
 0x34a   : > { %2686 = vperm.xlu0 %3929, %v2427_v28   ;;  %v1212_v28 = vadd.f32 %v1135_v42, %v8130_v7  ;;  %v4316_v47 = vpop.eup %4315  ;;  %v8133_v42 = vld [vmem:[#allocation47_spill] sm:$0xff]  ;;  %v8134_v56 = vld [vmem:[#allocation129_spill] sm:$0xff]  ;;  %v2125_v48 = vcvt.s32.f32 %v4418_v25  ;;  %v8137_v60 = vmov 0.0  }
 0x34b   : > { %v1204_v7 = vadd.f32 %v1119_v53, %v8133_v42  ;;  %v1127_v53 = vmul.f32 0.6931472, %v4316_v47  ;;  %v8136_v42 = vld [vmem:[#allocation49_spill] sm:$0xff]  ;;  %v3678_v40 = vsel %vm2206_vm12, 1.0, %v8137_v60  ;;  %vm2190_vm14 = vcmp.eq.f32.partialorder %v6403_v37, %v2126_v45  ;;  %v8139_v47 = vld [vmem:[#allocation108_spill] sm:$0xff] }
 0x34c   : > { %v1788_v19 = vsub.f32 %v1212_v28, %v8132_v22  ;;  %v2419_v28 = vmul.f32 %v1778_v39, %v430_v5  ;;  %v432_v22 = vld [vmem:[%s6306_s11 + $0x150] sm:$0xff]  ;;  %v1206_v33 = vadd.f32 %v1123_v43, %v8136_v42  ;;  %v434_v43 = vld [vmem:[%s6306_s11 + $0x160] sm:$0xff]  ;;  %vm2189_vm15 = vcmp.eq.f32.partialorder %v6327_v32, %v2125_v48 }
 0x34d   : > { %v6607_v15 = vpop.xlane.xlu1 %2043  ;;  %2626 = vperm.xlu1 %3930, %v2415_v31   ;;  %v6609_v10 = vpop.xlane.xlu0 %2082  ;;  %v4416_v31 = vld [vmem:[%s5271_s8 + $0x90] sm:$0xff]  ;;  %v1780_v6 = vsub.f32 %v1204_v7, %v8134_v56  ;;  %v3662_v37 = vsel %vm2190_vm14, 1.0, %v8137_v60  ;;  %v8141_v56 = vld [vmem:[#allocation57_spill] sm:$0xff]  ;;  %v3661_v25 = vsel %vm2189_vm15, 1.0, %v8137_v60 }
 0x34e   : > { %3932 = vperm.xlu0 %3929, %v3931_v30   ;;  %v2141_v0 = vcvt.s32.f32 %v4416_v31  ;;  %v4318_v23 = vpop.eup %4317  ;;  %v2429_v31 = vmul.f32 %v1788_v19, %v440_v55  ;;  %v8138_v19 = vld [vmem:[#allocation131_spill] sm:$0xff] }
 0x34f   : > { %v4320_v39 = vpop.eup %4319  ;;  %v1139_v5 = vmul.f32 0.6931472, %v4318_v23 }
 0x350   : > { %vm2205_vm13 = vcmp.eq.f32.partialorder %v6417_v20, %v2141_v0  ;;  %v2421_v20 = vmul.f32 %v1780_v6, %v432_v22  ;;  %v1133_v55 = vmul.f32 0.6931472, %v4320_v39  ;;  %v4419_v22 = vld [vmem:[%s5271_s8 + $0xa8] sm:$0xff]  ;;  %v3961_v39 = vpack.i.bf16 %v3662_v37, %v3661_v25 }
 0x351   : > { %v6620_v30 = vpop.xlane.xlu1 %2049  ;;  %2636 = vperm.xlu1 %3930, %v2417_v14   ;;  %v6622_v50 = vpop.xlane.xlu0 %2088  ;;  %v8135_v14 = vld [vmem:[#allocation111_spill] sm:$0xff]  ;;  %v3677_v0 = vsel %vm2205_vm13, 1.0, %v8137_v60  ;;  %v1214_v6 = vadd.f32 %v1139_v5, %v8141_v56  ;;  %v8145_v56 = vld [vmem:[#allocation144_spill] sm:$0xff] }
 0x352   : > { %3942 = vperm.xlu0 %3929, %v3941_v58   ;;  %4321 = vlog2.f32 %v8135_v14  ;;  %v1782_v58 = vsub.f32 %v1206_v33, %v8138_v19  ;;  %v3951_v7 = vpack.i.bf16 %v3678_v40, %v3677_v0  ;;  %v8142_v40 = vld [vmem:[#allocation133_spill] sm:$0xff]  ;;  %v8143_v14 = vld [vmem:[#allocation138_spill] sm:$0xff] }
 0x353   : > { %4323 = vlog2.f32 %v8139_v47  ;;  %v1790_v42 = vsub.f32 %v1214_v6, %v8143_v14  ;;  %v4420_v19 = vld [vmem:[%s5271_s8 + $0xa0] sm:$0xff]  ;;  %v8144_v47 = vld [vmem:[#allocation54_spill] sm:$0xff] }
 0x354   : > { %v2423_v32 = vmul.f32 %v1782_v58, %v434_v43  ;;  %v442_v0 = vld [vmem:[%s6306_s11 + $0x1a0] sm:$0xff]  ;;  %v1211_v5 = vadd.f32 %v1133_v55, %v8144_v47  ;;  %v4421_v43 = vld [vmem:[%s5271_s8 + $0x28] sm:$0xff] }
 0x355   : > { %v6633_v62 = vpop.xlane.xlu1 %2055  ;;  %2646 = vperm.xlu1 %3930, %v2419_v28   ;;  %v6635_v18 = vpop.xlane.xlu0 %2094  ;;  %v8140_v28 = vld [vmem:[#allocation51_spill] sm:$0xff]  ;;  %v4422_v55 = vld [vmem:[%s5271_s8 + $0x20] sm:$0xff] }
 0x356   : > { %2696 = vperm.xlu0 %3929, %v2429_v31   ;;  %v1208_v23 = vadd.f32 %v1127_v53, %v8140_v28  ;;  %v2144_v31 = vcvt.s32.f32 %v4419_v22  ;;  %v436_v53 = vld [vmem:[%s6306_s11 + $0x170] sm:$0xff]  ;;  %v1787_v6 = vsub.f32 %v1211_v5, %v8145_v56  ;;  %v2431_v22 = vmul.f32 %v1790_v42, %v442_v0  ;;  %v4423_v14 = vld [vmem:[%s5271_s8 + $0x180] sm:$0xff] }
 0x357   : > { %v2127_v25 = vcvt.s32.f32 %v4422_v55  ;;  %v8148_v47 = vld [vmem:[#allocation113_spill] sm:$0xff]  ;;  %v8153_v55 = vld [vmem:[#allocation110_spill] sm:$0xff]  ;;  %v8155_v42 = vld [vmem:[#allocation139_spill] sm:$0xff] }
 0x358   : > { %v1784_v48 = vsub.f32 %v1208_v23, %v8142_v40  ;;  %vm2208_vm1 = vcmp.eq.f32.partialorder %v6511_v51, %v2144_v31  ;;  %v439_v40 = vld [vmem:[%s6306_s11 + $0x188] sm:$0xff]  ;;  %4325 = vlog2.f32 %v8148_v47 }
 0x359   : > { %v6645_v45 = vpop.xlane.xlu1 %2061  ;;  %2656 = vperm.xlu1 %3930, %v2421_v20   ;;  %v6647_v33 = vpop.xlane.xlu0 %2100  ;;  %v2143_v20 = vcvt.s32.f32 %v4420_v19  ;;  %v2171_v19 = vcvt.s32.f32 %v4423_v14  ;;  %v3680_v51 = vsel %vm2208_vm1, 1.0, %v8137_v60  ;;  %v2428_v5 = vmul.f32 %v1787_v6, %v439_v40 }
 0x35a   : > { %3952 = vperm.xlu0 %3929, %v3951_v7   ;;  %v2128_v7 = vcvt.s32.f32 %v4421_v43  ;;  %v2425_v37 = vmul.f32 %v1784_v48, %v436_v53  ;;  %vm6690_vm4 = vcmp.eq.f32.partialorder %v6340_v21, %v2127_v25  ;;  %4327 = vlog2.f32 %v8153_v55  ;;  %v4427_v25 = vld [vmem:[%s5271_s8 + $0xb8] sm:$0xff] }
 0x35b   : > { %vm6668_vm2 = vcmp.eq.f32.partialorder %v6429_v41, %v2143_v20  ;;  %v4424_v41 = vld [vmem:[%s5271_s8 + $0x108] sm:$0xff]  ;;  %vm2235_vm5 = vcmp.eq.f32.partialorder %v6597_v35, %v2171_v19  ;;  %v2146_v14 = vcvt.s32.f32 %v4427_v25  ;;  %v3663_v35 = vsel %vm6690_vm4, 1.0, %v8137_v60  ;;  %v4428_v19 = vld [vmem:[%s5271_s8 + $0xb0] sm:$0xff] }
 0x35c   : > { %v4322_v23 = vpop.eup %4321  ;;  %vm6678_vm3 = vcmp.eq.f32.partialorder %v6415_v59, %v2128_v7  ;;  %v4425_v20 = vld [vmem:[%s5271_s8 + $0x188] sm:$0xff]  ;;  %v3679_v43 = vsel %vm6668_vm2, 1.0, %v8137_v60  ;;  %v4426_v59 = vld [vmem:[%s5271_s8 + $0x100] sm:$0xff]  ;;  %v2145_v47 = vcvt.s32.f32 %v4428_v19  ;;  %v4432_v25 = vld [vmem:[%s5271_s8 + $0x190] sm:$0xff] }
 0x35d   : > { %v6658_v28 = vpop.xlane.xlu1 %2067  ;;  %2666 = vperm.xlu1 %3930, %v2423_v32   ;;  %v6660_v58 = vpop.xlane.xlu0 %2106  ;;  %v1143_v53 = vmul.f32 0.6931472, %v4322_v23  ;;  %v2172_v0 = vcvt.s32.f32 %v4425_v20  ;;  %v2155_v7 = vcvt.s32.f32 %v4426_v59  ;;  %v3664_v6 = vsel %vm6678_vm3, 1.0, %v8137_v60  ;;  %v8154_v32 = vld [vmem:[#allocation5_spill] sm:$0xff]  ;;  %v444_v20 = vld [vmem:[%s6306_s11 + $0x1b0] sm:$0xff]  ;;  %v8158_v23 = vld [vmem:[#allocation56_spill] sm:$0xff] }
 0x35e   : > { %3962 = vperm.xlu0 %3929, %v3961_v39   ;;  %v4324_v48 = vpop.eup %4323  ;;  %v2156_v39 = vcvt.s32.f32 %v4424_v41  ;;  %v3981_v41 = vpack.i.bf16 %v3664_v6, %v3663_v35  ;;  %vm6722_vm0 = vcmp.eq.f32.partialorder %v6523_v46, %v2146_v14  ;;  %v2173_v35 = vcvt.s32.f32 %v4432_v25  ;;  %v8161_v46 = vld [vmem:[#allocation146_spill] sm:$0xff] }
 0x35f   : > { %v1216_v21 = vadd.f32 %v1143_v53, %v8154_v32  ;;  %vm6711_vm8 = vcmp.eq.f32.partialorder %v6501_v13, %v2155_v7  ;;  %v4430_v13 = vld [vmem:[%s5271_s8 + $0x198] sm:$0xff]  ;;  %v4431_v32 = vld [vmem:[%s5271_s8 + $0x30] sm:$0xff]  ;;  %vm2209_vm9 = vcmp.eq.f32.partialorder %v6441_v49, %v2145_v47 }
 0x360   : > { %vm2220_vm6 = vcmp.eq.f32.partialorder %v6581_v8, %v2156_v39  ;;  %v2174_v7 = vcvt.s32.f32 %v4430_v13  ;;  %v3681_v47 = vsel %vm2209_vm9, 1.0, %v8137_v60  ;;  %vm6749_vm13 = vcmp.eq.f32.partialorder %v6609_v10, %v2173_v35  ;;  %v4436_v35 = vld [vmem:[%s5271_s8 + $0xc0] sm:$0xff] }
 0x361   : > { %v6675_v31 = vpop.xlane.xlu1 %2073  ;;  %2676 = vperm.xlu1 %3930, %v2425_v37   ;;  %v6687_v56 = vpop.xlane.xlu0 %2112  ;;  %v3971_v37 = vpack.i.bf16 %v3680_v51, %v3679_v43  ;;  %v3707_v51 = vsel %vm2235_vm5, 1.0, %v8137_v60  ;;  %v1792_v53 = vsub.f32 %v1216_v21, %v8155_v42  ;;  %v2129_v21 = vcvt.s32.f32 %v4431_v32  ;;  %v441_v42 = vld [vmem:[%s6306_s11 + $0x198] sm:$0xff] }
 0x362   : > { %2706 = vperm.xlu0 %3929, %v2431_v22   ;;  %v1137_v22 = vmul.f32 0.6931472, %v4324_v48 }
 0x363   : > { %v2433_v19 = vmul.f32 %v1792_v53, %v444_v20  ;;  %v4433_v53 = vld [vmem:[%s5271_s8 + $0x118] sm:$0xff]  ;;  %vm2193_vm12 = vcmp.eq.f32.partialorder %v6350_v38, %v2129_v21  ;;  %v8166_v38 = vld [vmem:[#allocation7_spill] sm:$0xff] }
 0x364   : > { %v1213_v59 = vadd.f32 %v1137_v22, %v8158_v23  ;;  %v3691_v22 = vsel %vm6711_vm8, 1.0, %v8137_v60  ;;  %v2158_v20 = vcvt.s32.f32 %v4433_v53  ;;  %v3665_v10 = vsel %vm2193_vm12, 1.0, %v8137_v60 }
 0x365   : > { %v2080_v40 = vpop.xlane.xlu1 %2079  ;;  %2691 = vperm.xlu1 %3930, %v2428_v5   ;;  %v6717_v5 = vpop.xlane.xlu0 %2118 }
 0x366   : > { %vm2236_vm7 = vcmp.eq.f32.partialorder %v2080_v40, %v2172_v0  ;;  %3972 = vperm.xlu0 %3929, %v3971_v37   ;;  %v3692_v0 = vsel %vm2220_vm6, 1.0, %v8137_v60  ;;  %v4429_v37 = vld [vmem:[%s5271_s8 + $0x38] sm:$0xff]  ;;  %v4326_v40 = vpop.eup %4325  ;;  %v1789_v14 = vsub.f32 %v1213_v59, %v8161_v46  ;;  %vm2222_vm14 = vcmp.eq.f32.partialorder %v6595_v9, %v2158_v20 }
 0x367   : > { %v3708_v48 = vsel %vm2236_vm7, 1.0, %v8137_v60  ;;  %v2130_v55 = vcvt.s32.f32 %v4429_v37  ;;  %v1147_v23 = vmul.f32 0.6931472, %v4326_v40  ;;  %v4328_v49 = vpop.eup %4327  ;;  %v3709_v46 = vsel %vm6749_vm13, 1.0, %v8137_v60 }
 0x368   : > { %v3936_v39 = vpack.i.bf16 %v3708_v48, %v3707_v51  ;;  %v3946_v51 = vpack.i.bf16 %v3692_v0, %v3691_v22  ;;  %v8162_v48 = vld [vmem:[#allocation115_spill] sm:$0xff]  ;;  %v2430_v37 = vmul.f32 %v1789_v14, %v441_v42  ;;  %v1141_v32 = vmul.f32 0.6931472, %v4328_v49  ;;  %v4435_v22 = vld [vmem:[%s5271_s8 + $0xc8] sm:$0xff]  ;;  %v8167_v14 = vld [vmem:[#allocation140_spill] sm:$0xff] }
 0x369   : > { %v2086_v43 = vpop.xlane.xlu1 %2085  ;;  %4329 = vlog2.f32 %v8162_v48  ;;  %vm2194_vm10 = vcmp.eq.f32.partialorder %v6427_v61, %v2130_v55  ;;  %v4434_v0 = vld [vmem:[%s5271_s8 + $0x110] sm:$0xff]  ;;  %v8165_v61 = vld [vmem:[#allocation112_spill] sm:$0xff]  ;;  %v1218_v21 = vadd.f32 %v1147_v23, %v8166_v38  ;;  %v2148_v25 = vcvt.s32.f32 %v4435_v22  ;;  %v8170_v49 = vld [vmem:[#allocation58_spill] sm:$0xff] }
 0x36a   : > { %3982 = vperm.xlu0 %3929, %v3981_v41   ;;  %3937 = vperm.xlu1 %3930, %v3936_v39   ;;  %v3682_v41 = vsel %vm6722_vm0, 1.0, %v8137_v60  ;;  %vm2238_vm11 = vcmp.eq.f32.partialorder %v2086_v43, %v2174_v7  ;;  %v2157_v59 = vcvt.s32.f32 %v4434_v0  ;;  %4331 = vlog2.f32 %v8165_v61  ;;  %v4437_v0 = vld [vmem:[%s5271_s8 + $0x48] sm:$0xff]  ;;  %v4439_v61 = vld [vmem:[%s5271_s8 + $0x40] sm:$0xff] }
 0x36b   : > { %v3991_v6 = vpack.i.bf16 %v3682_v41, %v3681_v47  ;;  %v3666_v43 = vsel %vm2194_vm10, 1.0, %v8137_v60  ;;  %v3710_v55 = vsel %vm2238_vm11, 1.0, %v8137_v60  ;;  %v446_v41 = vld [vmem:[%s6306_s11 + $0x1c0] sm:$0xff]  ;;  %v3694_v23 = vsel %vm2222_vm14, 1.0, %v8137_v60 }
 0x36c   : > { %v4001_v48 = vpack.i.bf16 %v3666_v43, %v3665_v10  ;;  %vm6770_vm15 = vcmp.eq.f32.partialorder %v6513_v52, %v2157_v59  ;;  %v3956_v9 = vpack.i.bf16 %v3710_v55, %v3709_v46  ;;  %v1215_v47 = vadd.f32 %v1141_v32, %v8170_v49  ;;  %v4438_v52 = vld [vmem:[%s5271_s8 + $0x1a8] sm:$0xff]  ;;  %v4440_v32 = vld [vmem:[%s5271_s8 + $0x1a0] sm:$0xff] }
 0x36d   : > { %v6739_v39 = vpop.xlane.xlu1 %2091  ;;  %v6741_v8 = vpop.permute.xlu0 %2446  ;;  %vm6783_vm1 = vcmp.eq.f32.partialorder %v6534_v4, %v2148_v25  ;;  %v2176_v59 = vcvt.s32.f32 %v4438_v52  ;;  %v2131_v43 = vcvt.s32.f32 %v4439_v61  ;;  %v3693_v55 = vsel %vm6770_vm15, 1.0, %v8137_v60  ;;  %v8173_v25 = vld [vmem:[#allocation117_spill] sm:$0xff]  ;;  %v443_v10 = vld [vmem:[%s6306_s11 + $0x1a8] sm:$0xff]  ;;  %v4444_v61 = vld [vmem:[%s5271_s8 + $0xd0] sm:$0xff] }
 0x36e   : > { %2716 = vperm.xlu0 %3929, %v2433_v19   ;;  %3947 = vperm.xlu1 %3930, %v3946_v51   ;;  %v2147_v19 = vcvt.s32.f32 %v4436_v35  ;;  %v1794_v51 = vsub.f32 %v1218_v21, %v8167_v14  ;;  %v2175_v38 = vcvt.s32.f32 %v4440_v32  ;;  %v1791_v4 = vsub.f32 %v1215_v47, %v6325_v26  ;;  %v4442_v42 = vld [vmem:[%s5271_s8 + $0x120] sm:$0xff]  ;;  %v8176_v49 = vld [vmem:[#allocation114_spill] sm:$0xff] }
 0x36f   : > { %v3966_v22 = vpack.i.bf16 %v3694_v23, %v3693_v55  ;;  %4333 = vlog2.f32 %v8173_v25  ;;  %v3684_v35 = vsel %vm6783_vm1, 1.0, %v8137_v60  ;;  %vm2240_vm4 = vcmp.eq.f32.partialorder %v6739_v39, %v2176_v59  ;;  %v4443_v59 = vld [vmem:[%s5271_s8 + $0xd8] sm:$0xff]  ;;  %v8178_v32 = vld [vmem:[#allocation141_spill] sm:$0xff] }
 0x370   : > { %v2435_v21 = vmul.f32 %v1794_v51, %v446_v41  ;;  %vm2211_vm2 = vcmp.eq.f32.partialorder %v6453_v29, %v2147_v19  ;;  %v4441_v51 = vld [vmem:[%s5271_s8 + $0x128] sm:$0xff]  ;;  %v2432_v41 = vmul.f32 %v1791_v4, %v443_v10  ;;  %vm2195_vm5 = vcmp.eq.f32.partialorder %v6359_v36, %v2131_v43  ;;  %v8177_v36 = vld [vmem:[#allocation9_spill] sm:$0xff] }
 0x371   : > { %v6756_v7 = vpop.xlane.xlu1 %2097  ;;  %v6758_v40 = vpop.permute.xlu0 %2461  ;;  %v2160_v26 = vcvt.s32.f32 %v4441_v51  ;;  %v3683_v19 = vsel %vm2211_vm2, 1.0, %v8137_v60  ;;  %vm6811_vm6 = vcmp.eq.f32.partialorder %v6622_v50, %v2175_v38  ;;  %4335 = vlog2.f32 %v8176_v49  ;;  %v4448_v49 = vld [vmem:[%s5271_s8 + $0x1b0] sm:$0xff] }
 0x372   : > { %3992 = vperm.xlu0 %3929, %v3991_v6   ;;  %2701 = vperm.xlu1 %3930, %v2430_v37   ;;  %v2132_v37 = vcvt.s32.f32 %v4437_v0  ;;  %v4011_v23 = vpack.i.bf16 %v3684_v35, %v3683_v19  ;;  %v3712_v47 = vsel %vm2240_vm4, 1.0, %v8137_v60  ;;  %v3667_v50 = vsel %vm2195_vm5, 1.0, %v8137_v60 }
 0x373   : > { %v4330_v13 = vpop.eup %4329  ;;  %vm2224_vm7 = vcmp.eq.f32.partialorder %v6607_v15, %v2160_v26  ;;  %v2149_v43 = vcvt.s32.f32 %v4444_v61  ;;  %v3711_v55 = vsel %vm6811_vm6, 1.0, %v8137_v60  ;;  %v4445_v26 = vld [vmem:[%s5271_s8 + $0x58] sm:$0xff] }
 0x374   : > { %vm2196_vm3 = vcmp.eq.f32.partialorder %v6439_v1, %v2132_v37  ;;  %v4332_v29 = vpop.eup %4331  ;;  %v3976_v15 = vpack.i.bf16 %v3712_v47, %v3711_v55  ;;  %v3696_v25 = vsel %vm2224_vm7, 1.0, %v8137_v60  ;;  %v4449_v55 = vld [vmem:[%s5271_s8 + $0x138] sm:$0xff] }
 0x375   : > { %v6776_v53 = vpop.xlane.xlu1 %2103  ;;  %v6778_v20 = vpop.permute.xlu0 %2471  ;;  %v3668_v39 = vsel %vm2196_vm3, 1.0, %v8137_v60  ;;  %v1145_v6 = vmul.f32 0.6931472, %v4332_v29  ;;  %v2134_v29 = vcvt.s32.f32 %v4445_v26  ;;  %vm2213_vm9 = vcmp.eq.f32.partialorder %v6465_v27, %v2149_v43  ;;  %v8188_v26 = vld [vmem:[#allocation11_spill] sm:$0xff] }
 0x376   : > { %4002 = vperm.xlu0 %3929, %v4001_v48   ;;  %3957 = vperm.xlu1 %3930, %v3956_v9   ;;  %v1151_v48 = vmul.f32 0.6931472, %v4330_v13  ;;  %v2159_v9 = vcvt.s32.f32 %v4442_v42  ;;  %v2150_v13 = vcvt.s32.f32 %v4443_v59  ;;  %v3685_v43 = vsel %vm2213_vm9, 1.0, %v8137_v60 }
 0x377   : > { %vm2198_vm10 = vcmp.eq.f32.partialorder %v6451_v24, %v2134_v29  ;;  %v4451_v29 = vld [vmem:[%s5271_s8 + $0xe8] sm:$0xff] }
 0x378   : > { %v1220_v52 = vadd.f32 %v1151_v48, %v8177_v36  ;;  %vm6832_vm8 = vcmp.eq.f32.partialorder %v6525_v57, %v2159_v9  ;;  %v8181_v48 = vld [vmem:[#allocation6_spill] sm:$0xff]  ;;  %vm6845_vm0 = vcmp.eq.f32.partialorder %v6545_v63, %v2150_v13  ;;  %v4446_v57 = vld [vmem:[%s5271_s8 + $0x1b8] sm:$0xff]  ;;  %v8184_v36 = vld [vmem:[#allocation119_spill] sm:$0xff]  ;;  %v2152_v19 = vcvt.s32.f32 %v4451_v29 }
 0x379   : > { %v6800_v46 = vpop.xlane.xlu1 %2109  ;;  %v6802_v14 = vpop.permute.xlu0 %2481  ;;  %v1217_v51 = vadd.f32 %v1145_v6, %v8181_v48  ;;  %v2178_v42 = vcvt.s32.f32 %v4446_v57  ;;  %v3695_v1 = vsel %vm6832_vm8, 1.0, %v8137_v60  ;;  %4337 = vlog2.f32 %v8184_v36  ;;  %v4452_v57 = vld [vmem:[%s5271_s8 + $0xe0] sm:$0xff] }
 0x37a   : > { %2726 = vperm.xlu0 %3929, %v2435_v21   ;;  %3967 = vperm.xlu1 %3930, %v3966_v22   ;;  %v1796_v38 = vsub.f32 %v1220_v52, %v8178_v32  ;;  %v4021_v21 = vpack.i.bf16 %v3668_v39, %v3667_v50  ;;  %v448_v22 = vld [vmem:[%s6306_s11 + $0x1d0] sm:$0xff]  ;;  %v4334_v9 = vpop.eup %4333  ;;  %v2177_v39 = vcvt.s32.f32 %v4448_v49  ;;  %v3986_v6 = vpack.i.bf16 %v3696_v25, %v3695_v1  ;;  %v445_v52 = vld [vmem:[%s6306_s11 + $0x1b8] sm:$0xff] }
 0x37b   : > { %v1793_v63 = vsub.f32 %v1217_v51, %v6338_v16  ;;  %v3686_v59 = vsel %vm6845_vm0, 1.0, %v8137_v60  ;;  %v1155_v61 = vmul.f32 0.6931472, %v4334_v9  ;;  %v2162_v16 = vcvt.s32.f32 %v4449_v55  ;;  %v4336_v27 = vpop.eup %4335  ;;  %v4450_v32 = vld [vmem:[%s5271_s8 + $0x130] sm:$0xff] }
 0x37c   : > { %v2437_v47 = vmul.f32 %v1796_v38, %v448_v22  ;;  %vm2242_vm11 = vcmp.eq.f32.partialorder %v6756_v7, %v2178_v42  ;;  %v2161_v38 = vcvt.s32.f32 %v4450_v32  ;;  %v4031_v4 = vpack.i.bf16 %v3686_v59, %v3685_v43  ;;  %v4455_v32 = vld [vmem:[%s5271_s8 + $0x60] sm:$0xff] }
 0x37d   : > { %v6818_v0 = vpop.xlane.xlu1 %2115  ;;  %v6820_v37 = vpop.permute.xlu0 %2491  ;;  %vm6873_vm13 = vcmp.eq.f32.partialorder %v6635_v18, %v2177_v39  ;;  %v3670_v7 = vsel %vm2198_vm10, 1.0, %v8137_v60  ;;  %v3714_v22 = vsel %vm2242_vm11, 1.0, %v8137_v60  ;;  %v1149_v51 = vmul.f32 0.6931472, %v4336_v27  ;;  %v8192_v39 = vld [vmem:[#allocation104_spill] sm:$0xff] }
 0x37e   : > { %4012 = vperm.xlu0 %3929, %v4011_v23   ;;  %2711 = vperm.xlu1 %3930, %v2432_v41   ;;  %v4447_v41 = vld [vmem:[%s5271_s8 + $0x50] sm:$0xff]  ;;  %vm2226_vm14 = vcmp.eq.f32.partialorder %v6620_v30, %v2162_v16  ;;  %v2151_v42 = vcvt.s32.f32 %v4452_v57  ;;  %v3713_v9 = vsel %vm6873_vm13, 1.0, %v8137_v60  ;;  %vm6894_vm15 = vcmp.eq.f32.partialorder %v6536_v17, %v2161_v38  ;;  %v4454_v16 = vld [vmem:[%s5271_s8 + $0x1c8] sm:$0xff]  ;;  %v4458_v57 = vld [vmem:[%s5271_s8 + $0x140] sm:$0xff] }
 0x37f   : > { %v2133_v23 = vcvt.s32.f32 %v4447_v41  ;;  %v8189_v41 = vld [vmem:[#allocation143_spill] sm:$0xff]  ;;  %v3996_v30 = vpack.i.bf16 %v3714_v22, %v3713_v9  ;;  %vm6908_vm1 = vcmp.eq.f32.partialorder %v6557_v11, %v2152_v19  ;;  %v2180_v27 = vcvt.s32.f32 %v4454_v16  ;;  %v447_v22 = vld [vmem:[%s6306_s11 + $0x1c8] sm:$0xff] }
 0x380   : > { %v2135_v38 = vcvt.s32.f32 %v4455_v32  ;;  %vm2215_vm2 = vcmp.eq.f32.partialorder %v6477_v34, %v2151_v42  ;;  %v4457_v19 = vld [vmem:[%s5271_s8 + $0x148] sm:$0xff]  ;;  %v2163_v42 = vcvt.s32.f32 %v4458_v57 }
 0x381   : > { %v6838_v10 = vpop.xlane.xlu1 %2121  ;;  %v6840_v35 = vpop.permute.xlu0 %2501  ;;  %vm2197_vm12 = vcmp.eq.f32.partialorder %v6369_v54, %v2133_v23  ;;  %v1222_v54 = vadd.f32 %v1155_v61, %v8188_v26  ;;  %v4453_v61 = vld [vmem:[%s5271_s8 + $0x68] sm:$0xff]  ;;  %vm2244_vm4 = vcmp.eq.f32.partialorder %v6776_v53, %v2180_v27  ;;  %v3687_v34 = vsel %vm2215_vm2, 1.0, %v8137_v60  ;;  %v8202_v27 = vld [vmem:[#allocation145_spill] sm:$0xff] }
 0x382   : > { %4022 = vperm.xlu0 %3929, %v4021_v21   ;;  %3977 = vperm.xlu1 %3930, %v3976_v15   ;;  %v2434_v21 = vmul.f32 %v1793_v63, %v445_v52  ;;  %v8187_v15 = vld [vmem:[#allocation116_spill] sm:$0xff]  ;;  %v3669_v18 = vsel %vm2197_vm12, 1.0, %v8137_v60  ;;  %v3698_v63 = vsel %vm2226_vm14, 1.0, %v8137_v60  ;;  %v2136_v55 = vcvt.s32.f32 %v4453_v61  ;;  %v8200_v53 = vld [vmem:[#allocation118_spill] sm:$0xff] }
 0x383   : > { %4339 = vlog2.f32 %v8187_v15  ;;  %v1798_v23 = vsub.f32 %v1222_v54, %v8189_v41  ;;  %v4041_v1 = vpack.i.bf16 %v3670_v7, %v3669_v18  ;;  %v8193_v52 = vld [vmem:[#allocation8_spill] sm:$0xff]  ;;  %v4338_v43 = vpop.eup %4337  ;;  %v2164_v18 = vcvt.s32.f32 %v4457_v19  ;;  %v4462_v19 = vld [vmem:[%s5271_s8 + $0x1d0] sm:$0xff] }
 0x384   : > { %4341 = vlog2.f32 %v8192_v39  ;;  %v1219_v59 = vadd.f32 %v1149_v51, %v8193_v52  ;;  %v3688_v51 = vsel %vm6908_vm1, 1.0, %v8137_v60  ;;  %v1159_v29 = vmul.f32 0.6931472, %v4338_v43  ;;  %v4459_v52 = vld [vmem:[%s5271_s8 + $0xf8] sm:$0xff] }
 0x385   : > { %v6862_v13 = vpop.permute.xlu1 %2451  ;;  %v6864_v50 = vpop.permute.xlu0 %2511  ;;  %vm2200_vm3 = vcmp.eq.f32.partialorder %v6463_v44, %v2136_v55  ;;  %vm6934_vm5 = vcmp.eq.f32.partialorder %v6381_v2, %v2135_v38  ;;  %4343 = vlog2.f32 %v8200_v53  ;;  %v3716_v49 = vsel %vm2244_vm4, 1.0, %v8137_v60  ;;  %v4460_v55 = vld [vmem:[%s5271_s8 + $0xf0] sm:$0xff]  ;;  %v449_v41 = vld [vmem:[%s6306_s11 + $0x1d8] sm:$0xff] }
 0x386   : > { %2736 = vperm.xlu0 %3929, %v2437_v47   ;;  %3987 = vperm.xlu1 %3930, %v3986_v6   ;;  %v450_v47 = vld [vmem:[%s6306_s11 + $0x1e0] sm:$0xff]  ;;  %v1795_v11 = vsub.f32 %v1219_v59, %v6348_v3  ;;  %v2154_v59 = vcvt.s32.f32 %v4459_v52  ;;  %vm2228_vm7 = vcmp.eq.f32.partialorder %v6633_v62, %v2164_v18  ;;  %v3671_v61 = vsel %vm6934_vm5, 1.0, %v8137_v60  ;;  %v452_v38 = vld [vmem:[%s6306_s11 + $0x1f0] sm:$0xff] }
 0x387   : > { %v2439_v15 = vmul.f32 %v1798_v23, %v450_v47  ;;  %v4051_v23 = vpack.i.bf16 %v3688_v51, %v3687_v34  ;;  %v8201_v47 = vld [vmem:[#allocation13_spill] sm:$0xff]  ;;  %v2153_v17 = vcvt.s32.f32 %v4460_v55  ;;  %vm2227_vm8 = vcmp.eq.f32.partialorder %v6547_v12, %v2163_v42  ;;  %v4461_v51 = vld [vmem:[%s5271_s8 + $0x1d8] sm:$0xff]  ;;  %v8205_v34 = vld [vmem:[#allocation147_spill] sm:$0xff] }
 0x388   : > { %v2436_v9 = vmul.f32 %v1795_v11, %v447_v22  ;;  %v8203_v11 = vld [vmem:[#allocation10_spill] sm:$0xff]  ;;  %v3699_v12 = vsel %vm2227_vm8, 1.0, %v8137_v60  ;;  %v2181_v18 = vcvt.s32.f32 %v4462_v19 }
 0x389   : > { %v6880_v25 = vpop.permute.xlu1 %2456  ;;  %v6882_v48 = vpop.permute.xlu0 %2521  ;;  %v8204_v22 = vld [vmem:[#allocation66_spill] sm:$0xff] }
 0x38a   : > { %4032 = vperm.xlu0 %3929, %v4031_v4   ;;  %2721 = vperm.xlu1 %3930, %v2434_v21   ;;  %v3697_v21 = vsel %vm6894_vm15, 1.0, %v8137_v60  ;;  %v4456_v4 = vld [vmem:[%s5271_s8 + $0x1c0] sm:$0xff]  ;;  %vm2218_vm0 = vcmp.eq.f32.partialorder %v8204_v22, %v2154_v59  ;;  %v8206_v42 = vld [vmem:[#allocation62_spill] sm:$0xff]  ;;  %vm2245_vm11 = vcmp.eq.f32.partialorder %v6660_v58, %v2181_v18 }
 0x38b   : > { %v2179_v24 = vcvt.s32.f32 %v4456_v4  ;;  %v4006_v7 = vpack.i.bf16 %v3698_v63, %v3697_v21  ;;  %v1224_v63 = vadd.f32 %v1159_v29, %v8201_v47  ;;  %v3700_v21 = vsel %vm2228_vm7, 1.0, %v8137_v60 }
 0x38c   : > { %v2182_v29 = vcvt.s32.f32 %v4461_v51  ;;  %vm2217_vm9 = vcmp.eq.f32.partialorder %v8206_v42, %v2153_v17  ;;  %v4466_v17 = vld [vmem:[%s5271_s8 + $0x170] sm:$0xff]  ;;  %v3717_v22 = vsel %vm2245_vm11, 1.0, %v8137_v60  ;;  %v8210_v51 = vld [vmem:[#allocation64_spill] sm:$0xff] }
 0x38d   : > { %v6901_v6 = vpop.permute.xlu1 %2466  ;;  %v6903_v36 = vpop.permute.xlu0 %2531  ;;  %vm6939_vm6 = vcmp.eq.f32.partialorder %v6647_v33, %v2179_v24  ;;  %v1800_v43 = vsub.f32 %v1224_v63, %v8202_v27  ;;  %v4464_v63 = vld [vmem:[%s5271_s8 + $0x178] sm:$0xff]  ;;  %v8208_v27 = vld [vmem:[#allocation142_spill] sm:$0xff] }
 0x38e   : > { %4042 = vperm.xlu0 %3929, %v4041_v1   ;;  %3997 = vperm.xlu1 %3930, %v3996_v30   ;;  %v4340_v3 = vpop.eup %4339  ;;  %v3672_v1 = vsel %vm2200_vm3, 1.0, %v8137_v60  ;;  %v3715_v16 = vsel %vm6939_vm6, 1.0, %v8137_v60  ;;  %v2170_v52 = vcvt.s32.f32 %v4464_v63  ;;  %vm2246_vm10 = vcmp.eq.f32.partialorder %v6800_v46, %v2182_v29  ;;  %v8211_v29 = vld [vmem:[#allocation16_spill] sm:$0xff] }
 0x38f   : > { %v1153_v2 = vmul.f32 0.6931472, %v4340_v3  ;;  %v4342_v33 = vpop.eup %4341  ;;  %v4061_v32 = vpack.i.bf16 %v3672_v1, %v3671_v61  ;;  %v4016_v62 = vpack.i.bf16 %v3716_v49, %v3715_v16  ;;  %v2441_v3 = vmul.f32 %v1800_v43, %v452_v38  ;;  %v8207_v1 = vld [vmem:[#allocation52_spill] sm:$0xff]  ;;  %v4465_v61 = vld [vmem:[%s5271_s8 + $0x150] sm:$0xff] }
 0x390   : > { %v4344_v59 = vpop.eup %4343  ;;  %v2165_v55 = vcvt.s32.f32 %v4465_v61  ;;  %v2169_v16 = vcvt.s32.f32 %v4466_v17  ;;  %v8209_v38 = vld [vmem:[#allocation120_spill] sm:$0xff]  ;;  %v3718_v46 = vsel %vm2246_vm10, 1.0, %v8137_v60  ;;  %vm2234_vm13 = vcmp.eq.f32.partialorder %v6675_v31, %v2170_v52  ;;  %v451_v52 = vld [vmem:[%s6306_s11 + $0x1e8] sm:$0xff] }
 0x391   : > { %v6924_v26 = vpop.permute.xlu1 %2476  ;;  %v6926_v54 = vpop.permute.xlu0 %2541  ;;  %4345 = vlog2.f32 %v8209_v38  ;;  %v3706_v18 = vsel %vm2234_vm13, 1.0, %v8137_v60  ;;  %v8212_v31 = vld [vmem:[#allocation12_spill] sm:$0xff]  ;;  %v4469_v61 = vld [vmem:[%s5271_s8 + $0x168] sm:$0xff] }
 0x392   : > { %2746 = vperm.xlu0 %3929, %v2439_v15   ;;  %4007 = vperm.xlu1 %3930, %v4006_v7   ;;  %v1129_v15 = vmul.f32 0.6931472, %v4342_v33  ;;  %v1221_v7 = vadd.f32 %v1153_v2, %v8203_v11  ;;  %v4463_v2 = vld [vmem:[%s5271_s8 + $0x158] sm:$0xff]  ;;  %v3689_v33 = vsel %vm2217_vm9, 1.0, %v8137_v60  ;;  %vm2229_vm14 = vcmp.eq.f32.partialorder %v8210_v51, %v2165_v55  ;;  %v8215_v51 = vld [vmem:[#allocation14_spill] sm:$0xff] }
 0x393   : > { %v2166_v47 = vcvt.s32.f32 %v4463_v2  ;;  %vm2233_vm15 = vcmp.eq.f32.partialorder %v8211_v29, %v2169_v16  ;;  %v2168_v55 = vcvt.s32.f32 %v4469_v61 }
 0x394   : > { %v1797_v57 = vsub.f32 %v1221_v7, %v8205_v34  ;;  %v1209_v49 = vadd.f32 %v1129_v15, %v8207_v1  ;;  %v1157_v7 = vmul.f32 0.6931472, %v4344_v59 }
 0x395   : > { %v6946_v30 = vpop.permute.xlu1 %2486  ;;  %v6948_v39 = vpop.permute.xlu0 %2551  ;;  %vm2230_vm12 = vcmp.eq.f32.partialorder %v6645_v45, %v2166_v47  ;;  %v4468_v47 = vld [vmem:[%s5271_s8 + $0x1e0] sm:$0xff]  ;;  %vm2232_vm3 = vcmp.eq.f32.partialorder %v6658_v28, %v2168_v55 }
 0x396   : > { %4052 = vperm.xlu0 %3929, %v4051_v23   ;;  %2731 = vperm.xlu1 %3930, %v2436_v9   ;;  %v4026_v9 = vpack.i.bf16 %v3700_v21, %v3699_v12  ;;  %v3690_v23 = vsel %vm2218_vm0, 1.0, %v8137_v60  ;;  %v1785_v43 = vsub.f32 %v1209_v49, %v8208_v27  ;;  %v437_v21 = vld [vmem:[%s6306_s11 + $0x178] sm:$0xff]  ;;  %v4036_v12 = vpack.i.bf16 %v3718_v46, %v3717_v22  ;;  %v4470_v27 = vld [vmem:[%s5271_s8 + $0x160] sm:$0xff] }
 0x397   : > { %v3702_v19 = vsel %vm2230_vm12, 1.0, %v8137_v60  ;;  %v1223_v34 = vadd.f32 %v1157_v7, %v8212_v31  ;;  %v2183_v63 = vcvt.s32.f32 %v4468_v47  ;;  %v8214_v46 = vld [vmem:[#allocation68_spill] sm:$0xff]  ;;  %v4474_v47 = vld [vmem:[%s5271_s8 + $0x70] sm:$0xff] }
 0x398   : > { %v2426_v58 = vmul.f32 %v1785_v43, %v437_v21  ;;  %v2167_v43 = vcvt.s32.f32 %v4470_v27  ;;  %v8218_v27 = vld [vmem:[#allocation15_spill] sm:$0xff] }
 0x399   : > { %v6964_v4 = vpop.permute.xlu1 %2496  ;;  %v6966_v24 = vpop.permute.xlu0 %2561  ;;  %vm2247_vm2 = vcmp.eq.f32.partialorder %v6687_v56, %v2183_v63  ;;  %v3704_v56 = vsel %vm2232_vm3, 1.0, %v8137_v60  ;;  %v2137_v63 = vcvt.s32.f32 %v4474_v47 }
 0x39a   : > { %4062 = vperm.xlu0 %3929, %v4061_v32   ;;  %4017 = vperm.xlu1 %3930, %v4016_v62   ;;  %v2438_v32 = vmul.f32 %v1797_v57, %v449_v41  ;;  %v4071_v62 = vpack.i.bf16 %v3690_v23, %v3689_v33  ;;  %v4467_v57 = vld [vmem:[%s5271_s8 + $0x1e8] sm:$0xff]  ;;  %v3705_v41 = vsel %vm2233_vm15, 1.0, %v8137_v60  ;;  %v8213_v23 = vld [vmem:[#allocation148_spill] sm:$0xff]  ;;  %vm2231_vm4 = vcmp.eq.f32.partialorder %v8214_v46, %v2167_v43 }
 0x39b   : > { %v2184_v42 = vcvt.s32.f32 %v4467_v57  ;;  %v1799_v1 = vsub.f32 %v1223_v34, %v8213_v23  ;;  %v4086_v2 = vpack.i.bf16 %v3706_v18, %v3705_v41  ;;  %v4346_v17 = vpop.eup %4345  ;;  %v3703_v28 = vsel %vm2231_vm4, 1.0, %v8137_v60  ;;  %v8216_v18 = vld [vmem:[#allocation149_spill] sm:$0xff]  ;;  %v4472_v57 = vld [vmem:[%s5271_s8 + $0x1f0] sm:$0xff] }
 0x39c   : > { %v1161_v21 = vmul.f32 0.6931472, %v4346_v17  ;;  %v4066_v34 = vpack.i.bf16 %v3704_v56, %v3703_v28  ;;  %v8217_v17 = vld [vmem:[#allocation60_spill] sm:$0xff]  ;;  %vm2201_vm8 = vcmp.eq.f32.partialorder %v8218_v27, %v2137_v63 }
 0x39d   : > { %v6977_v44 = vpop.permute.xlu1 %2506  ;;  %v6979_v53 = vpop.permute.xlu0 %2571  ;;  %vm2248_vm1 = vcmp.eq.f32.partialorder %v6818_v0, %v2184_v42  ;;  %v2440_v16 = vmul.f32 %v1799_v1, %v451_v52  ;;  %v3719_v0 = vsel %vm2247_vm2, 1.0, %v8137_v60  ;;  %v2185_v42 = vcvt.s32.f32 %v4472_v57  ;;  %v4473_v1 = vld [vmem:[%s5271_s8 + $0x78] sm:$0xff] }
 0x39e   : > { %2756 = vperm.xlu0 %3929, %v2441_v3   ;;  %4027 = vperm.xlu1 %3930, %v4026_v9   ;;  %v3701_v9 = vsel %vm2229_vm14, 1.0, %v8137_v60  ;;  %v1225_v29 = vadd.f32 %v1161_v21, %v8215_v51  ;;  %v3673_v21 = vsel %vm2201_vm8, 1.0, %v8137_v60 }
 0x39f   : > { %v4046_v49 = vpack.i.bf16 %v3702_v19, %v3701_v9  ;;  %v453_v9 = vld [vmem:[%s6306_s11 + $0x1f8] sm:$0xff]  ;;  %vm2249_vm6 = vcmp.eq.f32.partialorder %v6717_v5, %v2185_v42 }
 0x3a0   : > { %v1801_v31 = vsub.f32 %v1225_v29, %v8216_v18  ;;  %v8219_v29 = vlaneseq }
 0x3a1   : > { %v6993_v15 = vpop.permute.xlu1 %2516  ;;  %v6995_v11 = vpop.permute.xlu0 %2581 }
 0x3a2   : > { %2741 = vperm.xlu1 %3930, %v2438_v32   ;;  %4072 = vperm.xlu0 %3929, %v4071_v62   ;;  %v3720_v32 = vsel %vm2248_vm1, 1.0, %v8137_v60 }
 0x3a3   : > { %v4056_v7 = vpack.i.bf16 %v3720_v32, %v3719_v0 }
 0x3a5   : > { %v7004_v3 = vpop.permute.xlu1 %2526  ;;  %v7006_v45 = vpop.permute.xlu0 %2591 }
 0x3a6   : > { %4037 = vperm.xlu1 %3930, %v4036_v12   ;;  %2681 = vperm.xlu0 %3929, %v2426_v58   ;;  %v4471_v12 = vld [vmem:[%s5271_s8 + $0x1f8] sm:$0xff]  ;;  %s4475_s8 = scalar_lea.vmem %s7549_s28, 256 }
 0x3a7   : > { %v2186_v19 = vcvt.s32.f32 %v4471_v12  ;;  %v7074_v12 = vshrl.u32 %v8219_v29, 7  ;;  %p4476_p12 = scmp.ne.s32.totalorder %s7549_s28, %s4475_s8  ;;  %p4483_p2 = scmp.lt.s32.totalorder %s4481_s10, %s4475_s8 }
 0x3a9   : > { %v7015_v59 = vpop.permute.xlu1 %2536  ;;  %v7017_v33 = vpop.permute.xlu0 %2601  ;;  %vm2250_vm5 = vcmp.eq.f32.partialorder %v6838_v10, %v2186_v19  ;;  %v3360_v19 = vsub.s32 3, %v7074_v12  ;;  %v3356_v57 = vsub.s32 2, %v7074_v12  ;;  %p4477_p13 = pnand %p4476_p12, %p4608_p5  ;;  %p4484_p3 = por %p4483_p2, %p4482_p1 }
 0x3aa   : > { %4047 = vperm.xlu1 %3930, %v4046_v49   ;;  %4087 = vperm.xlu0 %3929, %v4086_v2   ;;  %v2138_v49 = vcvt.s32.f32 %v4473_v1  ;;  %v2442_v2 = vmul.f32 %v1801_v31, %v453_v9  ;;  %v3722_v52 = vsel %vm2250_vm5, 1.0, %v8137_v60  ;;  %v454_v31 = vld [vmem:[%s259_s20] sm:$0xf]  ;;  %v3348_v9 = vsub.s32 0, %v7074_v12 }
 0x3ab   : > { %v7086_v42 = vrot.slane %v454_v31, %v3360_v19  ;;  %p4478_p0 = pneg %p4477_p13 }
 0x3ac   : > { %vm2202_vm7 = vcmp.eq.f32.partialorder %v8217_v17, %v2138_v49  ;;  %v7091_v49 = vrot.slane %v454_v31, %v3356_v57  ;;  %v7096_v47 = vrot.slane %v454_v31, %v3348_v9  ;;  %v7742_v17 = vmov 1.0  }
 0x3ad   : > { %v7024_v62 = vpop.permute.xlu1 %2546  ;;  %v7026_v38 = vpop.permute.xlu0 %2611  ;;  %v3674_v43 = vsel %vm2202_vm7, 1.0, %v8137_v60  ;;  %8220 = vst [vmem:[#allocation70_spill] sm:$0xff] %v7086_v42  ;;  %vm3365_vm9 = vcmp.eq.s32.totalorder %v7074_v12, %v7086_v42  ;;  %p4485_p4 = pnand %p4484_p3, %p4478_p0 }
 0x3ae   : > { %2751 = vperm.xlu1 %3930, %v2440_v16   ;;  %v3721_v16 = vsel %vm2249_vm6, 1.0, %v8137_v60  ;;  %v4081_v0 = vpack.i.bf16 %v3674_v43, %v3673_v21  ;;  %8223 = vst [vmem:[#allocation72_spill] sm:$0xff] %v7096_v47  ;;  %3735 = vmatprep.mubr.msk.f32.mxu1 %vm3365_vm9, %v7742_v17  ;;  %vm3364_vm12 = vcmp.eq.s32.totalorder %v7074_v12, %v7091_v49  ;;  %v7114_v43 = vadd.s32 8, %v7074_v12 }
 0x3af   : > { %v4076_v10 = vpack.i.bf16 %v3722_v52, %v3721_v16  ;;  %vm3362_vm13 = vcmp.eq.s32.totalorder %v7074_v12, %v7096_v47 }
 0x3b0   : > { %8224 = vst [vmem:[#allocation61_spill] sm:$0xff] %v7114_v43  ;;  %vm3369_vm15 = vcmp.eq.s32.totalorder %v7114_v43, %v7086_v42  ;;  %vm3368_vm2 = vcmp.eq.s32.totalorder %v7114_v43, %v7091_v49  ;;  %vm3366_vm3 = vcmp.eq.s32.totalorder %v7114_v43, %v7096_v47 }
 0x3b1   : > { %v7032_v22 = vpop.permute.xlu1 %2556  ;;  %v7034_v58 = vpop.permute.xlu0 %2621 }
 0x3b2   : > { %4057 = vperm.xlu1 %3930, %v4056_v7  }
 0x3b5   : > { %v7042_v41 = vpop.permute.xlu1 %2566  ;;  %v7044_v23 = vpop.permute.xlu0 %2631 }
 0x3b6   : > { %4067 = vperm.xlu1 %3930, %v4066_v34   ;;  %v3352_v34 = vsub.s32 1, %v7074_v12 }
 0x3b8   : > { %v7089_v1 = vrot.slane %v454_v31, %v3352_v34 }
 0x3b9   : > { %v7051_v61 = vpop.permute.xlu1 %2576  ;;  %v7053_v55 = vpop.permute.xlu0 %2641 }
 0x3ba   : > { %2761 = vperm.xlu1 %3930, %v2442_v2   ;;  %8221 = vst [vmem:[#allocation59_spill] sm:$0xff] %v7089_v1  ;;  %v8222_v2 = vld [vmem:[#allocation121_spill] sm:$0xff]  ;;  %vm3363_vm11 = vcmp.eq.s32.totalorder %v7074_v12, %v7089_v1  ;;  %vm3367_vm1 = vcmp.eq.s32.totalorder %v7114_v43, %v7089_v1 }
 0x3bb   : > { %vm3277_vm0 = vcmp.eq.s32.totalorder %v8222_v2, 2  ;;  %vm2828_vm10 = vcmp.eq.s32.totalorder %v8222_v2, 1  ;;  %3731 = vmatprep.mubr.msk.f32.mxu0 %vm3363_vm11, %v7742_v17  ;;  %vm2443_vm14 = vcmp.eq.s32.totalorder %v8222_v2, 0 }
 0x3bc   : > { %v2781_v21 = vsel %vm2443_vm14, %v6903_v36, 0.0 }
 0x3bd   : > { %v7059_v32 = vpop.permute.xlu1 %2586  ;;  %v7061_v5 = vpop.permute.xlu0 %2651 }
 0x3be   : > { %4077 = vperm.xlu1 %3930, %v4076_v10   ;;  %v7111_v10 = vsel %vm3277_vm0, 1.0, %v8137_v60 }
 0x3c1   : > { %v7064_v46 = vpop.permute.xlu1 %2596  ;;  %v7066_v7 = vpop.permute.xlu0 %2661 }
 0x3c2   : > { %4082 = vperm.xlu1 %3930, %v4081_v0   ;;  %v2780_v0 = vsel %vm2443_vm14, %v7004_v3, 0.0 }
 0x3c5   : > { %v7069_v56 = vpop.permute.xlu1 %2606  ;;  %v7071_v51 = vpop.permute.xlu0 %2671 }
 0x3c9   : > { %v7080_v28 = vpop.permute.xlu1 %2616  ;;  %v7082_v18 = vpop.permute.xlu0 %2686 }
 0x3cd   : > { %v7098_v63 = vpop.permute.xlu1 %2626  ;;  %v3933_v52 = vpop.permute.xlu0 %3932 }
 0x3ce   : > { %v3935_v16 = vunpack.i.h.bf16 %v3933_v52  ;;  %v3934_v27 = vunpack.i.l.bf16 %v3933_v52 }
 0x3d0   : > { %v3166_v29 = vsel %vm2828_vm10, %v3935_v16, 0.0  ;;  %v3165_v19 = vsel %vm2828_vm10, %v3934_v27, 0.0  ;;  %v2764_v16 = vsel %vm2443_vm14, %v6741_v8, 0.0  ;;  %v2765_v27 = vsel %vm2443_vm14, %v6862_v13, 0.0 }
 0x3d1   : > { %v7126_v31 = vpop.permute.xlu1 %2636  ;;  %v3943_v60 = vpop.permute.xlu0 %3942  ;;  %v3229_v34 = vadd.f32 %v3165_v19, %v2780_v0  ;;  %v3230_v57 = vadd.f32 %v3166_v29, %v2781_v21 }
 0x3d2   : > { %v3945_v36 = vunpack.i.h.bf16 %v3943_v60  ;;  %v3944_v9 = vunpack.i.l.bf16 %v3943_v60 }
 0x3d3   : > { %v3295_v3 = vadd.f32 %v7111_v10, %v3229_v34  ;;  %v3296_v52 = vadd.f32 %v7111_v10, %v3230_v57 }
 0x3d4   : > { %v3150_v21 = vsel %vm2828_vm10, %v3945_v36, 0.0  ;;  %v3149_v0 = vsel %vm2828_vm10, %v3944_v9, 0.0  ;;  %v2783_v9 = vsel %vm2443_vm14, %v6926_v54, 0.0 }
 0x3d5   : > { %v3214_v29 = vadd.f32 %v3150_v21, %v2765_v27  ;;  %v3213_v19 = vadd.f32 %v3149_v0, %v2764_v16  ;;  %v7148_v60 = vpop.permute.xlu1 %2646  ;;  %v7150_v34 = vpop.permute.xlu0 %2696  ;;  %v3821_v57 = vpack.c.bf16 %v3296_v52, %v3295_v3  ;;  %v2782_v3 = vsel %vm2443_vm14, %v7015_v59, 0.0 }
 0x3d6   : > { %v2767_v59 = vsel %vm2443_vm14, %v6758_v40, 0.0 }
 0x3d7   : > { %3822 = vmatprep.subr.bf16.mxu0 %v3821_v57  ;;  %v3279_v8 = vadd.f32 %v7111_v10, %v3213_v19  ;;  %v3280_v17 = vadd.f32 %v7111_v10, %v3214_v29  ;;  %v2766_v57 = vsel %vm2443_vm14, %v6880_v25, 0.0 }
 0x3d9   : > { %v7154_v1 = vpop.permute.xlu1 %2656  ;;  %v3953_v13 = vpop.permute.xlu0 %3952  ;;  %v3823_v47 = vpack.c.bf16 %v3280_v17, %v3279_v8 }
 0x3da   : > { %v3955_v36 = vunpack.i.h.bf16 %v3953_v13  ;;  %v3954_v42 = vunpack.i.l.bf16 %v3953_v13 }
 0x3db   : > { %3824 = vmatpush3.bf16.msra.mxu0 %v3823_v47 }
 0x3dc   : > { %v3168_v52 = vsel %vm2828_vm10, %v3955_v36, 0.0  ;;  %v3167_v16 = vsel %vm2828_vm10, %v3954_v42, 0.0 }
 0x3dd   : > { %v3232_v27 = vadd.f32 %v3168_v52, %v2783_v9  ;;  %v3231_v21 = vadd.f32 %v3167_v16, %v2782_v3  ;;  %v7166_v17 = vpop.permute.xlu1 %2666  ;;  %v3963_v0 = vpop.permute.xlu0 %3962 }
 0x3de   : > { %v3965_v47 = vunpack.i.h.bf16 %v3963_v0  ;;  %v3964_v29 = vunpack.i.l.bf16 %v3963_v0 }
 0x3df   : > { %v3297_v19 = vadd.f32 %v7111_v10, %v3231_v21  ;;  %v3298_v54 = vadd.f32 %v7111_v10, %v3232_v27 }
 0x3e0   : > { %v3152_v42 = vsel %vm2828_vm10, %v3965_v47, 0.0  ;;  %v3151_v8 = vsel %vm2828_vm10, %v3964_v29, 0.0  ;;  %v2785_v29 = vsel %vm2443_vm14, %v6948_v39, 0.0 }
 0x3e1   : > { %v3216_v13 = vadd.f32 %v3152_v42, %v2767_v59  ;;  %v3215_v36 = vadd.f32 %v3151_v8, %v2766_v57  ;;  %v7180_v9 = vpop.permute.xlu1 %2676  ;;  %v7182_v3 = vpop.permute.xlu0 %2706  ;;  %v3825_v52 = vpack.c.bf16 %v3298_v54, %v3297_v19  ;;  %v2784_v59 = vsel %vm2443_vm14, %v7024_v62, 0.0 }
 0x3e2   : > { %v2769_v57 = vsel %vm2443_vm14, %v6778_v20, 0.0  ;;  %v2768_v42 = vsel %vm2443_vm14, %v6901_v6, 0.0 }
 0x3e3   : > { %3826 = vmatprep.subr.bf16.mxu0 %v3825_v52  ;;  %v3281_v40 = vadd.f32 %v7111_v10, %v3215_v36  ;;  %v3282_v16 = vadd.f32 %v7111_v10, %v3216_v13 }
 0x3e5   : > { %v2692_v27 = vpop.permute.xlu1 %2691  ;;  %v3973_v25 = vpop.permute.xlu0 %3972  ;;  %v3827_v21 = vpack.c.bf16 %v3282_v16, %v3281_v40 }
 0x3e6   : > { %v3975_v0 = vunpack.i.h.bf16 %v3973_v25  ;;  %v3974_v47 = vunpack.i.l.bf16 %v3973_v25  ;;  %v2812_v25 = vsel %vm2443_vm14, %v7082_v18, 0.0 }
 0x3e7   : > { %3828 = vmatpush3.bf16.msra.mxu0 %v3827_v21  ;;  %v2813_v21 = vsel %vm2443_vm14, %v2692_v27, 0.0 }
 0x3e8   : > { %v3170_v19 = vsel %vm2828_vm10, %v3975_v0, 0.0  ;;  %v3169_v54 = vsel %vm2828_vm10, %v3974_v47, 0.0 }
 0x3e9   : > { %v3234_v8 = vadd.f32 %v3170_v19, %v2785_v29  ;;  %v3233_v39 = vadd.f32 %v3169_v54, %v2784_v59  ;;  %v3938_v13 = vpop.permute.xlu1 %3937  ;;  %v3983_v36 = vpop.permute.xlu0 %3982 }
 0x3ea   : > { %v3940_v52 = vunpack.i.h.bf16 %v3938_v13  ;;  %v3939_v62 = vunpack.i.l.bf16 %v3938_v13  ;;  %v3985_v40 = vunpack.i.h.bf16 %v3983_v36  ;;  %v3984_v16 = vunpack.i.l.bf16 %v3983_v36 }
 0x3eb   : > { %v3299_v20 = vadd.f32 %v7111_v10, %v3233_v39  ;;  %v3300_v0 = vadd.f32 %v7111_v10, %v3234_v8 }
 0x3ec   : > { %v3198_v6 = vsel %vm2828_vm10, %v3940_v52, 0.0  ;;  %v3197_v47 = vsel %vm2828_vm10, %v3939_v62, 0.0  ;;  %v3154_v29 = vsel %vm2828_vm10, %v3985_v40, 0.0  ;;  %v3153_v59 = vsel %vm2828_vm10, %v3984_v16, 0.0 }
 0x3ed   : > { %v3218_v18 = vadd.f32 %v3154_v29, %v2769_v57  ;;  %v3217_v19 = vadd.f32 %v3153_v59, %v2768_v42  ;;  %v3948_v54 = vpop.permute.xlu1 %3947  ;;  %v7217_v27 = vpop.permute.xlu0 %2716  ;;  %v3829_v39 = vpack.c.bf16 %v3300_v0, %v3299_v20  ;;  %v3261_v13 = vadd.f32 %v3197_v47, %v2812_v25 }
 0x3ee   : > { %v3950_v8 = vunpack.i.h.bf16 %v3948_v54  ;;  %v3949_v36 = vunpack.i.l.bf16 %v3948_v54  ;;  %v3262_v43 = vadd.f32 %v3198_v6, %v2813_v21  ;;  %v2797_v52 = vsel %vm2443_vm14, %v7026_v38, 0.0 }
 0x3ef   : > { %3830 = vmatprep.subr.bf16.mxu0 %v3829_v39  ;;  %v3283_v62 = vadd.f32 %v7111_v10, %v3217_v19  ;;  %v3284_v40 = vadd.f32 %v7111_v10, %v3218_v18  ;;  %v3327_v57 = vadd.f32 %v7111_v10, %v3261_v13  ;;  %v2796_v42 = vsel %vm2443_vm14, %v7069_v56, 0.0 }
 0x3f0   : > { %v3182_v16 = vsel %vm2828_vm10, %v3950_v8, 0.0  ;;  %v3181_v25 = vsel %vm2828_vm10, %v3949_v36, 0.0  ;;  %v3328_v21 = vadd.f32 %v7111_v10, %v3262_v43  ;;  %v2771_v56 = vsel %vm2443_vm14, %v6802_v14, 0.0 }
 0x3f1   : > { %v3245_v38 = vadd.f32 %v3181_v25, %v2796_v42  ;;  %v3246_v20 = vadd.f32 %v3182_v16, %v2797_v52  ;;  %v2702_v0 = vpop.permute.xlu1 %2701  ;;  %v3993_v6 = vpop.permute.xlu0 %3992  ;;  %v3831_v47 = vpack.c.bf16 %v3284_v40, %v3283_v62  ;;  %v2787_v43 = vsel %vm2443_vm14, %v6966_v24, 0.0 }
 0x3f2   : > { %v3995_v29 = vunpack.i.h.bf16 %v3993_v6  ;;  %v3994_v59 = vunpack.i.l.bf16 %v3993_v6  ;;  %v3853_v18 = vpack.c.bf16 %v3328_v21, %v3327_v57  ;;  %v2786_v39 = vsel %vm2443_vm14, %v7032_v22, 0.0 }
 0x3f3   : > { %3832 = vmatpush3.bf16.msra.mxu0 %v3831_v47  ;;  %v3311_v19 = vadd.f32 %v7111_v10, %v3245_v38  ;;  %v3312_v54 = vadd.f32 %v7111_v10, %v3246_v20  ;;  %v2770_v14 = vsel %vm2443_vm14, %v6924_v26, 0.0  ;;  %v2814_v25 = vsel %vm2443_vm14, %v7150_v34, 0.0 }
 0x3f4   : > { %v3172_v13 = vsel %vm2828_vm10, %v3995_v29, 0.0  ;;  %v3171_v8 = vsel %vm2828_vm10, %v3994_v59, 0.0  ;;  %3854 = vmatprep.subr.bf16.mxu1 %v3853_v18  ;;  %v2815_v21 = vsel %vm2443_vm14, %v2702_v0, 0.0 }
 0x3f5   : > { %v3236_v36 = vadd.f32 %v3172_v13, %v2787_v43  ;;  %v3235_v52 = vadd.f32 %v3171_v8, %v2786_v39  ;;  %v3958_v62 = vpop.permute.xlu1 %3957  ;;  %v4003_v40 = vpop.permute.xlu0 %4002  ;;  %v3855_v24 = vpack.c.bf16 %v3312_v54, %v3311_v19 }
 0x3f6   : > { %v3960_v57 = vunpack.i.h.bf16 %v3958_v62  ;;  %v3959_v42 = vunpack.i.l.bf16 %v3958_v62  ;;  %v4005_v16 = vunpack.i.h.bf16 %v4003_v40  ;;  %v4004_v22 = vunpack.i.l.bf16 %v4003_v40 }
 0x3f7   : > { %3856 = vmatpush3.bf16.msra.mxu1 %v3855_v24  ;;  %v3301_v38 = vadd.f32 %v7111_v10, %v3235_v52  ;;  %v3302_v26 = vadd.f32 %v7111_v10, %v3236_v36  ;;  %v2799_v40 = vsel %vm2443_vm14, %v7034_v58, 0.0  ;;  %v2773_v58 = vsel %vm2443_vm14, %v6820_v37, 0.0 }
 0x3f8   : > { %v3200_v20 = vsel %vm2828_vm10, %v3960_v57, 0.0  ;;  %v3199_v6 = vsel %vm2828_vm10, %v3959_v42, 0.0  ;;  %v3156_v47 = vsel %vm2828_vm10, %v4005_v16, 0.0  ;;  %v3155_v34 = vsel %vm2828_vm10, %v4004_v22, 0.0 }
 0x3f9   : > { %v3264_v29 = vadd.f32 %v3200_v20, %v2815_v21  ;;  %v3263_v59 = vadd.f32 %v3199_v6, %v2814_v25  ;;  %v3220_v0 = vadd.f32 %v3156_v47, %v2771_v56  ;;  %v3219_v18 = vadd.f32 %v3155_v34, %v2770_v14  ;;  %v3968_v19 = vpop.permute.xlu1 %3967  ;;  %v7266_v54 = vpop.permute.xlu0 %2726 }
 0x3fa   : > { %v3970_v43 = vunpack.i.h.bf16 %v3968_v19  ;;  %v3969_v39 = vunpack.i.l.bf16 %v3968_v19  ;;  %v3833_v13 = vpack.c.bf16 %v3302_v26, %v3301_v38  ;;  %v2798_v56 = vsel %vm2443_vm14, %v7080_v28, 0.0 }
 0x3fb   : > { %v3285_v8 = vadd.f32 %v7111_v10, %v3219_v18  ;;  %v3286_v36 = vadd.f32 %v7111_v10, %v3220_v0  ;;  %v3329_v52 = vadd.f32 %v7111_v10, %v3263_v59  ;;  %v3330_v62 = vadd.f32 %v7111_v10, %v3264_v29 }
 0x3fc   : > { %v3184_v14 = vsel %vm2828_vm10, %v3970_v43, 0.0  ;;  %v3183_v24 = vsel %vm2828_vm10, %v3969_v39, 0.0  ;;  %3834 = vmatprep.subr.bf16.mxu0 %v3833_v13  ;;  %v2789_v6 = vsel %vm2443_vm14, %v6979_v53, 0.0  ;;  %v2788_v47 = vsel %vm2443_vm14, %v7042_v41, 0.0 }
 0x3fd   : > { %v3247_v57 = vadd.f32 %v3183_v24, %v2798_v56  ;;  %v3248_v42 = vadd.f32 %v3184_v14, %v2799_v40  ;;  %v2712_v16 = vpop.permute.xlu1 %2711  ;;  %v4013_v22 = vpop.permute.xlu0 %4012  ;;  %v3835_v25 = vpack.c.bf16 %v3286_v36, %v3285_v8  ;;  %v3857_v21 = vpack.c.bf16 %v3330_v62, %v3329_v52 }
 0x3fe   : > { %v4015_v38 = vunpack.i.h.bf16 %v4013_v22  ;;  %v4014_v26 = vunpack.i.l.bf16 %v4013_v22  ;;  %v2772_v29 = vsel %vm2443_vm14, %v6946_v30, 0.0  ;;  %v2816_v41 = vsel %vm2443_vm14, %v7182_v3, 0.0 }
 0x3ff   : > { %3836 = vmatpush3.bf16.msra.mxu0 %v3835_v25  ;;  %3858 = vmatprep.subr.bf16.mxu1 %v3857_v21  ;;  %v3313_v28 = vadd.f32 %v7111_v10, %v3247_v57  ;;  %v3314_v20 = vadd.f32 %v7111_v10, %v3248_v42  ;;  %v2817_v36 = vsel %vm2443_vm14, %v2712_v16, 0.0 }
 0x400   : > { %v3174_v34 = vsel %vm2828_vm10, %v4015_v38, 0.0  ;;  %v3173_v37 = vsel %vm2828_vm10, %v4014_v26, 0.0 }
 0x401   : > { %v3238_v59 = vadd.f32 %v3174_v34, %v2789_v6  ;;  %v3237_v0 = vadd.f32 %v3173_v37, %v2788_v47  ;;  %v3978_v18 = vpop.permute.xlu1 %3977  ;;  %v4023_v19 = vpop.permute.xlu0 %4022  ;;  %v3859_v43 = vpack.c.bf16 %v3314_v20, %v3313_v28  ;;  %v2801_v47 = vsel %vm2443_vm14, %v7044_v23, 0.0 }
 0x402   : > { %v3980_v53 = vunpack.i.h.bf16 %v3978_v18  ;;  %v3979_v39 = vunpack.i.l.bf16 %v3978_v18  ;;  %v4025_v13 = vunpack.i.h.bf16 %v4023_v19  ;;  %v4024_v8 = vunpack.i.l.bf16 %v4023_v19 }
 0x403   : > { %3860 = vmatpush3.bf16.msra.mxu1 %v3859_v43  ;;  %v3303_v52 = vadd.f32 %v7111_v10, %v3237_v0  ;;  %v3304_v30 = vadd.f32 %v7111_v10, %v3238_v59  ;;  %v2775_v23 = vsel %vm2443_vm14, %v6840_v35, 0.0 }
 0x404   : > { %v3202_v62 = vsel %vm2828_vm10, %v3980_v53, 0.0  ;;  %v3201_v40 = vsel %vm2828_vm10, %v3979_v39, 0.0  ;;  %v3158_v56 = vsel %vm2828_vm10, %v4025_v13, 0.0  ;;  %v3157_v3 = vsel %vm2828_vm10, %v4024_v8, 0.0 }
 0x405   : > { %v3266_v14 = vadd.f32 %v3202_v62, %v2817_v36  ;;  %v3265_v24 = vadd.f32 %v3201_v40, %v2816_v41  ;;  %v3222_v57 = vadd.f32 %v3158_v56, %v2773_v58  ;;  %v3221_v42 = vadd.f32 %v3157_v3, %v2772_v29  ;;  %v3988_v16 = vpop.permute.xlu1 %3987  ;;  %v7315_v22 = vpop.permute.xlu0 %2736 }
 0x406   : > { %v3990_v25 = vunpack.i.h.bf16 %v3988_v16  ;;  %v3989_v21 = vunpack.i.l.bf16 %v3988_v16  ;;  %v3837_v38 = vpack.c.bf16 %v3304_v30, %v3303_v52  ;;  %v2800_v58 = vsel %vm2443_vm14, %v7098_v63, 0.0 }
 0x407   : > { %v3287_v26 = vadd.f32 %v7111_v10, %v3221_v42  ;;  %v3288_v28 = vadd.f32 %v7111_v10, %v3222_v57  ;;  %v3331_v20 = vadd.f32 %v7111_v10, %v3265_v24  ;;  %v3332_v6 = vadd.f32 %v7111_v10, %v3266_v14 }
 0x408   : > { %v3186_v34 = vsel %vm2828_vm10, %v3990_v25, 0.0  ;;  %v3185_v37 = vsel %vm2828_vm10, %v3989_v21, 0.0  ;;  %3838 = vmatprep.subr.bf16.mxu0 %v3837_v38  ;;  %v2791_v8 = vsel %vm2443_vm14, %v6995_v11, 0.0  ;;  %v2790_v41 = vsel %vm2443_vm14, %v7051_v61, 0.0 }
 0x409   : > { %v3249_v29 = vadd.f32 %v3185_v37, %v2800_v58  ;;  %v3250_v59 = vadd.f32 %v3186_v34, %v2801_v47  ;;  %v2722_v0 = vpop.permute.xlu1 %2721  ;;  %v4033_v18 = vpop.permute.xlu0 %4032  ;;  %v3839_v19 = vpack.c.bf16 %v3288_v28, %v3287_v26  ;;  %v3861_v43 = vpack.c.bf16 %v3332_v6, %v3331_v20 }
 0x40a   : > { %v4035_v53 = vunpack.i.h.bf16 %v4033_v18  ;;  %v4034_v39 = vunpack.i.l.bf16 %v4033_v18  ;;  %v2774_v52 = vsel %vm2443_vm14, %v6964_v4, 0.0  ;;  %v2818_v61 = vsel %vm2443_vm14, %v7217_v27, 0.0 }
 0x40b   : > { %3840 = vmatpush3.bf16.msra.mxu0 %v3839_v19  ;;  %3862 = vmatprep.subr.bf16.mxu1 %v3861_v43  ;;  %v3315_v63 = vadd.f32 %v7111_v10, %v3249_v29  ;;  %v3316_v13 = vadd.f32 %v7111_v10, %v3250_v59  ;;  %v2819_v42 = vsel %vm2443_vm14, %v2722_v0, 0.0  ;;  %v2803_v43 = vsel %vm2443_vm14, %v7053_v55, 0.0 }
 0x40c   : > { %v3176_v36 = vsel %vm2828_vm10, %v4035_v53, 0.0  ;;  %v3175_v35 = vsel %vm2828_vm10, %v4034_v39, 0.0  ;;  %v2802_v53 = vsel %vm2443_vm14, %v7126_v31, 0.0  ;;  %v2777_v55 = vsel %vm2443_vm14, %v6864_v50, 0.0 }
 0x40d   : > { %v3240_v30 = vadd.f32 %v3176_v36, %v2791_v8  ;;  %v3239_v62 = vadd.f32 %v3175_v35, %v2790_v41  ;;  %v3998_v40 = vpop.permute.xlu1 %3997  ;;  %v4043_v56 = vpop.permute.xlu0 %4042  ;;  %v3863_v3 = vpack.c.bf16 %v3316_v13, %v3315_v63 }
 0x40e   : > { %v4000_v11 = vunpack.i.h.bf16 %v3998_v40  ;;  %v3999_v14 = vunpack.i.l.bf16 %v3998_v40  ;;  %v4045_v24 = vunpack.i.h.bf16 %v4043_v56  ;;  %v4044_v57 = vunpack.i.l.bf16 %v4043_v56 }
 0x40f   : > { %3864 = vmatpush3.bf16.msra.mxu1 %v3863_v3  ;;  %v3305_v16 = vadd.f32 %v7111_v10, %v3239_v62  ;;  %v3306_v4 = vadd.f32 %v7111_v10, %v3240_v30  ;;  %v2793_v40 = vsel %vm2443_vm14, %v7006_v45, 0.0  ;;  %v2792_v56 = vsel %vm2443_vm14, %v7059_v32, 0.0 }
 0x410   : > { %v3204_v25 = vsel %vm2828_vm10, %v4000_v11, 0.0  ;;  %v3203_v21 = vsel %vm2828_vm10, %v3999_v14, 0.0  ;;  %v3160_v38 = vsel %vm2828_vm10, %v4045_v24, 0.0  ;;  %v3159_v27 = vsel %vm2828_vm10, %v4044_v57, 0.0 }
 0x411   : > { %v3268_v26 = vadd.f32 %v3204_v25, %v2819_v42  ;;  %v3267_v28 = vadd.f32 %v3203_v21, %v2818_v61  ;;  %v3224_v20 = vadd.f32 %v3160_v38, %v2775_v23  ;;  %v3223_v6 = vadd.f32 %v3159_v27, %v2774_v52  ;;  %v4008_v47 = vpop.permute.xlu1 %4007  ;;  %v7364_v58 = vpop.permute.xlu0 %2746 }
 0x412   : > { %v4010_v34 = vunpack.i.h.bf16 %v4008_v47  ;;  %v4009_v37 = vunpack.i.l.bf16 %v4008_v47  ;;  %v3841_v29 = vpack.c.bf16 %v3306_v4, %v3305_v16  ;;  %v2776_v11 = vsel %vm2443_vm14, %v6977_v44, 0.0 }
 0x413   : > { %v3289_v59 = vadd.f32 %v7111_v10, %v3223_v6  ;;  %v3290_v0 = vadd.f32 %v7111_v10, %v3224_v20  ;;  %v3333_v18 = vadd.f32 %v7111_v10, %v3267_v28  ;;  %v3334_v19 = vadd.f32 %v7111_v10, %v3268_v26 }
 0x414   : > { %v3188_v39 = vsel %vm2828_vm10, %v4010_v34, 0.0  ;;  %v3187_v23 = vsel %vm2828_vm10, %v4009_v37, 0.0  ;;  %3842 = vmatprep.subr.bf16.mxu0 %v3841_v29  ;;  %v2820_v32 = vsel %vm2443_vm14, %v7266_v54, 0.0 }
 0x415   : > { %v3251_v63 = vadd.f32 %v3187_v23, %v2802_v53  ;;  %v3252_v13 = vadd.f32 %v3188_v39, %v2803_v43  ;;  %v2732_v8 = vpop.permute.xlu1 %2731  ;;  %v4053_v41 = vpop.permute.xlu0 %4052  ;;  %v3843_v36 = vpack.c.bf16 %v3290_v0, %v3289_v59  ;;  %v3865_v35 = vpack.c.bf16 %v3334_v19, %v3333_v18 }
 0x416   : > { %v4055_v52 = vunpack.i.h.bf16 %v4053_v41  ;;  %v4054_v30 = vunpack.i.l.bf16 %v4053_v41  ;;  %v2821_v21 = vsel %vm2443_vm14, %v2732_v8, 0.0  ;;  %v2805_v23 = vsel %vm2443_vm14, %v7061_v5, 0.0 }
 0x417   : > { %3844 = vmatpush3.bf16.msra.mxu0 %v3843_v36  ;;  %3866 = vmatprep.subr.bf16.mxu1 %v3865_v35  ;;  %v3317_v31 = vadd.f32 %v7111_v10, %v3251_v63  ;;  %v3318_v62 = vadd.f32 %v7111_v10, %v3252_v13  ;;  %v2804_v63 = vsel %vm2443_vm14, %v7148_v60, 0.0 }
 0x418   : > { %v3178_v3 = vsel %vm2828_vm10, %v4055_v52, 0.0  ;;  %v3177_v50 = vsel %vm2828_vm10, %v4054_v30, 0.0 }
 0x419   : > { %v3242_v14 = vadd.f32 %v3178_v3, %v2793_v40  ;;  %v3241_v24 = vadd.f32 %v3177_v50, %v2792_v56  ;;  %v4018_v57 = vpop.permute.xlu1 %4017  ;;  %v4063_v61 = vpop.permute.xlu0 %4062  ;;  %v3867_v42 = vpack.c.bf16 %v3318_v62, %v3317_v31  ;;  %v2795_v40 = vsel %vm2443_vm14, %v7017_v33, 0.0 }
 0x41a   : > { %v4020_v45 = vunpack.i.h.bf16 %v4018_v57  ;;  %v4019_v16 = vunpack.i.l.bf16 %v4018_v57  ;;  %v4065_v4 = vunpack.i.h.bf16 %v4063_v61  ;;  %v4064_v25 = vunpack.i.l.bf16 %v4063_v61 }
 0x41b   : > { %3868 = vmatpush3.bf16.msra.mxu1 %v3867_v42  ;;  %v3307_v38 = vadd.f32 %v7111_v10, %v3241_v24  ;;  %v3308_v44 = vadd.f32 %v7111_v10, %v3242_v14  ;;  %v2794_v56 = vsel %vm2443_vm14, %v7064_v46, 0.0  ;;  %v2822_v46 = vsel %vm2443_vm14, %v7315_v22, 0.0 }
 0x41c   : > { %v3206_v27 = vsel %vm2828_vm10, %v4020_v45, 0.0  ;;  %v3205_v26 = vsel %vm2828_vm10, %v4019_v16, 0.0  ;;  %v3162_v28 = vsel %vm2828_vm10, %v4065_v4, 0.0  ;;  %v3161_v54 = vsel %vm2828_vm10, %v4064_v25, 0.0 }
 0x41d   : > { %v3270_v20 = vadd.f32 %v3206_v27, %v2821_v21  ;;  %v3269_v6 = vadd.f32 %v3205_v26, %v2820_v32  ;;  %v3226_v47 = vadd.f32 %v3162_v28, %v2777_v55  ;;  %v3225_v34 = vadd.f32 %v3161_v54, %v2776_v11  ;;  %v4028_v37 = vpop.permute.xlu1 %4027  ;;  %v7413_v29 = vpop.permute.xlu0 %2756 }
 0x41e   : > { %v4030_v59 = vunpack.i.h.bf16 %v4028_v37  ;;  %v4029_v0 = vunpack.i.l.bf16 %v4028_v37  ;;  %v3845_v18 = vpack.c.bf16 %v3308_v44, %v3307_v38  ;;  %v2807_v54 = vsel %vm2443_vm14, %v7066_v7, 0.0 }
 0x41f   : > { %v3291_v19 = vadd.f32 %v7111_v10, %v3225_v34  ;;  %v3292_v43 = vadd.f32 %v7111_v10, %v3226_v47  ;;  %v3335_v53 = vadd.f32 %v7111_v10, %v3269_v6  ;;  %v3336_v39 = vadd.f32 %v7111_v10, %v3270_v20 }
 0x420   : > { %v3190_v13 = vsel %vm2828_vm10, %v4030_v59, 0.0  ;;  %v3189_v8 = vsel %vm2828_vm10, %v4029_v0, 0.0  ;;  %3846 = vmatprep.subr.bf16.mxu0 %v3845_v18  ;;  %v2806_v20 = vsel %vm2443_vm14, %v7154_v1, 0.0 }
 0x421   : > { %v3253_v41 = vadd.f32 %v3189_v8, %v2804_v63  ;;  %v3254_v36 = vadd.f32 %v3190_v13, %v2805_v23  ;;  %v2742_v35 = vpop.permute.xlu1 %2741  ;;  %v4073_v52 = vpop.permute.xlu0 %4072  ;;  %v3847_v30 = vpack.c.bf16 %v3292_v43, %v3291_v19  ;;  %v3869_v55 = vpack.c.bf16 %v3336_v39, %v3335_v53 }
 0x422   : > { %v4075_v31 = vunpack.i.h.bf16 %v4073_v52  ;;  %v4074_v62 = vunpack.i.l.bf16 %v4073_v52  ;;  %v2823_v16 = vsel %vm2443_vm14, %v2742_v35, 0.0  ;;  %v2824_v23 = vsel %vm2443_vm14, %v7364_v58, 0.0 }
 0x423   : > { %3848 = vmatpush3.bf16.msra.mxu0 %v3847_v30  ;;  %3870 = vmatprep.subr.bf16.mxu1 %v3869_v55  ;;  %v3319_v5 = vadd.f32 %v7111_v10, %v3253_v41  ;;  %v3320_v60 = vadd.f32 %v7111_v10, %v3254_v36 }
 0x424   : > { %v3180_v3 = vsel %vm2828_vm10, %v4075_v31, 0.0  ;;  %v3179_v50 = vsel %vm2828_vm10, %v4074_v62, 0.0 }
 0x425   : > { %v3244_v11 = vadd.f32 %v3180_v3, %v2795_v40  ;;  %v3243_v14 = vadd.f32 %v3179_v50, %v2794_v56  ;;  %v4038_v24 = vpop.permute.xlu1 %4037  ;;  %v3871_v57 = vpack.c.bf16 %v3320_v60, %v3319_v5  ;;  %v2682_v0 = vpop.permute.xlu0 %2681  ;;  %v2809_v60 = vsel %vm2443_vm14, %v7071_v51, 0.0 }
 0x426   : > { %v4040_v61 = vunpack.i.h.bf16 %v4038_v24  ;;  %v4039_v42 = vunpack.i.l.bf16 %v4038_v24  ;;  %v2808_v40 = vsel %vm2443_vm14, %v7166_v17, 0.0 }
 0x427   : > { %3872 = vmatpush3.bf16.msra.mxu1 %v3871_v57  ;;  %v3309_v45 = vadd.f32 %v7111_v10, %v3243_v14  ;;  %v3310_v33 = vadd.f32 %v7111_v10, %v3244_v11 }
 0x428   : > { %v3208_v4 = vsel %vm2828_vm10, %v4040_v61, 0.0  ;;  %v3207_v25 = vsel %vm2828_vm10, %v4039_v42, 0.0  ;;  %v2810_v42 = vsel %vm2443_vm14, %v7180_v9, 0.0 }
 0x429   : > { %v3272_v32 = vadd.f32 %v3208_v4, %v2823_v16  ;;  %v3271_v21 = vadd.f32 %v3207_v25, %v2822_v46  ;;  %v4048_v38 = vpop.permute.xlu1 %4047  ;;  %v3849_v44 = vpack.c.bf16 %v3310_v33, %v3309_v45  ;;  %v4088_v63 = vpop.permute.xlu0 %4087  ;;  %v2811_v45 = vsel %vm2443_vm14, %v2682_v0, 0.0 }
 0x42a   : > { %v4050_v27 = vunpack.i.h.bf16 %v4048_v38  ;;  %v4049_v26 = vunpack.i.l.bf16 %v4048_v38  ;;  %v4090_v31 = vunpack.i.h.bf16 %v4088_v63  ;;  %v4089_v62 = vunpack.i.l.bf16 %v4088_v63 }
 0x42b   : > { %3850 = vmatprep.subr.bf16.mxu0 %v3849_v44  ;;  %v3337_v28 = vadd.f32 %v7111_v10, %v3271_v21  ;;  %v3338_v22 = vadd.f32 %v7111_v10, %v3272_v32  ;;  %v2826_v21 = vsel %vm2443_vm14, %v7413_v29, 0.0 }
 0x42c   : > { %v3192_v6 = vsel %vm2828_vm10, %v4050_v27, 0.0  ;;  %v3191_v47 = vsel %vm2828_vm10, %v4049_v26, 0.0  ;;  %v3196_v57 = vsel %vm2828_vm10, %v4090_v31, 0.0  ;;  %v3195_v51 = vsel %vm2828_vm10, %v4089_v62, 0.0 }
 0x42d   : > { %v3255_v34 = vadd.f32 %v3191_v47, %v2806_v20  ;;  %v3256_v37 = vadd.f32 %v3192_v6, %v2807_v54  ;;  %v2752_v59 = vpop.permute.xlu1 %2751  ;;  %v3873_v18 = vpack.c.bf16 %v3338_v22, %v3337_v28  ;;  %v3260_v16 = vadd.f32 %v3196_v57, %v2811_v45 }
 0x42e   : > { %v2825_v13 = vsel %vm2443_vm14, %v2752_v59, 0.0  ;;  %v3259_v4 = vadd.f32 %v3195_v51, %v2810_v42 }
 0x42f   : > { %v3321_v19 = vadd.f32 %v7111_v10, %v3255_v34  ;;  %v3322_v43 = vadd.f32 %v7111_v10, %v3256_v37  ;;  %3874 = vmatprep.subr.bf16.mxu1 %v3873_v18  ;;  %v3326_v22 = vadd.f32 %v7111_v10, %v3260_v16  ;;  %v2779_v34 = vsel %vm2443_vm14, %v6882_v48, 0.0 }
 0x430   : > { %v3325_v54 = vadd.f32 %v7111_v10, %v3259_v4  ;;  %v2778_v37 = vsel %vm2443_vm14, %v6993_v15, 0.0  ;;  %v8225_v15 = vmov 1.0  }
 0x431   : > { %v4058_v7 = vpop.permute.xlu1 %4057  ;;  %v3875_v53 = vpack.c.bf16 %v3322_v43, %v3321_v19 }
 0x432   : > { %v4060_v39 = vunpack.i.h.bf16 %v4058_v7  ;;  %v4059_v1 = vunpack.i.l.bf16 %v4058_v7  ;;  %v3883_v7 = vpack.c.bf16 %v3326_v22, %v3325_v54 }
 0x433   : > { %3876 = vmatpush3.bf16.msra.mxu1 %v3875_v53 }
 0x434   : > { %v3210_v8 = vsel %vm2828_vm10, %v4060_v39, 0.0  ;;  %v3209_v41 = vsel %vm2828_vm10, %v4059_v1, 0.0 }
 0x435   : > { %v3274_v36 = vadd.f32 %v3210_v8, %v2825_v13  ;;  %v3273_v35 = vadd.f32 %v3209_v41, %v2824_v23  ;;  %v4068_v52 = vpop.permute.xlu1 %4067 }
 0x436   : > { %v4070_v30 = vunpack.i.h.bf16 %v4068_v52  ;;  %v4069_v55 = vunpack.i.l.bf16 %v4068_v52 }
 0x437   : > { %v3339_v5 = vadd.f32 %v7111_v10, %v3273_v35  ;;  %v3340_v58 = vadd.f32 %v7111_v10, %v3274_v36 }
 0x438   : > { %v3194_v56 = vsel %vm2828_vm10, %v4070_v30, 0.0  ;;  %v3193_v3 = vsel %vm2828_vm10, %v4069_v55, 0.0 }
 0x439   : > { %v3257_v50 = vadd.f32 %v3193_v3, %v2808_v40  ;;  %v3258_v11 = vadd.f32 %v3194_v56, %v2809_v60  ;;  %v2762_v14 = vpop.permute.xlu1 %2761  ;;  %v3877_v24 = vpack.c.bf16 %v3340_v58, %v3339_v5 }
 0x43a   : > { %v2827_v38 = vsel %vm2443_vm14, %v2762_v14, 0.0 }
 0x43b   : > { %3878 = vmatprep.subr.bf16.mxu1 %v3877_v24  ;;  %v3323_v61 = vadd.f32 %v7111_v10, %v3257_v50  ;;  %v3324_v17 = vadd.f32 %v7111_v10, %v3258_v11 }
 0x43d   : > { %v4078_v33 = vpop.permute.xlu1 %4077  ;;  %v3879_v46 = vpack.c.bf16 %v3324_v17, %v3323_v61 }
 0x43e   : > { %v4080_v25 = vunpack.i.h.bf16 %v4078_v33  ;;  %v4079_v32 = vunpack.i.l.bf16 %v4078_v33 }
 0x43f   : > { %3880 = vmatpush3.bf16.msra.mxu1 %v3879_v46 }
 0x440   : > { %v3212_v9 = vsel %vm2828_vm10, %v4080_v25, 0.0  ;;  %v3211_v44 = vsel %vm2828_vm10, %v4079_v32, 0.0 }
 0x441   : > { %v3276_v27 = vadd.f32 %v3212_v9, %v2827_v38  ;;  %v3275_v26 = vadd.f32 %v3211_v44, %v2826_v21  ;;  %v4083_v28 = vpop.permute.xlu1 %4082 }
 0x442   : > { %v4085_v20 = vunpack.i.h.bf16 %v4083_v28  ;;  %v4084_v6 = vunpack.i.l.bf16 %v4083_v28 }
 0x443   : > { %v3341_v29 = vadd.f32 %v7111_v10, %v3275_v26  ;;  %v3342_v47 = vadd.f32 %v7111_v10, %v3276_v27 }
 0x444   : > { %v3164_v59 = vsel %vm2828_vm10, %v4085_v20, 0.0  ;;  %v3163_v0 = vsel %vm2828_vm10, %v4084_v6, 0.0 }
 0x445   : > { %v3227_v18 = vadd.f32 %v3163_v0, %v2778_v37  ;;  %v3228_v19 = vadd.f32 %v3164_v59, %v2779_v34  ;;  %v3881_v43 = vpack.c.bf16 %v3342_v47, %v3341_v29 }
 0x447   : > { %v3293_v53 = vadd.f32 %v7111_v10, %v3227_v18  ;;  %v3294_v39 = vadd.f32 %v7111_v10, %v3228_v19  ;;  %3882 = vmatprep.subr.bf16.mxu1 %v3881_v43 }
 0x448   : > { %3884 = vmatpush3.bf16.msra.mxu1 %v3883_v7 }
 0x449   : > { %v3851_v48 = vpack.c.bf16 %v3294_v39, %v3293_v53 }
 0x44b   : > { %3852 = vmatpush3.bf16.msra.mxu0 %v3851_v48  ;;  %3736 = vmatmul.mubr.msk.f32.vlgmr.msra.gmra.mrb[0].mxu1 %vm3364_vm12, %v8225_v15 }
 0x44c   : > { %3737 = vmatprep.mubr.msk.f32.mxu1 %vm3369_vm15, %v8225_v15 }
 0x44e   : > { %3732 = vmatmul.mubr.msk.f32.vlgmr.msra.gmra.mrb[0].mxu0 %vm3362_vm13, %v8225_v15 }
 0x44f   : > { %3733 = vmatprep.mubr.msk.f32.mxu0 %vm3367_vm1, %v8225_v15  ;;  %3738 = vmatmul.mubr.msk.f32.gmra.mrb[2].mxu1 %vm3368_vm2, %v8225_v15 }
 0x452   : > { %3734 = vmatmul.mubr.msk.f32.gmra.mrb[2].mxu0 %vm3366_vm3, %v8225_v15 }
 0x51e   : > { %v3815_v63 = vpop.f32.mrb[0].mxu1 }
 0x51f   : > { %v3816_v12 = vpop.f32.mrb[1].mxu1 }
 0x520   : > { %v3817_v13 = vadd.f32 %v3816_v12, %v3815_v63 }
 0x521   : > { %v3777_v8 = vpop.f32.mrb[0].mxu0 }
 0x522   : > { %v3778_v41 = vpop.f32.mrb[1].mxu0  ;;  %v3818_v36 = vpop.f32.mrb[2].mxu1 }
 0x523   : > { %v3779_v35 = vadd.f32 %v3778_v41, %v3777_v8  ;;  %v3819_v52 = vpop.f32.mrb[3].mxu1 }
 0x524   : > { %v3820_v30 = vadd.f32 %v3819_v52, %v3818_v36 }
 0x525   : > { %v3528_v49 = vadd.f32 %v3817_v13, %v3779_v35  ;;  %v3780_v55 = vpop.f32.mrb[2].mxu0 }
 0x526   : > { %v3781_v31 = vpop.f32.mrb[3].mxu0 }
 0x527   : > { %3536 = vst [vmem:[%s237_s27] sm:$0xff] %v3528_v49  ;;  %v3782_v62 = vadd.f32 %v3781_v31, %v3780_v55 }
 0x529   : > { %v3533_v5 = vadd.f32 %v3820_v30, %v3782_v62 }
 0x52b   : > { %3537 = vst [vmem:[%s237_s27 + $0x8] sm:$0xff] %v3533_v5 }
 0x52c   : > { %4488 = shalt.err (!%p4485_p4)
}
 0x52d   : > { %s4489_s11 = scalar_lea.hbm %s7554_s6, 256  ;;  %s4493_s14 = scalar_lea.hbm %s7601_s4, 768 }
 0x52e   : > { %p4490_p7 = scmp.ne.s32.totalorder %s7554_s6, %s4489_s11  ;;  %p4494_p10 = scmp.lt.u32.totalorder %s7554_s6, %s7601_s4 }
 0x52f   : > { %p4495_p11 = scmp.lt.u32.totalorder %s4493_s14, %s4489_s11  ;;  %p4497_p13 = scmp.lt.u32.totalorder %s4489_s11, %s7554_s6 }
 0x530   : > { %p4491_p8 = pnand %p4490_p7, %p4608_p5 }
 0x531   : > { %p4496_p12 = por %p4495_p11, %p4494_p10 }
 0x532   : > { %p4492_p9 = pneg %p4491_p8 }
 0x533   : > { %p4498_p0 = por %p4497_p13, %p4496_p12 }
 0x535   : > { %p4499_p1 = pnand %p4498_p0, %p4492_p9 }
 0x537   : > { %4502 = shalt.err (!%p4499_p1)
}
 0x538   : > { %s4543_s23 = smov 128   ;;  %s4544_s27 = smov 8  }
 0x539   : > { %3885 = dma.vmem_to_hbm [thread:$0]  (%p4608_p5), %s7549_s28, 256, %s7554_s6, %s7556_s7, %s4543_s23, %s4543_s23, %s4544_s27  }
 0x53a PF: > { %p3891_p2 = scmp.ge.s32.totalorder %s4537_s18, 2  ;;  %s3567_s29 = sand.u32 1, %s4525_s15  }
 0x53b   : > { %s3568_s30 = scalar_lea.sflag [#allocation3], %s3567_s29 }
 0x53c   : > { %p3888_p3 = pnand %p3891_p2, %p4612_p6 }
 0x53e   : > { %4520 = dma.done.wait (!%p3888_p3), %s3568_s30, 256  }
 0x53f   : > { %4522 = vsyncadd (!%p3888_p3), %s3568_s30, 4294967040  ;;  %p14_p4 = scmp.ge.s32.totalorder %s4595_s21, 5   ;;  %s8230_s15 = smov %s4529_s16 }
 0x540   : > { %s8231_s16 = smov %s4533_s17  ;;  %s8232_s17 = smov %s4606_s24 }
 0x541   : > { %s8233_s18 = smov %s4595_s21  ;;  %16 = sbr.rel (!%p14_p4) target bundleno = 3 (0x3), region = 80 }
 0x548   :  { %3573 = vsyncpa [#allocation3], 1 }
 0x549   :  { %3575 = vsyncpa [#allocation3 + $0x1], 1 }

</bundles_post_ra>
